<compile_context>
chip_gen: v7x
topology: tpu7x:2x2x1
jax: 0.10.0
libtpu: 0.0.40
codegen_flags: <defaults>
</compile_context>

<pallas_src>
import functools

import jax
import jax.numpy as jnp
import numpy as np
from jax import lax
from jax.experimental import pallas as pl
from jax.experimental.pallas import tpu as pltpu


def _round_up(x, m):
    return (x + m - 1) // m * m


def _matmul_bias_kernel(x_ref, w_ref, b_ref, o_ref):
    # x_ref: [TM, Kd] bf16, w_ref: [Kd, Npad] bf16, b_ref: [1, Npad] f32,
    # o_ref: [TM, Npad] (bf16 for inner layers, f32 for the last layer).
    # One MXU dot per M-tile, f32 accumulation, bias add in f32, one cast at
    # the store so the store path stays lane-dense and cheap.
    acc = jnp.dot(x_ref[...], w_ref[...], preferred_element_type=jnp.float32)
    o_ref[...] = (acc + b_ref[...]).astype(o_ref.dtype)


@functools.lru_cache()
def _arch_config():
    """Returns (tm_cap, want_even_grid, vmem_budget_bytes) per TPU generation.

    tm_cap: tallest M tile we aim for.  v5-and-older (128x128 MXU class) keep
    128; v6e (2x256 MXU, 128 MiB physical VMEM) goes to 512 so the tall M tile
    makes up for N being stuck at 128; v7x stays at 256 because it has only
    64 MiB physical VMEM per TensorCore.  want_even_grid: v7x shards the 1-D
    grid across 2 TensorCores, so an even step count avoids idling one core.
    The VMEM budget is enforced below, so an unrecognized device kind just
    falls back to a safe middle ground instead of an unchecked hardcode.
    """
    try:
        kind = jax.devices()[0].device_kind.lower()
    except Exception:
        kind = ""
    if any(t in kind for t in ("v2", "v3", "v4", "v5")):
        return 128, False, 12 * 1024 * 1024
    if "v6" in kind:
        return 512, False, 24 * 1024 * 1024
    if "v7" in kind:
        return 256, True, 20 * 1024 * 1024
    return 256, False, 16 * 1024 * 1024


def _choose_tiling(M, Kd, Npad, out_itemsize):
    tm_cap, even_grid, vmem_budget = _arch_config()

    def footprint(tm):
        # double-buffered bf16 patch tile + (conservatively double-buffered)
        # resident bf16 weights + bias + double-buffered output tile
        return (2 * tm * Kd * 2 + 2 * Kd * Npad * 2 + 2 * Npad * 4
                + 2 * tm * Npad * out_itemsize)

    while tm_cap > 16 and footprint(tm_cap) > vmem_budget:
        tm_cap //= 2

    n_steps = max(pl.cdiv(M, tm_cap), 1)
    if even_grid and n_steps > 1 and n_steps % 2:
        n_steps += 1                      # even grid -> both v7x TCs get work
    tm = _round_up(pl.cdiv(M, n_steps), 16)   # 16 = bf16 sublane packing
    m_pad = _round_up(M, tm)
    return tm, m_pad


def _im2col_nhwc(x, k, stride):
    """Gather-free im2col.  x: [B,H,W,C] -> patches [B*OH*OW, C*KH*KW].

    lax.conv_general_dilated_patches orders the patch feature dim as
    (ci, kh, kw) (channel slowest), so the weight reshape below must match.
    """
    B, H, W, C = x.shape
    OH = (H - k) // stride + 1
    OW = (W - k) // stride + 1
    p = lax.conv_general_dilated_patches(
        x, filter_shape=(k, k), window_strides=(stride, stride),
        padding="VALID", dimension_numbers=("NHWC", "HWIO", "NHWC"))
    return p.reshape(B * OH * OW, C * k * k), OH, OW


def conv2d_pallas_nhwc(x, weight, bias, stride, *, out_dtype=jnp.float32):
    """Strided VALID Conv2d.  x: [B,H,W,Cin], weight: [Cout,Cin,K,K] (torch
    OIHW), bias: [Cout].  Returns [B,OH,OW,Cout] in out_dtype."""
    B, H, W, Cin = x.shape
    Cout, _, K, _ = weight.shape

    # im2col in bf16 (MXU-native, half the HBM bytes of f32).
    patches, OH, OW = _im2col_nhwc(x.astype(jnp.bfloat16), K, stride)   # [M, Kd]
    M, Kd = patches.shape

    # (ci, kh, kw) weight flattening matches the patch layout; pad Cout to a
    # multiple of 128 so output stores are lane-dense.
    Npad = _round_up(Cout, 128)
    w2d = weight.astype(jnp.bfloat16).transpose(1, 2, 3, 0).reshape(Kd, Cout)
    if Npad != Cout:
        w2d = jnp.pad(w2d, ((0, 0), (0, Npad - Cout)))
    b2d = jnp.pad(bias.astype(jnp.float32), (0, Npad - Cout)).reshape(1, Npad)

    out_itemsize = jnp.dtype(out_dtype).itemsize
    TM, M_pad = _choose_tiling(M, Kd, Npad, out_itemsize)
    if M_pad != M:
        patches = jnp.pad(patches, ((0, M_pad - M), (0, 0)))
    grid = (M_pad // TM,)

    cost = pl.CostEstimate(
        flops=2 * M_pad * Kd * Npad,
        transcendentals=0,
        bytes_accessed=(M_pad * Kd * 2 + Kd * Npad * 2 + Npad * 4
                        + M_pad * Npad * out_itemsize),
    )

    out = pl.pallas_call(
        _matmul_bias_kernel,
        out_shape=jax.ShapeDtypeStruct((M_pad, Npad), out_dtype),
        grid=grid,
        in_specs=[
            pl.BlockSpec((TM, Kd), lambda i: (i, 0)),       # patches: tiled over M
            pl.BlockSpec((Kd, Npad), lambda i: (0, 0)),     # weights: resident
            pl.BlockSpec((1, Npad), lambda i: (0, 0)),      # bias: resident
        ],
        out_specs=pl.BlockSpec((TM, Npad), lambda i: (i, 0)),
        compiler_params=pltpu.CompilerParams(
            dimension_semantics=("parallel",),
            vmem_limit_bytes=32 * 1024 * 1024,
        ),
        cost_estimate=cost,
    )(patches, w2d, b2d)

    return out[:M, :Cout].reshape(B, OH, OW, Cout)


def init_params(key):
    # Deterministic synthetic init (PyTorch-style uniform bounds, not a checkpoint).
    keys = jax.random.split(key, 6)

    def conv_param(kw, kb, cout, cin, k):
        fan_in = cin * k * k
        bound = 1.0 / np.sqrt(fan_in)
        w = jax.random.uniform(kw, (cout, cin, k, k), jnp.float32, -bound, bound)
        b = jax.random.uniform(kb, (cout,), jnp.float32, -bound, bound)
        return w, b

    w1, b1 = conv_param(keys[0], keys[1], 32, 3, 32)    # Conv2d(3, 32, 32, stride=2)
    w2, b2 = conv_param(keys[2], keys[3], 64, 32, 8)    # Conv2d(32, 64, 8, stride=2)
    w3, b3 = conv_param(keys[4], keys[5], 128, 64, 2)   # Conv2d(64, 128, 2, stride=2)
    return (w1, b1), (w2, b2), (w3, b3)


def conv_forward(params, image_stack):
    (w1, b1), (w2, b2), (w3, b3) = params
    x = jnp.transpose(image_stack, (0, 2, 3, 1))        # NCHW -> NHWC (boundary only)
    # Inner layers emit bf16 (next layer consumes bf16 anyway); last layer f32.
    x = conv2d_pallas_nhwc(x, w1, b1, stride=2, out_dtype=jnp.bfloat16)
    x = conv2d_pallas_nhwc(x, w2, b2, stride=2, out_dtype=jnp.bfloat16)
    x = conv2d_pallas_nhwc(x, w3, b3, stride=2, out_dtype=jnp.float32)
    return jnp.transpose(x, (0, 3, 1, 2))               # NHWC -> NCHW (boundary only)


if __name__ == "__main__":
    key = jax.random.PRNGKey(0)
    pkey, xkey = jax.random.split(key)
    params = init_params(pkey)

    # Smallest convenient input that survives kernels (32, 8, 2) with stride 2:
    # 64x64 -> 17x17 -> 5x5 -> 2x2
    image_stack = jax.random.normal(xkey, (2, 3, 64, 64), jnp.float32)

    out = jax.jit(conv_forward)(params, image_stack)
    out = jax.block_until_ready(out)
    assert out.shape == (2, 128, 2, 2), out.shape

    # Reference: XLA conv with matching numerics (bf16 operands, f32 accumulate;
    # the bf16 cast of intermediates happens at the consumer, same values).
    def ref_conv(x, w, b, s):
        y = lax.conv_general_dilated(
            x.astype(jnp.bfloat16), w.astype(jnp.bfloat16), (s, s), "VALID",
            dimension_numbers=("NCHW", "OIHW", "NCHW"),
            preferred_element_type=jnp.float32,
        )
        return y + b[None, :, None, None]

    (w1, b1), (w2, b2), (w3, b3) = params
    ref = ref_conv(ref_conv(ref_conv(image_stack, w1, b1, 2), w2, b2, 2), w3, b3, 2)
    np.testing.assert_allclose(np.asarray(out), np.asarray(ref), rtol=2e-2, atol=2e-2)

    print("KERNEL_OK")
</pallas_src>

<mosaic_0001>
module attributes {stable_mosaic.version = 11 : i64} {
  func.func @_matmul_bias_kernel(%arg0: i32, %arg1: memref<208x3072xbf16, #tpu.memory_space<vmem>>, %arg2: memref<3072x128xbf16, #tpu.memory_space<vmem>>, %arg3: memref<1x128xf32, #tpu.memory_space<vmem>>, %arg4: memref<208x128xbf16, #tpu.memory_space<vmem>>) attributes {dimension_semantics = [#tpu.dimension_semantics<parallel>], iteration_bounds = array<i64: 3>, scalar_prefetch = 0 : i64, scratch_operands = 0 : i64, tpu.core_type = #tpu.core_type<tc>, window_params = [{transform_indices = @transform_0, window_bounds = array<i64: 208, 3072>}, {pipeline_mode = #tpu.pipeline_mode<synchronous>, transform_indices = @transform_1, window_bounds = array<i64: 3072, 128>}, {pipeline_mode = #tpu.pipeline_mode<synchronous>, transform_indices = @transform_2, window_bounds = array<i64: 1, 128>}, {transform_indices = @transform_3, window_bounds = array<i64: 208, 128>}]} {
    %c0 = arith.constant 0 : index
    %c0_0 = arith.constant 0 : index
    %0 = vector.load %arg1[%c0, %c0_0] : memref<208x3072xbf16, #tpu.memory_space<vmem>>, vector<208x3072xbf16>
    %c0_1 = arith.constant 0 : index
    %c0_2 = arith.constant 0 : index
    %1 = vector.load %arg2[%c0_1, %c0_2] : memref<3072x128xbf16, #tpu.memory_space<vmem>>, vector<3072x128xbf16>
    %cst = arith.constant dense<0.000000e+00> : vector<208x128xf32>
    %2 = tpu.matmul %0, %1, %cst {dimension_numbers = #tpu.dot_dimension_numbers<[1], [0], [0], [1], [0, 0, 1, 1], [], []>} : vector<208x3072xbf16>, vector<3072x128xbf16>, vector<208x128xf32> -> vector<208x128xf32>
    %c0_3 = arith.constant 0 : index
    %c0_4 = arith.constant 0 : index
    %3 = vector.load %arg3[%c0_3, %c0_4] : memref<1x128xf32, #tpu.memory_space<vmem>>, vector<1x128xf32>
    %4 = vector.broadcast %3 : vector<1x128xf32> to vector<208x128xf32>
    %5 = arith.addf %2, %4 : vector<208x128xf32>
    %6 = arith.truncf %5 : vector<208x128xf32> to vector<208x128xbf16>
    %c0_5 = arith.constant 0 : index
    %c0_6 = arith.constant 0 : index
    %7 = vector.load %arg4[%c0_5, %c0_6] : memref<208x128xbf16, #tpu.memory_space<vmem>>, vector<208x128xbf16>
    tpu.vector_store %arg4[%c0_5, %c0_6], %6 {strides = array<i32>} : memref<208x128xbf16, #tpu.memory_space<vmem>>, vector<208x128xbf16>,
    return
  }
  func.func @transform_0(%arg0: i32) -> (i32, i32) {
    %c0_i32 = arith.constant 0 : i32
    %c0_i32_0 = arith.constant 0 : i32
    return %arg0, %c0_i32 : i32, i32
  }
  func.func @transform_1(%arg0: i32) -> (i32, i32) {
    %c0_i32 = arith.constant 0 : i32
    %c0_i32_0 = arith.constant 0 : i32
    %c0_i32_1 = arith.constant 0 : i32
    return %c0_i32, %c0_i32_0 : i32, i32
  }
  func.func @transform_2(%arg0: i32) -> (i32, i32) {
    %c0_i32 = arith.constant 0 : i32
    %c0_i32_0 = arith.constant 0 : i32
    %c0_i32_1 = arith.constant 0 : i32
    return %c0_i32, %c0_i32_0 : i32, i32
  }
  func.func @transform_3(%arg0: i32) -> (i32, i32) {
    %c0_i32 = arith.constant 0 : i32
    %c0_i32_0 = arith.constant 0 : i32
    return %arg0, %c0_i32 : i32, i32
  }
}

module attributes {stable_mosaic.version = 11 : i64} {
  func.func @_matmul_bias_kernel(%arg0: i32, %arg1: memref<64x2048xbf16, #tpu.memory_space<vmem>>, %arg2: memref<2048x128xbf16, #tpu.memory_space<vmem>>, %arg3: memref<1x128xf32, #tpu.memory_space<vmem>>, %arg4: memref<64x128xbf16, #tpu.memory_space<vmem>>) attributes {dimension_semantics = [#tpu.dimension_semantics<parallel>], iteration_bounds = array<i64: 1>, scalar_prefetch = 0 : i64, scratch_operands = 0 : i64, tpu.core_type = #tpu.core_type<tc>, window_params = [{transform_indices = @transform_0, window_bounds = array<i64: 64, 2048>}, {pipeline_mode = #tpu.pipeline_mode<synchronous>, transform_indices = @transform_1, window_bounds = array<i64: 2048, 128>}, {pipeline_mode = #tpu.pipeline_mode<synchronous>, transform_indices = @transform_2, window_bounds = array<i64: 1, 128>}, {transform_indices = @transform_3, window_bounds = array<i64: 64, 128>}]} {
    %c0 = arith.constant 0 : index
    %c0_0 = arith.constant 0 : index
    %0 = vector.load %arg1[%c0, %c0_0] : memref<64x2048xbf16, #tpu.memory_space<vmem>>, vector<64x2048xbf16>
    %c0_1 = arith.constant 0 : index
    %c0_2 = arith.constant 0 : index
    %1 = vector.load %arg2[%c0_1, %c0_2] : memref<2048x128xbf16, #tpu.memory_space<vmem>>, vector<2048x128xbf16>
    %cst = arith.constant dense<0.000000e+00> : vector<64x128xf32>
    %2 = tpu.matmul %0, %1, %cst {dimension_numbers = #tpu.dot_dimension_numbers<[1], [0], [0], [1], [0, 0, 1, 1], [], []>} : vector<64x2048xbf16>, vector<2048x128xbf16>, vector<64x128xf32> -> vector<64x128xf32>
    %c0_3 = arith.constant 0 : index
    %c0_4 = arith.constant 0 : index
    %3 = vector.load %arg3[%c0_3, %c0_4] : memref<1x128xf32, #tpu.memory_space<vmem>>, vector<1x128xf32>
    %4 = vector.broadcast %3 : vector<1x128xf32> to vector<64x128xf32>
    %5 = arith.addf %2, %4 : vector<64x128xf32>
    %6 = arith.truncf %5 : vector<64x128xf32> to vector<64x128xbf16>
    %c0_5 = arith.constant 0 : index
    %c0_6 = arith.constant 0 : index
    %7 = vector.load %arg4[%c0_5, %c0_6] : memref<64x128xbf16, #tpu.memory_space<vmem>>, vector<64x128xbf16>
    tpu.vector_store %arg4[%c0_5, %c0_6], %6 {strides = array<i32>} : memref<64x128xbf16, #tpu.memory_space<vmem>>, vector<64x128xbf16>,
    return
  }
  func.func @transform_0(%arg0: i32) -> (i32, i32) {
    %c0_i32 = arith.constant 0 : i32
    %c0_i32_0 = arith.constant 0 : i32
    return %arg0, %c0_i32 : i32, i32
  }
  func.func @transform_1(%arg0: i32) -> (i32, i32) {
    %c0_i32 = arith.constant 0 : i32
    %c0_i32_0 = arith.constant 0 : i32
    %c0_i32_1 = arith.constant 0 : i32
    return %c0_i32, %c0_i32_0 : i32, i32
  }
  func.func @transform_2(%arg0: i32) -> (i32, i32) {
    %c0_i32 = arith.constant 0 : i32
    %c0_i32_0 = arith.constant 0 : i32
    %c0_i32_1 = arith.constant 0 : i32
    return %c0_i32, %c0_i32_0 : i32, i32
  }
  func.func @transform_3(%arg0: i32) -> (i32, i32) {
    %c0_i32 = arith.constant 0 : i32
    %c0_i32_0 = arith.constant 0 : i32
    return %arg0, %c0_i32 : i32, i32
  }
}

module attributes {stable_mosaic.version = 11 : i64} {
  func.func @_matmul_bias_kernel(%arg0: i32, %arg1: memref<16x256xbf16, #tpu.memory_space<vmem>>, %arg2: memref<256x128xbf16, #tpu.memory_space<vmem>>, %arg3: memref<1x128xf32, #tpu.memory_space<vmem>>, %arg4: memref<16x128xf32, #tpu.memory_space<vmem>>) attributes {dimension_semantics = [#tpu.dimension_semantics<parallel>], iteration_bounds = array<i64: 1>, scalar_prefetch = 0 : i64, scratch_operands = 0 : i64, tpu.core_type = #tpu.core_type<tc>, window_params = [{transform_indices = @transform_0, window_bounds = array<i64: 16, 256>}, {pipeline_mode = #tpu.pipeline_mode<synchronous>, transform_indices = @transform_1, window_bounds = array<i64: 256, 128>}, {pipeline_mode = #tpu.pipeline_mode<synchronous>, transform_indices = @transform_2, window_bounds = array<i64: 1, 128>}, {transform_indices = @transform_3, window_bounds = array<i64: 16, 128>}]} {
    %c0 = arith.constant 0 : index
    %c0_0 = arith.constant 0 : index
    %0 = vector.load %arg1[%c0, %c0_0] : memref<16x256xbf16, #tpu.memory_space<vmem>>, vector<16x256xbf16>
    %c0_1 = arith.constant 0 : index
    %c0_2 = arith.constant 0 : index
    %1 = vector.load %arg2[%c0_1, %c0_2] : memref<256x128xbf16, #tpu.memory_space<vmem>>, vector<256x128xbf16>
    %cst = arith.constant dense<0.000000e+00> : vector<16x128xf32>
    %2 = tpu.matmul %0, %1, %cst {dimension_numbers = #tpu.dot_dimension_numbers<[1], [0], [0], [1], [0, 0, 1, 1], [], []>} : vector<16x256xbf16>, vector<256x128xbf16>, vector<16x128xf32> -> vector<16x128xf32>
    %c0_3 = arith.constant 0 : index
    %c0_4 = arith.constant 0 : index
    %3 = vector.load %arg3[%c0_3, %c0_4] : memref<1x128xf32, #tpu.memory_space<vmem>>, vector<1x128xf32>
    %4 = vector.broadcast %3 : vector<1x128xf32> to vector<16x128xf32>
    %5 = arith.addf %2, %4 : vector<16x128xf32>
    %c0_5 = arith.constant 0 : index
    %c0_6 = arith.constant 0 : index
    %6 = vector.load %arg4[%c0_5, %c0_6] : memref<16x128xf32, #tpu.memory_space<vmem>>, vector<16x128xf32>
    tpu.vector_store %arg4[%c0_5, %c0_6], %5 {strides = array<i32>} : memref<16x128xf32, #tpu.memory_space<vmem>>, vector<16x128xf32>,
    return
  }
  func.func @transform_0(%arg0: i32) -> (i32, i32) {
    %c0_i32 = arith.constant 0 : i32
    %c0_i32_0 = arith.constant 0 : i32
    return %arg0, %c0_i32 : i32, i32
  }
  func.func @transform_1(%arg0: i32) -> (i32, i32) {
    %c0_i32 = arith.constant 0 : i32
    %c0_i32_0 = arith.constant 0 : i32
    %c0_i32_1 = arith.constant 0 : i32
    return %c0_i32, %c0_i32_0 : i32, i32
  }
  func.func @transform_2(%arg0: i32) -> (i32, i32) {
    %c0_i32 = arith.constant 0 : i32
    %c0_i32_0 = arith.constant 0 : i32
    %c0_i32_1 = arith.constant 0 : i32
    return %c0_i32, %c0_i32_0 : i32, i32
  }
  func.func @transform_3(%arg0: i32) -> (i32, i32) {
    %c0_i32 = arith.constant 0 : i32
    %c0_i32_0 = arith.constant 0 : i32
    return %arg0, %c0_i32 : i32, i32
  }
}

</mosaic_0001>

<bundles_post_ra>
// kernel: conv_forward.3
= control target key start
LH: loop header
LB: loop body
LE: loop exit
PB: predicated region body
PF: predicated region fallthrough
CT: control target
= control target key end

     0   :  { %s7423_s12 = smov 0   ;;  %s8960_s0 = inlined_call_operand.vmem [shape: bf16[624,3072], index: 0, kind: input, shape index: {}]   ;;  %s8961_s1 = inlined_call_operand.vmem [shape: bf16[3072,128], index: 1, kind: input, shape index: {}]   ;;  %s8962_s2 = inlined_call_operand.vmem [shape: f32[1,128], index: 2, kind: input, shape index: {}]   ;;  %s8963_s3 = inlined_call_operand.vmem [shape: bf16[624,128], index: 3, kind: output, shape index: {}]  }
   0x1 LB: > { %s5423_s13 = sadd.s32 4294967295, %s7401_s12   ;;  %p5427_p0 = scmp.ge.s32.totalorder %s7401_s12, 1  ;;  %s7401_s12 = sphi %s7423_s12, %s13_s12  }
   0x2   : > { %p139_p1 = scmp.lt.s32.totalorder %s7401_s12, 4 }
   0x4   : > { %p140_p2 = pnand %p5427_p0, %p139_p1 }
   0x5   : > { %v7203_v0 = vld [vmem:[%s8961_s1 + $0x40] sm:$0xff] (!%p140_p2)   ;;  %v7207_v4 = vld [vmem:[%s8961_s1 + $0x48] sm:$0xff] (!%p140_p2)   ;;  %v7211_v8 = vld [vmem:[%s8961_s1 + $0x50] sm:$0xff] (!%p140_p2)   ;;  %s164_s17 = smul.u32 (!%p140_p2), 26, %s5423_s13 }
   0x6   : > { %143 = sbr.rel (%p140_p2) target bundleno = 879 (0x36f), region = 32  ;;  %v7204_v1 = vld [vmem:[%s8961_s1 + $0xc0] sm:$0xff] (!%p140_p2)   ;;  %6066 = vmatprep.subr.bf16.mxu0 (!%p140_p2), %v7203_v0  ;;  %v7208_v5 = vld [vmem:[%s8961_s1 + $0xc8] sm:$0xff] (!%p140_p2)   ;;  %v7212_v9 = vld [vmem:[%s8961_s1 + $0xd0] sm:$0xff] (!%p140_p2)  }
   0x7   : > { %v7205_v2 = vld [vmem:[%s8961_s1] sm:$0xff] (!%p140_p2)   ;;  %6160 = vmatprep.subr.bf16.mxu1 (!%p140_p2), %v7204_v1  ;;  %v7209_v6 = vld [vmem:[%s8961_s1 + $0x8] sm:$0xff] (!%p140_p2)   ;;  %v7213_v10 = vld [vmem:[%s8961_s1 + $0x10] sm:$0xff] (!%p140_p2)   ;;  %p165_p3 = scmp.lt.s32.totalorder (!%p140_p2), %s164_s17, 77 }
   0x8   : > { %v7206_v3 = vld [vmem:[%s8961_s1 + $0x80] sm:$0xff] (!%p140_p2)   ;;  %6067 = vmatpush3.bf16.msra.mxu0 (!%p140_p2), %v7205_v2  ;;  %v7210_v7 = vld [vmem:[%s8961_s1 + $0x88] sm:$0xff] (!%p140_p2)   ;;  %v7214_v11 = vld [vmem:[%s8961_s1 + $0x90] sm:$0xff] (!%p140_p2)  }
   0x9   : > { %6161 = vmatpush3.bf16.msra.mxu1 (!%p140_p2), %v7206_v3  ;;  %6068 = vmatprep.subr.bf16.mxu0 (!%p140_p2), %v7207_v4  ;;  %v7215_v12 = vld [vmem:[%s8961_s1 + $0x58] sm:$0xff] (!%p140_p2)   ;;  %v7219_v16 = vld [vmem:[%s8961_s1 + $0x60] sm:$0xff] (!%p140_p2)   ;;  %v7223_v20 = vld [vmem:[%s8961_s1 + $0x68] sm:$0xff] (!%p140_p2)  }
   0xa   : > { %6162 = vmatprep.subr.bf16.mxu1 (!%p140_p2), %v7208_v5  ;;  %v7216_v13 = vld [vmem:[%s8961_s1 + $0xd8] sm:$0xff] (!%p140_p2)   ;;  %v7220_v17 = vld [vmem:[%s8961_s1 + $0xe0] sm:$0xff] (!%p140_p2)   ;;  %v7224_v21 = vld [vmem:[%s8961_s1 + $0xe8] sm:$0xff] (!%p140_p2)  }
   0xb   : > { %v7217_v14 = vld [vmem:[%s8961_s1 + $0x18] sm:$0xff] (!%p140_p2)   ;;  %v7221_v18 = vld [vmem:[%s8961_s1 + $0x20] sm:$0xff] (!%p140_p2)   ;;  %v7225_v22 = vld [vmem:[%s8961_s1 + $0x28] sm:$0xff] (!%p140_p2)  }
   0xc   : > { %6069 = vmatpush3.bf16.msra.mxu0 (!%p140_p2), %v7209_v6  ;;  %v7218_v15 = vld [vmem:[%s8961_s1 + $0x98] sm:$0xff] (!%p140_p2)   ;;  %v7222_v19 = vld [vmem:[%s8961_s1 + $0xa0] sm:$0xff] (!%p140_p2)   ;;  %v7226_v23 = vld [vmem:[%s8961_s1 + $0xa8] sm:$0xff] (!%p140_p2)  }
   0xd   : > { %6163 = vmatpush3.bf16.msra.mxu1 %v7210_v7  ;;  %6070 = vmatprep.subr.bf16.mxu0 %v7211_v8  ;;  %s8965_s17 = smov (!%p165_p3, %s164_s17), 77  ;;  %v7227_v24 = vld [vmem:[%s8961_s1 + $0x70] sm:$0xff]   ;;  %v7231_v28 = vld [vmem:[%s8961_s1 + $0x78] sm:$0xff]   ;;  %v7235_v40 = vld [vmem:[%s8961_s1 + $0x140] sm:$0xff]  }
   0xe   : > { %6164 = vmatprep.subr.bf16.mxu1 %v7212_v9  ;;  %v7228_v25 = vld [vmem:[%s8961_s1 + $0xf0] sm:$0xff]   ;;  %s7194_s16 = smul.u32 96, %s8965_s17  ;;  %v7232_v29 = vld [vmem:[%s8961_s1 + $0xf8] sm:$0xff]   ;;  %v7236_v41 = vld [vmem:[%s8961_s1 + $0x100] sm:$0xff]  }
   0xf   : > { %v7229_v26 = vld [vmem:[%s8961_s1 + $0x30] sm:$0xff]   ;;  %v7233_v30 = vld [vmem:[%s8961_s1 + $0x38] sm:$0xff]   ;;  %v7237_v42 = vld [vmem:[%s8961_s1 + $0x1c0] sm:$0xff]  }
  0x10   : > { %6071 = vmatpush3.bf16.msra.mxu0 %v7213_v10  ;;  %v7230_v27 = vld [vmem:[%s8961_s1 + $0xb0] sm:$0xff]   ;;  %s7529_s27 = scalar_lea.vmem %s8960_s0, %s7194_s16  ;;  %v7234_v31 = vld [vmem:[%s8961_s1 + $0xb8] sm:$0xff]   ;;  %v7238_v43 = vld [vmem:[%s8961_s1 + $0x180] sm:$0xff]  }
  0x11   : > { %6165 = vmatpush3.bf16.msra.mxu1 %v7214_v11  ;;  %6072 = vmatprep.subr.bf16.mxu0 %v7215_v12  ;;  %v178_v32 = vld [vmem:[%s7529_s27] sm:$0xff]  ;;  %v179_v34 = vld [vmem:[%s7529_s27 + $0x8] sm:$0xff]  ;;  %v7243_v2 = vld [vmem:[%s8961_s1 + $0x150] sm:$0xff]  }
  0x12   : > { %6166 = vmatprep.subr.bf16.mxu1 %v7216_v13  ;;  %v190_v33 = vld [vmem:[%s7529_s27 + $0x60] sm:$0xff]  ;;  %v191_v37 = vld [vmem:[%s7529_s27 + $0x68] sm:$0xff]  ;;  %v7244_v3 = vld [vmem:[%s8961_s1 + $0x110] sm:$0xff]  }
  0x13   : > { %v5431_v35 = vcombine.low %v178_v32, %v190_v33  ;;  %v5432_v36 = vcombine.high %v178_v32, %v190_v33  ;;  %v5433_v38 = vcombine.low %v179_v34, %v191_v37  ;;  %v5434_v39 = vcombine.high %v179_v34, %v191_v37  ;;  %v202_v44 = vld [vmem:[%s7529_s27 + $0xc0] sm:$0xff]  ;;  %v203_v47 = vld [vmem:[%s7529_s27 + $0xc8] sm:$0xff]  ;;  %v7245_v5 = vld [vmem:[%s8961_s1 + $0x1d0] sm:$0xff]  }
  0x14   : > { %6073 = vmatpush3.bf16.msra.mxu0 %v7217_v14  ;;  %v214_v45 = vld [vmem:[%s7529_s27 + $0x120] sm:$0xff]  ;;  %v215_v48 = vld [vmem:[%s7529_s27 + $0x128] sm:$0xff]  ;;  %v7246_v8 = vld [vmem:[%s8961_s1 + $0x190] sm:$0xff]  }
  0x15   : > { %6167 = vmatpush3.bf16.msra.mxu1 %v7218_v15  ;;  %6074 = vmatprep.subr.bf16.mxu0 %v7219_v16  ;;  %v5456_v46 = vcombine.high %v202_v44, %v214_v45  ;;  %v5458_v49 = vcombine.high %v203_v47, %v215_v48  ;;  %v7239_v50 = vld [vmem:[%s8961_s1 + $0x148] sm:$0xff]   ;;  %v5455_v51 = vcombine.low %v202_v44, %v214_v45  ;;  %v226_v53 = vld [vmem:[%s7529_s27 + $0x180] sm:$0xff]  ;;  %v7247_v12 = vld [vmem:[%s8961_s1 + $0x158] sm:$0xff]  }
  0x16   : > { %6168 = vmatprep.subr.bf16.mxu1 %v7220_v17  ;;  %3625 = vmatprep.mubr.bf16.mxu0 %v5432_v36  ;;  %v7240_v52 = vld [vmem:[%s8961_s1 + $0x108] sm:$0xff]   ;;  %v5457_v54 = vcombine.low %v203_v47, %v215_v48  ;;  %v238_v55 = vld [vmem:[%s7529_s27 + $0x1e0] sm:$0xff]  ;;  %v7248_v15 = vld [vmem:[%s8961_s1 + $0x118] sm:$0xff]  }
  0x17   : > { %3762 = vmatprep.mubr.bf16.mxu1 %v5434_v39  ;;  %v227_v56 = vld [vmem:[%s7529_s27 + $0x188] sm:$0xff]  ;;  %v5480_v58 = vcombine.high %v226_v53, %v238_v55  ;;  %v250_v62 = vld [vmem:[%s7529_s27 + $0x240] sm:$0xff]  ;;  %v5479_v4 = vcombine.low %v226_v53, %v238_v55  ;;  %v7249_v16 = vld [vmem:[%s8961_s1 + $0x1d8] sm:$0xff]  }
  0x18   : > { %6075 = vmatpush3.bf16.msra.mxu0 %v7221_v18  ;;  %v239_v57 = vld [vmem:[%s7529_s27 + $0x1e8] sm:$0xff]  ;;  %v262_v63 = vld [vmem:[%s7529_s27 + $0x2a0] sm:$0xff]  ;;  %v7250_v17 = vld [vmem:[%s8961_s1 + $0x198] sm:$0xff]  }
  0x19   : > { %6169 = vmatpush3.bf16.msra.mxu1 %v7222_v19  ;;  %6076 = vmatprep.subr.bf16.mxu0 %v7223_v20  ;;  %v5482_v59 = vcombine.high %v227_v56, %v239_v57  ;;  %v7241_v60 = vld [vmem:[%s8961_s1 + $0x1c8] sm:$0xff]   ;;  %v5481_v6 = vcombine.low %v227_v56, %v239_v57  ;;  %v5504_v7 = vcombine.high %v250_v62, %v262_v63  ;;  %v274_v10 = vld [vmem:[%s7529_s27 + $0x300] sm:$0xff]  ;;  %v7260_v44 = vld [vmem:[%s8961_s1 + $0x130] sm:$0xff]  }
  0x1a   : > { %6170 = vmatprep.subr.bf16.mxu1 %v7224_v21  ;;  %v7242_v61 = vld [vmem:[%s8961_s1 + $0x188] sm:$0xff]   ;;  %v286_v11 = vld [vmem:[%s7529_s27 + $0x360] sm:$0xff]  ;;  %v5503_v18 = vcombine.low %v250_v62, %v262_v63  ;;  %v7261_v47 = vld [vmem:[%s8961_s1 + $0x1f0] sm:$0xff]  }
  0x1b   : > { %v251_v0 = vld [vmem:[%s7529_s27 + $0x248] sm:$0xff]  ;;  %v5528_v20 = vcombine.high %v274_v10, %v286_v11  ;;  %v334_v39 = vld [vmem:[%s7529_s27 + $0x4e0] sm:$0xff]  ;;  %v7264_v55 = vld [vmem:[%s8961_s1 + $0x138] sm:$0xff]  }
  0x1c   : > { %6077 = vmatpush3.bf16.msra.mxu0 %v7225_v22  ;;  %v263_v1 = vld [vmem:[%s7529_s27 + $0x2a8] sm:$0xff]  ;;  %v7251_v22 = vld [vmem:[%s8961_s1 + $0x160] sm:$0xff]   ;;  %v7265_v56 = vld [vmem:[%s8961_s1 + $0x1f8] sm:$0xff]  }
  0x1d   : > { %6171 = vmatpush3.bf16.msra.mxu1 %v7226_v23  ;;  %6078 = vmatprep.subr.bf16.mxu0 %v7227_v24  ;;  %v5506_v9 = vcombine.high %v251_v0, %v263_v1  ;;  %v275_v13 = vld [vmem:[%s7529_s27 + $0x308] sm:$0xff]  ;;  %v5505_v19 = vcombine.low %v251_v0, %v263_v1  ;;  %v7252_v23 = vld [vmem:[%s8961_s1 + $0x120] sm:$0xff]   ;;  %v7266_v57 = vld [vmem:[%s8961_s1 + $0x1b8] sm:$0xff]  }
  0x1e   : > { %6172 = vmatprep.subr.bf16.mxu1 %v7228_v25  ;;  %v287_v14 = vld [vmem:[%s7529_s27 + $0x368] sm:$0xff]  ;;  %v7253_v24 = vld [vmem:[%s8961_s1 + $0x1e0] sm:$0xff]  }
  0x1f   : > { %v5530_v21 = vcombine.high %v275_v13, %v287_v14  ;;  %v298_v25 = vld [vmem:[%s7529_s27 + $0x3c0] sm:$0xff]  ;;  %v5529_v32 = vcombine.low %v275_v13, %v287_v14  ;;  %v7256_v34 = vld [vmem:[%s8961_s1 + $0x128] sm:$0xff]  }
  0x20   : > { %6079 = vmatpush3.bf16.msra.mxu0 %v7229_v26  ;;  %v310_v26 = vld [vmem:[%s7529_s27 + $0x420] sm:$0xff]  ;;  %v7257_v36 = vld [vmem:[%s8961_s1 + $0x1e8] sm:$0xff]  }
  0x21   : > { %6173 = vmatpush3.bf16.msra.mxu1 %v7230_v27  ;;  %6080 = vmatprep.subr.bf16.mxu0 %v7231_v28  ;;  %v7254_v27 = vld [vmem:[%s8961_s1 + $0x1a0] sm:$0xff]   ;;  %v299_v28 = vld [vmem:[%s7529_s27 + $0x3c8] sm:$0xff]  ;;  %v5552_v33 = vcombine.high %v298_v25, %v310_v26 }
  0x22   : > { %6174 = vmatprep.subr.bf16.mxu1 %v7232_v29  ;;  %v311_v29 = vld [vmem:[%s7529_s27 + $0x428] sm:$0xff]  ;;  %v7267_v62 = vld [vmem:[%s8961_s1 + $0x240] sm:$0xff]  }
  0x23   : > { %v7258_v37 = vld [vmem:[%s8961_s1 + $0x1a8] sm:$0xff]   ;;  %v5553_v45 = vcombine.low %v299_v28, %v311_v29  ;;  %v7269_v63 = vld [vmem:[%s8961_s1 + $0x2c0] sm:$0xff]  }
  0x24   : > { %6081 = vmatpush3.bf16.msra.mxu0 %v7233_v30  ;;  %v5527_v30 = vcombine.low %v274_v10, %v286_v11  ;;  %v347_v53 = vld [vmem:[%s7529_s27 + $0x548] sm:$0xff]  ;;  %v370_v0 = vld [vmem:[%s7529_s27 + $0x600] sm:$0xff] }
  0x25   : > { %6175 = vmatpush3.bf16.msra.mxu1 %v7234_v31  ;;  %6254 = vmatprep.subr.bf16.mxu0 %v7235_v40  ;;  %v7255_v31 = vld [vmem:[%s8961_s1 + $0x168] sm:$0xff]   ;;  %v7259_v40 = vld [vmem:[%s8961_s1 + $0x170] sm:$0xff]   ;;  %v382_v1 = vld [vmem:[%s7529_s27 + $0x660] sm:$0xff] }
  0x26   : > { %6348 = vmatprep.subr.bf16.mxu1 %v7237_v42  ;;  %v335_v42 = vld [vmem:[%s7529_s27 + $0x4e8] sm:$0xff] }
  0x27   : > { %3626 = vmatmul.mubr.bf16.vlgmr.msra.gmra.mrb[0].mxu0 %v5431_v35  ;;  %v5554_v35 = vcombine.high %v299_v28, %v311_v29  ;;  %v395_v10 = vld [vmem:[%s7529_s27 + $0x6c8] sm:$0xff] }
  0x28   : > { %3763 = vmatmul.mubr.bf16.vlgmr.msra.gmra.mrb[0].mxu1 %v5433_v38  ;;  %6255 = vmatpush3.bf16.msra.mxu0 %v7236_v41  ;;  %v322_v38 = vld [vmem:[%s7529_s27 + $0x480] sm:$0xff]  ;;  %v323_v41 = vld [vmem:[%s7529_s27 + $0x488] sm:$0xff] }
  0x29   : > { %6349 = vmatpush3.bf16.msra.mxu1 %v7238_v43  ;;  %3633 = vmatprep.mubr.bf16.mxu0 %v5456_v46  ;;  %v5551_v43 = vcombine.low %v298_v25, %v310_v26  ;;  %v5576_v46 = vcombine.high %v322_v38, %v334_v39  ;;  %v5578_v48 = vcombine.high %v323_v41, %v335_v42  ;;  %v407_v11 = vld [vmem:[%s7529_s27 + $0x728] sm:$0xff]  ;;  %v454_v25 = vld [vmem:[%s7529_s27 + $0x8a0] sm:$0xff] }
  0x2a   : > { %3770 = vmatprep.mubr.bf16.mxu1 %v5458_v49  ;;  %6256 = vmatprep.subr.bf16.mxu0 %v7239_v50  ;;  %v7262_v49 = vld [vmem:[%s8961_s1 + $0x1b0] sm:$0xff]   ;;  %v346_v50 = vld [vmem:[%s7529_s27 + $0x540] sm:$0xff]  ;;  %v443_v26 = vld [vmem:[%s7529_s27 + $0x848] sm:$0xff] }
  0x2b   : > { %6350 = vmatprep.subr.bf16.mxu1 %v7241_v60 }
  0x2c   : > { %6257 = vmatpush3.bf16.msra.mxu0 %v7240_v52  ;;  %v7263_v52 = vld [vmem:[%s8961_s1 + $0x178] sm:$0xff]  }
  0x2d   : > { %6351 = vmatpush3.bf16.msra.mxu1 %v7242_v61  ;;  %6258 = vmatprep.subr.bf16.mxu0 %v7243_v2  ;;  %v371_v2 = vld [vmem:[%s7529_s27 + $0x608] sm:$0xff] }
  0x2e   : > { %6352 = vmatprep.subr.bf16.mxu1 %v7245_v5 }
  0x2f   : > { %3634 = vmatmul.mubr.bf16.gmra.mrb[4].mxu0 %v5455_v51  ;;  %v358_v51 = vld [vmem:[%s7529_s27 + $0x5a0] sm:$0xff] }
  0x30   : > { %3771 = vmatmul.mubr.bf16.gmra.mrb[4].mxu1 %v5457_v54  ;;  %3641 = vmatprep.mubr.bf16.mxu0 %v5480_v58  ;;  %v359_v54 = vld [vmem:[%s7529_s27 + $0x5a8] sm:$0xff]  ;;  %v5575_v58 = vcombine.low %v322_v38, %v334_v39  ;;  %v5600_v60 = vcombine.high %v346_v50, %v358_v51 }
  0x31   : > { %3778 = vmatprep.mubr.bf16.mxu1 %v5482_v59  ;;  %6259 = vmatpush3.bf16.msra.mxu0 %v7244_v3  ;;  %v5577_v59 = vcombine.low %v323_v41, %v335_v42  ;;  %v5602_v61 = vcombine.high %v347_v53, %v359_v54  ;;  %v383_v3 = vld [vmem:[%s7529_s27 + $0x668] sm:$0xff]  ;;  %v5601_v5 = vcombine.low %v347_v53, %v359_v54  ;;  %v192_v41 = vld [vmem:[%s7529_s27 + $0x70] sm:$0xff]  ;;  %v181_v42 = vld [vmem:[%s7529_s27 + $0x18] sm:$0xff] }
  0x32   : > { %6353 = vmatpush3.bf16.msra.mxu1 %v7246_v8  ;;  %6260 = vmatprep.subr.bf16.mxu0 %v7247_v12  ;;  %v394_v8 = vld [vmem:[%s7529_s27 + $0x6c0] sm:$0xff]  ;;  %v5623_v12 = vcombine.low %v370_v0, %v382_v1  ;;  %v5625_v13 = vcombine.low %v371_v2, %v383_v3 }
  0x33   : > { %6354 = vmatprep.subr.bf16.mxu1 %v7249_v16  ;;  %v418_v16 = vld [vmem:[%s7529_s27 + $0x780] sm:$0xff] }
  0x34   : > { %v7268_v54 = vld [vmem:[%s8961_s1 + $0x200] sm:$0xff]  }
  0x35   : > { %6261 = vmatpush3.bf16.msra.mxu0 %v7248_v15  ;;  %v5650_v15 = vcombine.high %v395_v10, %v407_v11 }
  0x36   : > { %6355 = vmatpush3.bf16.msra.mxu1 %v7250_v17  ;;  %6262 = vmatprep.subr.bf16.mxu0 %v7251_v22  ;;  %v430_v17 = vld [vmem:[%s7529_s27 + $0x7e0] sm:$0xff] }
  0x37   : > { %3642 = vmatmul.mubr.bf16.gmra.mrb[8].mxu0 %v5479_v4  ;;  %6356 = vmatprep.subr.bf16.mxu1 %v7253_v24  ;;  %v5599_v4 = vcombine.low %v346_v50, %v358_v51  ;;  %v5672_v22 = vcombine.high %v418_v16, %v430_v17  ;;  %v442_v24 = vld [vmem:[%s7529_s27 + $0x840] sm:$0xff]  ;;  %v5671_v28 = vcombine.low %v418_v16, %v430_v17  ;;  %v205_v51 = vld [vmem:[%s7529_s27 + $0xd8] sm:$0xff] }
  0x38   : > { %3779 = vmatmul.mubr.bf16.gmra.mrb[8].mxu1 %v5481_v6  ;;  %3649 = vmatprep.mubr.bf16.mxu0 %v5504_v7  ;;  %v5624_v6 = vcombine.high %v370_v0, %v382_v1  ;;  %v5626_v7 = vcombine.high %v371_v2, %v383_v3  ;;  %v7275_v0 = vld [vmem:[%s8961_s1 + $0x250] sm:$0xff]   ;;  %v229_v1 = vld [vmem:[%s7529_s27 + $0x198] sm:$0xff] }
  0x39   : > { %3786 = vmatprep.mubr.bf16.mxu1 %v5506_v9  ;;  %6263 = vmatpush3.bf16.msra.mxu0 %v7252_v23  ;;  %v406_v9 = vld [vmem:[%s7529_s27 + $0x720] sm:$0xff]  ;;  %v241_v2 = vld [vmem:[%s7529_s27 + $0x1f8] sm:$0xff]  ;;  %v7277_v3 = vld [vmem:[%s8961_s1 + $0x2d0] sm:$0xff]  }
  0x3a   : > { %6357 = vmatpush3.bf16.msra.mxu1 %v7254_v27  ;;  %6264 = vmatprep.subr.bf16.mxu0 %v7255_v31  ;;  %v5648_v14 = vcombine.high %v394_v8, %v406_v9  ;;  %v455_v27 = vld [vmem:[%s7529_s27 + $0x8a8] sm:$0xff]  ;;  %v265_v16 = vld [vmem:[%s7529_s27 + $0x2b8] sm:$0xff] }
  0x3b   : > { %6358 = vmatprep.subr.bf16.mxu1 %v7257_v36  ;;  %v5698_v31 = vcombine.high %v443_v26, %v455_v27  ;;  %v5695_v36 = vcombine.low %v442_v24, %v454_v25  ;;  %v7282_v17 = vld [vmem:[%s8961_s1 + $0x298] sm:$0xff]  }
  0x3d   : > { %6265 = vmatpush3.bf16.msra.mxu0 %v7256_v34  ;;  %v467_v34 = vld [vmem:[%s7529_s27 + $0x908] sm:$0xff] }
  0x3e   : > { %6359 = vmatpush3.bf16.msra.mxu1 %v7258_v37  ;;  %6266 = vmatprep.subr.bf16.mxu0 %v7259_v40  ;;  %v5697_v37 = vcombine.low %v443_v26, %v455_v27  ;;  %v180_v40 = vld [vmem:[%s7529_s27 + $0x10] sm:$0xff]  ;;  %v7289_v27 = vld [vmem:[%s8961_s1 + $0x2e8] sm:$0xff]  }
  0x3f   : > { %3650 = vmatmul.mubr.bf16.gmra.mrb[12].mxu0 %v5503_v18  ;;  %6360 = vmatprep.subr.bf16.mxu1 %v7261_v47  ;;  %v419_v18 = vld [vmem:[%s7529_s27 + $0x788] sm:$0xff]  ;;  %v5435_v50 = vcombine.low %v180_v40, %v192_v41 }
  0x40   : > { %3787 = vmatmul.mubr.bf16.gmra.mrb[12].mxu1 %v5505_v19  ;;  %3657 = vmatprep.mubr.bf16.mxu0 %v5528_v20  ;;  %v431_v19 = vld [vmem:[%s7529_s27 + $0x7e8] sm:$0xff]  ;;  %v5647_v20 = vcombine.low %v394_v8, %v406_v9  ;;  %v5486_v8 = vcombine.high %v229_v1, %v241_v2  ;;  %v7278_v9 = vld [vmem:[%s8961_s1 + $0x290] sm:$0xff]  }
  0x41   : > { %3794 = vmatprep.mubr.bf16.mxu1 %v5530_v21  ;;  %6267 = vmatpush3.bf16.msra.mxu0 %v7260_v44  ;;  %v5649_v21 = vcombine.low %v395_v10, %v407_v11  ;;  %v5674_v23 = vcombine.high %v419_v18, %v431_v19  ;;  %v5673_v29 = vcombine.low %v419_v18, %v431_v19  ;;  %v7279_v10 = vld [vmem:[%s8961_s1 + $0x258] sm:$0xff]   ;;  %v252_v11 = vld [vmem:[%s7529_s27 + $0x250] sm:$0xff]  ;;  %v7283_v18 = vld [vmem:[%s8961_s1 + $0x260] sm:$0xff]  }
  0x42   : > { %6361 = vmatpush3.bf16.msra.mxu1 %v7262_v49  ;;  %6268 = vmatprep.subr.bf16.mxu0 %v7263_v52  ;;  %v216_v49 = vld [vmem:[%s7529_s27 + $0x130] sm:$0xff]  ;;  %v217_v52 = vld [vmem:[%s7529_s27 + $0x138] sm:$0xff]  ;;  %v7285_v19 = vld [vmem:[%s8961_s1 + $0x2e0] sm:$0xff]  }
  0x43   : > { %6362 = vmatprep.subr.bf16.mxu1 %v7265_v56 }
  0x45   : > { %6269 = vmatpush3.bf16.msra.mxu0 %v7264_v55  ;;  %v7270_v55 = vld [vmem:[%s8961_s1 + $0x280] sm:$0xff]  }
  0x46   : > { %6363 = vmatpush3.bf16.msra.mxu1 %v7266_v57  ;;  %6442 = vmatprep.subr.bf16.mxu0 %v7267_v62  ;;  %v5462_v57 = vcombine.high %v205_v51, %v217_v52  ;;  %v7273_v62 = vld [vmem:[%s8961_s1 + $0x2c8] sm:$0xff]  }
  0x47   : > { %3658 = vmatmul.mubr.bf16.gmra.mrb[16].mxu0 %v5527_v30  ;;  %6536 = vmatprep.subr.bf16.mxu1 %v7269_v63  ;;  %v5696_v30 = vcombine.high %v442_v24, %v454_v25  ;;  %v7274_v63 = vld [vmem:[%s8961_s1 + $0x288] sm:$0xff]   ;;  %v7286_v24 = vld [vmem:[%s8961_s1 + $0x2a0] sm:$0xff]  }
  0x48   : > { %3795 = vmatmul.mubr.bf16.gmra.mrb[16].mxu1 %v5529_v32  ;;  %3665 = vmatprep.mubr.bf16.mxu0 %v5552_v33  ;;  %v466_v32 = vld [vmem:[%s7529_s27 + $0x900] sm:$0xff]  ;;  %v7287_v25 = vld [vmem:[%s8961_s1 + $0x268] sm:$0xff]  }
  0x49   : > { %3802 = vmatprep.mubr.bf16.mxu1 %v5554_v35  ;;  %v478_v33 = vld [vmem:[%s7529_s27 + $0x960] sm:$0xff]  ;;  %v479_v35 = vld [vmem:[%s7529_s27 + $0x968] sm:$0xff] }
  0x4a   : > { %v5720_v38 = vcombine.high %v466_v32, %v478_v33  ;;  %v5722_v39 = vcombine.high %v467_v34, %v479_v35  ;;  %v5719_v44 = vcombine.low %v466_v32, %v478_v33  ;;  %v7288_v32 = vld [vmem:[%s8961_s1 + $0x228] sm:$0xff]  }
  0x4b   : > { %v7290_v33 = vld [vmem:[%s8961_s1 + $0x2a8] sm:$0xff]  }
  0x4f   : > { %3666 = vmatmul.mubr.bf16.gmra.mrb[20].mxu0 %v5551_v43  ;;  %v193_v43 = vld [vmem:[%s7529_s27 + $0x78] sm:$0xff] }
  0x50   : > { %3803 = vmatmul.mubr.bf16.gmra.mrb[20].mxu1 %v5553_v45  ;;  %3673 = vmatprep.mubr.bf16.mxu0 %v5576_v46  ;;  %v5721_v45 = vcombine.low %v467_v34, %v479_v35  ;;  %v5436_v46 = vcombine.high %v180_v40, %v192_v41  ;;  %v5438_v47 = vcombine.high %v181_v42, %v193_v43  ;;  %v7291_v34 = vld [vmem:[%s8961_s1 + $0x270] sm:$0xff]   ;;  %v7295_v41 = vld [vmem:[%s8961_s1 + $0x278] sm:$0xff]  }
  0x51   : > { %3810 = vmatprep.mubr.bf16.mxu1 %v5578_v48  ;;  %v204_v48 = vld [vmem:[%s7529_s27 + $0xd0] sm:$0xff]  ;;  %v5437_v53 = vcombine.low %v181_v42, %v193_v43  ;;  %v7297_v43 = vld [vmem:[%s8961_s1 + $0x2f8] sm:$0xff]  }
  0x52   : > { %v5460_v56 = vcombine.high %v204_v48, %v216_v49  ;;  %v7293_v35 = vld [vmem:[%s8961_s1 + $0x2f0] sm:$0xff]  }
  0x53   : > { %v7294_v40 = vld [vmem:[%s8961_s1 + $0x2b0] sm:$0xff]  }
  0x57   : > { %3674 = vmatmul.mubr.bf16.gmra.mrb[24].mxu0 %v5575_v58  ;;  %v7271_v58 = vld [vmem:[%s8961_s1 + $0x248] sm:$0xff]  }
  0x58   : > { %3811 = vmatmul.mubr.bf16.gmra.mrb[24].mxu1 %v5577_v59  ;;  %3681 = vmatprep.mubr.bf16.mxu0 %v5600_v60  ;;  %v7272_v59 = vld [vmem:[%s8961_s1 + $0x208] sm:$0xff]   ;;  %v228_v60 = vld [vmem:[%s7529_s27 + $0x190] sm:$0xff] }
  0x59   : > { %3818 = vmatprep.mubr.bf16.mxu1 %v5602_v61  ;;  %v240_v61 = vld [vmem:[%s7529_s27 + $0x1f0] sm:$0xff] }
  0x5f   : > { %3682 = vmatmul.mubr.bf16.gmra.mrb[28].mxu0 %v5599_v4  ;;  %v5459_v4 = vcombine.low %v204_v48, %v216_v49  ;;  %v313_v48 = vld [vmem:[%s7529_s27 + $0x438] sm:$0xff] }
  0x60   : > { %3819 = vmatmul.mubr.bf16.gmra.mrb[28].mxu1 %v5601_v5  ;;  %3689 = vmatprep.mubr.bf16.mxu0 %v5624_v6  ;;  %v5461_v5 = vcombine.low %v205_v51, %v217_v52  ;;  %v5484_v6 = vcombine.high %v228_v60, %v240_v61  ;;  %v7298_v49 = vld [vmem:[%s8961_s1 + $0x2b8] sm:$0xff]   ;;  %v7301_v51 = vld [vmem:[%s8961_s1 + $0x3c0] sm:$0xff]  }
  0x61   : > { %3826 = vmatprep.mubr.bf16.mxu1 %v5626_v7  ;;  %v7276_v7 = vld [vmem:[%s8961_s1 + $0x210] sm:$0xff]  }
  0x67   : > { %3690 = vmatmul.mubr.bf16.gmra.mrb[32].mxu0 %v5623_v12  ;;  %v264_v12 = vld [vmem:[%s7529_s27 + $0x2b0] sm:$0xff] }
  0x68   : > { %3827 = vmatmul.mubr.bf16.gmra.mrb[32].mxu1 %v5625_v13  ;;  %3697 = vmatprep.mubr.bf16.mxu0 %v5648_v14  ;;  %v7280_v13 = vld [vmem:[%s8961_s1 + $0x218] sm:$0xff]  }
  0x69   : > { %3834 = vmatprep.mubr.bf16.mxu1 %v5650_v15  ;;  %v7281_v14 = vld [vmem:[%s8961_s1 + $0x2d8] sm:$0xff]  }
  0x6a   : > { %v253_v15 = vld [vmem:[%s7529_s27 + $0x258] sm:$0xff] }
  0x6b   : > { %v5510_v26 = vcombine.high %v253_v15, %v265_v16 }
  0x6f   : > { %3698 = vmatmul.mubr.bf16.gmra.mrb[36].mxu0 %v5647_v20  ;;  %v5483_v20 = vcombine.low %v228_v60, %v240_v61 }
  0x70   : > { %3835 = vmatmul.mubr.bf16.gmra.mrb[36].mxu1 %v5649_v21  ;;  %3705 = vmatprep.mubr.bf16.mxu0 %v5672_v22  ;;  %v5485_v21 = vcombine.low %v229_v1, %v241_v2  ;;  %v5508_v22 = vcombine.high %v252_v11, %v264_v12  ;;  %v360_v1 = vld [vmem:[%s7529_s27 + $0x5b0] sm:$0xff]  ;;  %v349_v2 = vld [vmem:[%s7529_s27 + $0x558] sm:$0xff] }
  0x71   : > { %3842 = vmatprep.mubr.bf16.mxu1 %v5674_v23  ;;  %v7284_v23 = vld [vmem:[%s8961_s1 + $0x220] sm:$0xff]  }
  0x77   : > { %3706 = vmatmul.mubr.bf16.gmra.mrb[40].mxu0 %v5671_v28  ;;  %v276_v28 = vld [vmem:[%s7529_s27 + $0x310] sm:$0xff] }
  0x78   : > { %3843 = vmatmul.mubr.bf16.gmra.mrb[40].mxu1 %v5673_v29  ;;  %3713 = vmatprep.mubr.bf16.mxu0 %v5696_v30  ;;  %v288_v29 = vld [vmem:[%s7529_s27 + $0x370] sm:$0xff]  ;;  %v277_v30 = vld [vmem:[%s7529_s27 + $0x318] sm:$0xff] }
  0x79   : > { %3850 = vmatprep.mubr.bf16.mxu1 %v5698_v31  ;;  %v289_v31 = vld [vmem:[%s7529_s27 + $0x378] sm:$0xff]  ;;  %v5531_v52 = vcombine.low %v276_v28, %v288_v29 }
  0x7a   : > { %v5534_v42 = vcombine.high %v277_v30, %v289_v31 }
  0x7f   : > { %3714 = vmatmul.mubr.bf16.gmra.mrb[44].mxu0 %v5695_v36  ;;  %v5507_v36 = vcombine.low %v252_v11, %v264_v12  ;;  %v385_v11 = vld [vmem:[%s7529_s27 + $0x678] sm:$0xff] }
  0x80   : > { %3851 = vmatmul.mubr.bf16.gmra.mrb[44].mxu1 %v5697_v37  ;;  %3721 = vmatprep.mubr.bf16.mxu0 %v5720_v38  ;;  %v5509_v37 = vcombine.low %v253_v15, %v265_v16  ;;  %v5532_v38 = vcombine.high %v276_v28, %v288_v29  ;;  %v396_v16 = vld [vmem:[%s7529_s27 + $0x6d0] sm:$0xff] }
  0x81   : > { %3858 = vmatprep.mubr.bf16.mxu1 %v5722_v39  ;;  %v7292_v39 = vld [vmem:[%s8961_s1 + $0x230] sm:$0xff]  }
  0x87   : > { %3722 = vmatmul.mubr.bf16.gmra.mrb[48].mxu0 %v5719_v44  ;;  %v300_v44 = vld [vmem:[%s7529_s27 + $0x3d0] sm:$0xff] }
  0x88   : > { %3859 = vmatmul.mubr.bf16.gmra.mrb[48].mxu1 %v5721_v45  ;;  %3899 = vmatprep.mubr.bf16.mxu0 %v5436_v46  ;;  %v312_v45 = vld [vmem:[%s7529_s27 + $0x430] sm:$0xff]  ;;  %v7296_v46 = vld [vmem:[%s8961_s1 + $0x238] sm:$0xff]  }
  0x89   : > { %4036 = vmatprep.mubr.bf16.mxu1 %v5438_v47  ;;  %v301_v47 = vld [vmem:[%s7529_s27 + $0x3d8] sm:$0xff]  ;;  %v5555_v60 = vcombine.low %v300_v44, %v312_v45 }
  0x8a   : > { %v5557_v61 = vcombine.low %v301_v47, %v313_v48 }
  0x8f   : > { %3900 = vmatmul.mubr.bf16.vlgmr.msra.gmra.mrb[52].mxu0 %v5435_v50  ;;  %v7299_v50 = vld [vmem:[%s8961_s1 + $0x340] sm:$0xff]  }
  0x90   : > { %4037 = vmatmul.mubr.bf16.vlgmr.msra.gmra.mrb[52].mxu1 %v5437_v53  ;;  %6443 = vmatpush3.bf16.msra.mxu0 %v7268_v54  ;;  %v5533_v53 = vcombine.low %v277_v30, %v289_v31  ;;  %v5556_v54 = vcombine.high %v300_v44, %v312_v45 }
  0x91   : > { %6537 = vmatpush3.bf16.msra.mxu1 %v7270_v55  ;;  %3907 = vmatprep.mubr.bf16.mxu0 %v5460_v56  ;;  %v5558_v55 = vcombine.high %v301_v47, %v313_v48  ;;  %v324_v56 = vld [vmem:[%s7529_s27 + $0x490] sm:$0xff]  ;;  %v182_v48 = vld [vmem:[%s7529_s27 + $0x20] sm:$0xff] }
  0x92   : > { %4044 = vmatprep.mubr.bf16.mxu1 %v5462_v57  ;;  %6444 = vmatprep.subr.bf16.mxu0 %v7271_v58  ;;  %v336_v57 = vld [vmem:[%s7529_s27 + $0x4f0] sm:$0xff]  ;;  %v325_v58 = vld [vmem:[%s7529_s27 + $0x498] sm:$0xff] }
  0x93   : > { %6538 = vmatprep.subr.bf16.mxu1 %v7273_v62  ;;  %v5580_v62 = vcombine.high %v324_v56, %v336_v57 }
  0x94   : > { %6445 = vmatpush3.bf16.msra.mxu0 %v7272_v59  ;;  %v337_v59 = vld [vmem:[%s7529_s27 + $0x4f8] sm:$0xff] }
  0x95   : > { %6539 = vmatpush3.bf16.msra.mxu1 %v7274_v63  ;;  %6446 = vmatprep.subr.bf16.mxu0 %v7275_v0  ;;  %v5582_v63 = vcombine.high %v325_v58, %v337_v59  ;;  %v348_v0 = vld [vmem:[%s7529_s27 + $0x550] sm:$0xff] }
  0x96   : > { %6540 = vmatprep.subr.bf16.mxu1 %v7277_v3  ;;  %v361_v3 = vld [vmem:[%s7529_s27 + $0x5b8] sm:$0xff]  ;;  %v5603_v12 = vcombine.low %v348_v0, %v360_v1 }
  0x97   : > { %3908 = vmatmul.mubr.bf16.gmra.mrb[56].mxu0 %v5459_v4  ;;  %v5579_v4 = vcombine.low %v324_v56, %v336_v57  ;;  %v206_v56 = vld [vmem:[%s7529_s27 + $0xe0] sm:$0xff] }
  0x98   : > { %4045 = vmatmul.mubr.bf16.gmra.mrb[56].mxu1 %v5461_v5  ;;  %3915 = vmatprep.mubr.bf16.mxu0 %v5484_v6  ;;  %v5581_v5 = vcombine.low %v325_v58, %v337_v59  ;;  %v5604_v6 = vcombine.high %v348_v0, %v360_v1  ;;  %v218_v57 = vld [vmem:[%s7529_s27 + $0x140] sm:$0xff]  ;;  %v207_v59 = vld [vmem:[%s7529_s27 + $0xe8] sm:$0xff] }
  0x99   : > { %4052 = vmatprep.mubr.bf16.mxu1 %v5486_v8  ;;  %6447 = vmatpush3.bf16.msra.mxu0 %v7276_v7  ;;  %v5606_v7 = vcombine.high %v349_v2, %v361_v3  ;;  %v372_v8 = vld [vmem:[%s7529_s27 + $0x610] sm:$0xff]  ;;  %v5464_v0 = vcombine.high %v206_v56, %v218_v57 }
  0x9a   : > { %6541 = vmatpush3.bf16.msra.mxu1 %v7278_v9  ;;  %6448 = vmatprep.subr.bf16.mxu0 %v7279_v10  ;;  %v384_v9 = vld [vmem:[%s7529_s27 + $0x670] sm:$0xff]  ;;  %v373_v10 = vld [vmem:[%s7529_s27 + $0x618] sm:$0xff] }
  0x9b   : > { %6542 = vmatprep.subr.bf16.mxu1 %v7281_v14  ;;  %v5628_v14 = vcombine.high %v372_v8, %v384_v9  ;;  %v5630_v15 = vcombine.high %v373_v10, %v385_v11 }
  0x9d   : > { %6449 = vmatpush3.bf16.msra.mxu0 %v7280_v13  ;;  %v5605_v13 = vcombine.low %v349_v2, %v361_v3  ;;  %v7303_v2 = vld [vmem:[%s8961_s1 + $0x348] sm:$0xff]  }
  0x9e   : > { %6543 = vmatpush3.bf16.msra.mxu1 %v7282_v17  ;;  %6450 = vmatprep.subr.bf16.mxu0 %v7283_v18  ;;  %v408_v17 = vld [vmem:[%s7529_s27 + $0x730] sm:$0xff]  ;;  %v397_v18 = vld [vmem:[%s7529_s27 + $0x6d8] sm:$0xff]  ;;  %v7305_v3 = vld [vmem:[%s8961_s1 + $0x3c8] sm:$0xff]  }
  0x9f   : > { %3916 = vmatmul.mubr.bf16.gmra.mrb[60].mxu0 %v5483_v20  ;;  %6544 = vmatprep.subr.bf16.mxu1 %v7285_v19  ;;  %v409_v19 = vld [vmem:[%s7529_s27 + $0x738] sm:$0xff]  ;;  %v5627_v20 = vcombine.low %v372_v8, %v384_v9  ;;  %v5651_v28 = vcombine.low %v396_v16, %v408_v17  ;;  %v7307_v8 = vld [vmem:[%s8961_s1 + $0x350] sm:$0xff]  }
  0xa0   : > { %4053 = vmatmul.mubr.bf16.gmra.mrb[60].mxu1 %v5485_v21  ;;  %3923 = vmatprep.mubr.bf16.mxu0 %v5508_v22  ;;  %v5629_v21 = vcombine.low %v373_v10, %v385_v11  ;;  %v5652_v22 = vcombine.high %v396_v16, %v408_v17  ;;  %v5653_v29 = vcombine.low %v397_v18, %v409_v19  ;;  %v7875_v10 = vld [vmem:[%s7529_s27 + $0x1a8] sm:$0xff] }
  0xa1   : > { %4060 = vmatprep.mubr.bf16.mxu1 %v5510_v26  ;;  %6451 = vmatpush3.bf16.msra.mxu0 %v7284_v23  ;;  %v5654_v23 = vcombine.high %v397_v18, %v409_v19  ;;  %v421_v26 = vld [vmem:[%s7529_s27 + $0x798] sm:$0xff]  ;;  %v7878_v11 = vld [vmem:[%s7529_s27 + $0x208] sm:$0xff]  ;;  %v5463_v16 = vcombine.low %v206_v56, %v218_v57 }
  0xa2   : > { %6545 = vmatpush3.bf16.msra.mxu1 %v7286_v24  ;;  %6452 = vmatprep.subr.bf16.mxu0 %v7287_v25  ;;  %v420_v24 = vld [vmem:[%s7529_s27 + $0x790] sm:$0xff] }
  0xa3   : > { %6546 = vmatprep.subr.bf16.mxu1 %v7289_v27  ;;  %v432_v25 = vld [vmem:[%s7529_s27 + $0x7f0] sm:$0xff]  ;;  %v433_v27 = vld [vmem:[%s7529_s27 + $0x7f8] sm:$0xff] }
  0xa4   : > { %v5676_v30 = vcombine.high %v420_v24, %v432_v25  ;;  %v5678_v31 = vcombine.high %v421_v26, %v433_v27 }
  0xa5   : > { %6453 = vmatpush3.bf16.msra.mxu0 %v7288_v32  ;;  %v444_v32 = vld [vmem:[%s7529_s27 + $0x850] sm:$0xff] }
  0xa6   : > { %6547 = vmatpush3.bf16.msra.mxu1 %v7290_v33  ;;  %6454 = vmatprep.subr.bf16.mxu0 %v7291_v34  ;;  %v456_v33 = vld [vmem:[%s7529_s27 + $0x8b0] sm:$0xff]  ;;  %v445_v34 = vld [vmem:[%s7529_s27 + $0x858] sm:$0xff] }
  0xa7   : > { %3924 = vmatmul.mubr.bf16.gmra.mrb[64].mxu0 %v5507_v36  ;;  %6548 = vmatprep.subr.bf16.mxu1 %v7293_v35  ;;  %v457_v35 = vld [vmem:[%s7529_s27 + $0x8b8] sm:$0xff]  ;;  %v5675_v36 = vcombine.low %v420_v24, %v432_v25  ;;  %v5699_v44 = vcombine.low %v444_v32, %v456_v33  ;;  %v5490_v25 = vcombine.high %v7875_v10, %v7878_v11 }
  0xa8   : > { %4061 = vmatmul.mubr.bf16.gmra.mrb[64].mxu1 %v5509_v37  ;;  %3931 = vmatprep.mubr.bf16.mxu0 %v5532_v38  ;;  %v5677_v37 = vcombine.low %v421_v26, %v433_v27  ;;  %v5700_v38 = vcombine.high %v444_v32, %v456_v33  ;;  %v5701_v45 = vcombine.low %v445_v34, %v457_v35  ;;  %v7308_v26 = vld [vmem:[%s8961_s1 + $0x310] sm:$0xff]   ;;  %v7313_v33 = vld [vmem:[%s8961_s1 + $0x3d8] sm:$0xff]  }
  0xa9   : > { %4068 = vmatprep.mubr.bf16.mxu1 %v5534_v42  ;;  %6455 = vmatpush3.bf16.msra.mxu0 %v7292_v39  ;;  %v5702_v39 = vcombine.high %v445_v34, %v457_v35  ;;  %v469_v42 = vld [vmem:[%s7529_s27 + $0x918] sm:$0xff] }
  0xaa   : > { %6549 = vmatpush3.bf16.msra.mxu1 %v7294_v40  ;;  %6456 = vmatprep.subr.bf16.mxu0 %v7295_v41  ;;  %v468_v40 = vld [vmem:[%s7529_s27 + $0x910] sm:$0xff] }
  0xab   : > { %6550 = vmatprep.subr.bf16.mxu1 %v7297_v43  ;;  %v480_v41 = vld [vmem:[%s7529_s27 + $0x970] sm:$0xff]  ;;  %v481_v43 = vld [vmem:[%s7529_s27 + $0x978] sm:$0xff] }
  0xac   : > { %v5726_v47 = vcombine.high %v469_v42, %v481_v43 }
  0xad   : > { %6457 = vmatpush3.bf16.msra.mxu0 %v7296_v46  ;;  %v5724_v46 = vcombine.high %v468_v40, %v480_v41 }
  0xae   : > { %6551 = vmatpush3.bf16.msra.mxu1 %v7298_v49  ;;  %6630 = vmatprep.subr.bf16.mxu0 %v7299_v50  ;;  %v194_v49 = vld [vmem:[%s7529_s27 + $0x80] sm:$0xff]  ;;  %v183_v50 = vld [vmem:[%s7529_s27 + $0x28] sm:$0xff] }
  0xaf   : > { %3932 = vmatmul.mubr.bf16.gmra.mrb[68].mxu0 %v5531_v52  ;;  %6724 = vmatprep.subr.bf16.mxu1 %v7301_v51  ;;  %v195_v51 = vld [vmem:[%s7529_s27 + $0x88] sm:$0xff]  ;;  %v5723_v52 = vcombine.low %v468_v40, %v480_v41  ;;  %v5439_v58 = vcombine.low %v182_v48, %v194_v49 }
  0xb0   : > { %4069 = vmatmul.mubr.bf16.gmra.mrb[68].mxu1 %v5533_v53  ;;  %3939 = vmatprep.mubr.bf16.mxu0 %v5556_v54  ;;  %v5725_v53 = vcombine.low %v469_v42, %v481_v43  ;;  %v5440_v54 = vcombine.high %v182_v48, %v194_v49  ;;  %v7923_v42 = vld [vmem:[%s7529_s27 + $0x2c8] sm:$0xff]  ;;  %v7314_v43 = vld [vmem:[%s8961_s1 + $0x398] sm:$0xff]   ;;  %v7317_v48 = vld [vmem:[%s8961_s1 + $0x3e0] sm:$0xff]  }
  0xb1   : > { %4076 = vmatprep.mubr.bf16.mxu1 %v5558_v55  ;;  %v5442_v55 = vcombine.high %v183_v50, %v195_v51 }
  0xb7   : > { %3940 = vmatmul.mubr.bf16.gmra.mrb[72].mxu0 %v5555_v60  ;;  %v219_v60 = vld [vmem:[%s7529_s27 + $0x148] sm:$0xff] }
  0xb8   : > { %4077 = vmatmul.mubr.bf16.gmra.mrb[72].mxu1 %v5557_v61  ;;  %3947 = vmatprep.mubr.bf16.mxu0 %v5580_v62  ;;  %v5441_v61 = vcombine.low %v183_v50, %v195_v51  ;;  %v7300_v62 = vld [vmem:[%s8961_s1 + $0x300] sm:$0xff]   ;;  %v5466_v1 = vcombine.high %v207_v59, %v219_v60 }
  0xb9   : > { %4084 = vmatprep.mubr.bf16.mxu1 %v5582_v63  ;;  %v7302_v63 = vld [vmem:[%s8961_s1 + $0x380] sm:$0xff]  }
  0xbf   : > { %3948 = vmatmul.mubr.bf16.gmra.mrb[76].mxu0 %v5579_v4  ;;  %v7304_v4 = vld [vmem:[%s8961_s1 + $0x308] sm:$0xff]  }
  0xc0   : > { %4085 = vmatmul.mubr.bf16.gmra.mrb[76].mxu1 %v5581_v5  ;;  %3955 = vmatprep.mubr.bf16.mxu0 %v5604_v6  ;;  %v7863_v5 = vld [vmem:[%s7529_s27 + $0x1a0] sm:$0xff] }
  0xc1   : > { %4092 = vmatprep.mubr.bf16.mxu1 %v5606_v7  ;;  %v7866_v6 = vld [vmem:[%s7529_s27 + $0x200] sm:$0xff]  ;;  %v7306_v7 = vld [vmem:[%s8961_s1 + $0x388] sm:$0xff]  }
  0xc7   : > { %3956 = vmatmul.mubr.bf16.gmra.mrb[80].mxu0 %v5603_v12  ;;  %v7309_v12 = vld [vmem:[%s8961_s1 + $0x3d0] sm:$0xff]  }
  0xc8   : > { %4093 = vmatmul.mubr.bf16.gmra.mrb[80].mxu1 %v5605_v13  ;;  %3963 = vmatprep.mubr.bf16.mxu0 %v5628_v14  ;;  %v7886_v14 = vld [vmem:[%s8962_s2] ss:$0 sm:$0xff] }
  0xc9   : > { %4100 = vmatprep.mubr.bf16.mxu1 %v5630_v15 }
  0xcf   : > { %3964 = vmatmul.mubr.bf16.gmra.mrb[84].mxu0 %v5627_v20  ;;  %v5465_v20 = vcombine.low %v207_v59, %v219_v60 }
  0xd0   : > { %4101 = vmatmul.mubr.bf16.gmra.mrb[84].mxu1 %v5629_v21  ;;  %3971 = vmatprep.mubr.bf16.mxu0 %v5652_v22  ;;  %v5488_v21 = vcombine.high %v7863_v5, %v7866_v6 }
  0xd1   : > { %4108 = vmatprep.mubr.bf16.mxu1 %v5654_v23 }
  0xd7   : > { %3972 = vmatmul.mubr.bf16.gmra.mrb[88].mxu0 %v5651_v28 }
  0xd8   : > { %4109 = vmatmul.mubr.bf16.gmra.mrb[88].mxu1 %v5653_v29  ;;  %3979 = vmatprep.mubr.bf16.mxu0 %v5676_v30  ;;  %v7310_v30 = vld [vmem:[%s8961_s1 + $0x390] sm:$0xff]  }
  0xd9   : > { %4116 = vmatprep.mubr.bf16.mxu1 %v5678_v31  ;;  %v7311_v31 = vld [vmem:[%s8961_s1 + $0x358] sm:$0xff]  }
  0xdf   : > { %3980 = vmatmul.mubr.bf16.gmra.mrb[92].mxu0 %v5675_v36  ;;  %v7909_v36 = vld [vmem:[%s7529_s27 + $0x260] sm:$0xff] }
  0xe0   : > { %4117 = vmatmul.mubr.bf16.gmra.mrb[92].mxu1 %v5677_v37  ;;  %3987 = vmatprep.mubr.bf16.mxu0 %v5700_v38  ;;  %v7912_v37 = vld [vmem:[%s7529_s27 + $0x2c0] sm:$0xff]  ;;  %v7915_v38 = vld [vmem:[%s7529_s27 + $0x268] sm:$0xff] }
  0xe1   : > { %4124 = vmatprep.mubr.bf16.mxu1 %v5702_v39  ;;  %v7312_v39 = vld [vmem:[%s8961_s1 + $0x318] sm:$0xff]   ;;  %v5514_v57 = vcombine.high %v7915_v38, %v7923_v42 }
  0xe7   : > { %3988 = vmatmul.mubr.bf16.gmra.mrb[96].mxu0 %v5699_v44  ;;  %v7315_v44 = vld [vmem:[%s8961_s1 + $0x360] sm:$0xff]  }
  0xe8   : > { %4125 = vmatmul.mubr.bf16.gmra.mrb[96].mxu1 %v5701_v45  ;;  %3995 = vmatprep.mubr.bf16.mxu0 %v5724_v46 }
  0xe9   : > { %4132 = vmatprep.mubr.bf16.mxu1 %v5726_v47  ;;  %v5487_v47 = vcombine.low %v7863_v5, %v7866_v6  ;;  %v7962_v5 = vld [vmem:[%s7529_s27 + $0x380] sm:$0xff]  ;;  %v7965_v6 = vld [vmem:[%s7529_s27 + $0x328] sm:$0xff] }
  0xef   : > { %3996 = vmatmul.mubr.bf16.gmra.mrb[100].mxu0 %v5723_v52  ;;  %v5489_v52 = vcombine.low %v7875_v10, %v7878_v11  ;;  %v7322_v10 = vld [vmem:[%s8961_s1 + $0x3a8] sm:$0xff]   ;;  %v7323_v11 = vld [vmem:[%s8961_s1 + $0x370] sm:$0xff]  }
  0xf0   : > { %4133 = vmatmul.mubr.bf16.gmra.mrb[100].mxu1 %v5725_v53  ;;  %4173 = vmatprep.mubr.bf16.mxu0 %v5440_v54  ;;  %v5512_v53 = vcombine.high %v7909_v36, %v7912_v37 }
  0xf1   : > { %4310 = vmatprep.mubr.bf16.mxu1 %v5442_v55 }
  0xf7   : > { %4174 = vmatmul.mubr.bf16.vlgmr.msra.gmra.mrb[104].mxu0 %v5439_v58  ;;  %v7316_v58 = vld [vmem:[%s8961_s1 + $0x320] sm:$0xff]  }
  0xf8   : > { %4311 = vmatmul.mubr.bf16.vlgmr.msra.gmra.mrb[104].mxu1 %v5441_v61  ;;  %6631 = vmatpush3.bf16.msra.mxu0 %v7300_v62  ;;  %v7318_v62 = vld [vmem:[%s8961_s1 + $0x3a0] sm:$0xff]  }
  0xf9   : > { %6725 = vmatpush3.bf16.msra.mxu1 %v7302_v63  ;;  %4181 = vmatprep.mubr.bf16.mxu0 %v5464_v0  ;;  %v7319_v63 = vld [vmem:[%s8961_s1 + $0x368] sm:$0xff]  }
  0xfa   : > { %v6082_v9 = vpop.f32.mrb[0].mxu0  ;;  %4318 = vmatprep.mubr.bf16.mxu1 %v5466_v1  ;;  %6632 = vmatprep.subr.bf16.mxu0 %v7303_v2  ;;  %v7321_v1 = vld [vmem:[%s8961_s1 + $0x3e8] sm:$0xff]  }
  0xfb   : > { %v6176_v13 = vpop.f32.mrb[0].mxu1  ;;  %v6083_v15 = vpop.f32.mrb[1].mxu0  ;;  %6726 = vmatprep.subr.bf16.mxu1 %v7305_v3  ;;  %v7957_v3 = vld [vmem:[%s7529_s27 + $0x320] sm:$0xff] }
  0xfc   : > { %v6084_v17 = vadd.f32 %v6083_v15, %v6082_v9  ;;  %v6177_v18 = vpop.f32.mrb[1].mxu1  ;;  %v6085_v19 = vpop.f32.mrb[2].mxu0  ;;  %6633 = vmatpush3.bf16.msra.mxu0 %v7304_v4  ;;  %v7971_v9 = vld [vmem:[%s7529_s27 + $0x388] sm:$0xff] }
  0xfd   : > { %v6178_v22 = vadd.f32 %v6177_v18, %v6176_v13  ;;  %v6179_v23 = vpop.f32.mrb[2].mxu1  ;;  %v6086_v24 = vpop.f32.mrb[3].mxu0  ;;  %6727 = vmatpush3.bf16.msra.mxu1 %v7306_v7  ;;  %6634 = vmatprep.subr.bf16.mxu0 %v7307_v8  ;;  %v7320_v7 = vld [vmem:[%s8961_s1 + $0x328] sm:$0xff]  }
  0xfe   : > { %v3628_v27 = vadd.f32 %v6084_v17, %v7886_v14  ;;  %v6087_v28 = vadd.f32 %v6086_v24, %v6085_v19  ;;  %v6180_v29 = vpop.f32.mrb[3].mxu1  ;;  %6728 = vmatprep.subr.bf16.mxu1 %v7309_v12  ;;  %v7325_v17 = vld [vmem:[%s8961_s1 + $0x3f0] sm:$0xff]  }
  0xff   : > { %v6181_v32 = vadd.f32 %v6180_v29, %v6179_v23  ;;  %4182 = vmatmul.mubr.bf16.gmra.mrb[108].mxu0 %v5463_v16  ;;  %v5511_v16 = vcombine.low %v7909_v36, %v7912_v37  ;;  %v8007_v37 = vld [vmem:[%s7529_s27 + $0x3e0] sm:$0xff] }
 0x100   : > { %v7905_v34 = vadd.f32 %v6178_v22, %v3628_v27  ;;  %v3631_v35 = vadd.f32 %v6087_v28, %v7886_v14  ;;  %4319 = vmatmul.mubr.bf16.gmra.mrb[108].mxu1 %v5465_v20  ;;  %4189 = vmatprep.mubr.bf16.mxu0 %v5488_v21  ;;  %v5513_v21 = vcombine.low %v7915_v38, %v7923_v42  ;;  %v7324_v27 = vld [vmem:[%s8961_s1 + $0x330] sm:$0xff]   ;;  %v7328_v42 = vld [vmem:[%s8961_s1 + $0x338] sm:$0xff]  }
 0x101   : > { %4326 = vmatprep.mubr.bf16.mxu1 %v5490_v25  ;;  %6635 = vmatpush3.bf16.msra.mxu0 %v7308_v26  ;;  %v5536_v22 = vcombine.high %v7957_v3, %v7962_v5  ;;  %v5538_v26 = vcombine.high %v7965_v6, %v7971_v9 }
 0x102   : > { %v7920_v40 = vadd.f32 %v6181_v32, %v3631_v35  ;;  %v6088_v41 = vpop.f32.mrb[4].mxu0  ;;  %6729 = vmatpush3.bf16.msra.mxu1 %v7310_v30  ;;  %6636 = vmatprep.subr.bf16.mxu0 %v7311_v31  ;;  %v7326_v31 = vld [vmem:[%s8961_s1 + $0x3b0] sm:$0xff]   ;;  %v7327_v32 = vld [vmem:[%s8961_s1 + $0x378] sm:$0xff]  }
 0x103   : > { %v6182_v45 = vpop.f32.mrb[4].mxu1  ;;  %v6089_v46 = vpop.f32.mrb[5].mxu0  ;;  %6730 = vmatprep.subr.bf16.mxu1 %v7313_v33  ;;  %v7329_v35 = vld [vmem:[%s8961_s1 + $0x3f8] sm:$0xff]  }
 0x104   : > { %v6090_v49 = vadd.f32 %v6089_v46, %v6088_v41  ;;  %v6183_v50 = vpop.f32.mrb[5].mxu1  ;;  %v6091_v51 = vpop.f32.mrb[6].mxu0  ;;  %v303_v41 = vld [vmem:[%s7529_s27 + $0x3e8] sm:$0xff]  ;;  %v7331_v46 = vld [vmem:[%s8961_s1 + $0x440] sm:$0xff]  }
 0x105   : > { %v6184_v54 = vadd.f32 %v6183_v50, %v6182_v45  ;;  %v6185_v55 = vpop.f32.mrb[6].mxu1  ;;  %v6092_v56 = vpop.f32.mrb[7].mxu0  ;;  %6637 = vmatpush3.bf16.msra.mxu0 %v7312_v39  ;;  %v314_v39 = vld [vmem:[%s7529_s27 + $0x440] sm:$0xff]  ;;  %v7330_v45 = vld [vmem:[%s8961_s1 + $0x3b8] sm:$0xff]   ;;  %v5535_v50 = vcombine.low %v7957_v3, %v7962_v5 }
 0x106   : > { %v3636_v59 = vadd.f32 %v6090_v49, %v7886_v14  ;;  %v6093_v60 = vadd.f32 %v6092_v56, %v6091_v51  ;;  %v6186_v61 = vpop.f32.mrb[7].mxu1  ;;  %6731 = vmatpush3.bf16.msra.mxu1 %v7314_v43  ;;  %6638 = vmatprep.subr.bf16.mxu0 %v7315_v44  ;;  %v315_v44 = vld [vmem:[%s7529_s27 + $0x448] sm:$0xff]  ;;  %v7333_v51 = vld [vmem:[%s8961_s1 + $0x4c0] sm:$0xff]   ;;  %v5560_v56 = vcombine.high %v8007_v37, %v314_v39 }
 0x107   : > { %v6187_v0 = vadd.f32 %v6186_v61, %v6185_v55  ;;  %4190 = vmatmul.mubr.bf16.gmra.mrb[112].mxu0 %v5487_v47  ;;  %6732 = vmatprep.subr.bf16.mxu1 %v7317_v48  ;;  %v5537_v55 = vcombine.low %v7965_v6, %v7971_v9  ;;  %v326_v3 = vld [vmem:[%s7529_s27 + $0x4a0] sm:$0xff] }
 0x108   : > { %v3639_v2 = vadd.f32 %v6093_v60, %v7886_v14  ;;  %4327 = vmatmul.mubr.bf16.gmra.mrb[112].mxu1 %v5489_v52  ;;  %4197 = vmatprep.mubr.bf16.mxu0 %v5512_v53  ;;  %v7959_v4 = vadd.f32 %v6184_v54, %v3636_v59  ;;  %v5562_v60 = vcombine.high %v303_v41, %v315_v44  ;;  %v338_v5 = vld [vmem:[%s7529_s27 + $0x500] sm:$0xff] }
 0x109   : > { %4334 = vmatprep.mubr.bf16.mxu1 %v5514_v57  ;;  %6639 = vmatpush3.bf16.msra.mxu0 %v7316_v58 }
 0x10a   : > { %v6094_v8 = vpop.f32.mrb[8].mxu0  ;;  %6733 = vmatpush3.bf16.msra.mxu1 %v7318_v62  ;;  %6640 = vmatprep.subr.bf16.mxu0 %v7319_v63  ;;  %v7979_v12 = vadd.f32 %v6187_v0, %v3639_v2 }
 0x10b   : > { %v6188_v13 = vpop.f32.mrb[8].mxu1  ;;  %v6095_v15 = vpop.f32.mrb[9].mxu0  ;;  %6734 = vmatprep.subr.bf16.mxu1 %v7321_v1 }
 0x10c   : > { %v6096_v18 = vadd.f32 %v6095_v15, %v6094_v8  ;;  %v6189_v19 = vpop.f32.mrb[9].mxu1  ;;  %v6097_v20 = vpop.f32.mrb[10].mxu0  ;;  %v339_v8 = vld [vmem:[%s7529_s27 + $0x508] sm:$0xff] }
 0x10d   : > { %v6190_v23 = vadd.f32 %v6189_v19, %v6188_v13  ;;  %v6191_v24 = vpop.f32.mrb[10].mxu1  ;;  %v6098_v25 = vpop.f32.mrb[11].mxu0  ;;  %6641 = vmatpush3.bf16.msra.mxu0 %v7320_v7  ;;  %v327_v7 = vld [vmem:[%s7529_s27 + $0x4a8] sm:$0xff]  ;;  %v5559_v13 = vcombine.low %v8007_v37, %v314_v39  ;;  %v5584_v19 = vcombine.high %v326_v3, %v338_v5 }
 0x10e   : > { %v3644_v28 = vadd.f32 %v6096_v18, %v7886_v14  ;;  %v6099_v29 = vadd.f32 %v6098_v25, %v6097_v20  ;;  %v6192_v30 = vpop.f32.mrb[11].mxu1  ;;  %6735 = vmatpush3.bf16.msra.mxu1 %v7322_v10  ;;  %6642 = vmatprep.subr.bf16.mxu0 %v7323_v11  ;;  %v5561_v18 = vcombine.low %v303_v41, %v315_v44 }
 0x10f   : > { %v6193_v33 = vadd.f32 %v6192_v30, %v6191_v24  ;;  %4198 = vmatmul.mubr.bf16.gmra.mrb[116].mxu0 %v5511_v16  ;;  %6736 = vmatprep.subr.bf16.mxu1 %v7325_v17  ;;  %v350_v30 = vld [vmem:[%s7529_s27 + $0x560] sm:$0xff]  ;;  %v5583_v41 = vcombine.low %v326_v3, %v338_v5 }
 0x110   : > { %v3647_v36 = vadd.f32 %v6099_v29, %v7886_v14  ;;  %4335 = vmatmul.mubr.bf16.gmra.mrb[116].mxu1 %v5513_v21  ;;  %4205 = vmatprep.mubr.bf16.mxu0 %v5536_v22  ;;  %v8009_v38 = vadd.f32 %v6190_v23, %v3644_v28  ;;  %v5586_v23 = vcombine.high %v327_v7, %v339_v8 }
 0x111   : > { %4342 = vmatprep.mubr.bf16.mxu1 %v5538_v26  ;;  %6643 = vmatpush3.bf16.msra.mxu0 %v7324_v27 }
 0x112   : > { %v6100_v43 = vpop.f32.mrb[12].mxu0  ;;  %6737 = vmatpush3.bf16.msra.mxu1 %v7326_v31  ;;  %6644 = vmatprep.subr.bf16.mxu0 %v7327_v32  ;;  %v8023_v47 = vadd.f32 %v6193_v33, %v3647_v36  ;;  %v362_v31 = vld [vmem:[%s7529_s27 + $0x5c0] sm:$0xff]  ;;  %v351_v33 = vld [vmem:[%s7529_s27 + $0x568] sm:$0xff] }
 0x113   : > { %v6194_v48 = vpop.f32.mrb[12].mxu1  ;;  %v6101_v49 = vpop.f32.mrb[13].mxu0  ;;  %6738 = vmatprep.subr.bf16.mxu1 %v7329_v35  ;;  %v363_v35 = vld [vmem:[%s7529_s27 + $0x5c8] sm:$0xff]  ;;  %v5607_v3 = vcombine.low %v350_v30, %v362_v31 }
 0x114   : > { %v6102_v52 = vadd.f32 %v6101_v49, %v6100_v43  ;;  %v6195_v53 = vpop.f32.mrb[13].mxu1  ;;  %v6103_v54 = vpop.f32.mrb[14].mxu0 }
 0x115   : > { %v6196_v57 = vadd.f32 %v6195_v53, %v6194_v48  ;;  %v6197_v58 = vpop.f32.mrb[14].mxu1  ;;  %v6104_v59 = vpop.f32.mrb[15].mxu0  ;;  %6645 = vmatpush3.bf16.msra.mxu0 %v7328_v42 }
 0x116   : > { %v3652_v61 = vadd.f32 %v6102_v52, %v7886_v14  ;;  %v6105_v62 = vadd.f32 %v6104_v59, %v6103_v54  ;;  %v6198_v63 = vpop.f32.mrb[15].mxu1  ;;  %6739 = vmatpush3.bf16.msra.mxu1 %v7330_v45  ;;  %6818 = vmatprep.subr.bf16.mxu0 %v7331_v46  ;;  %v5585_v45 = vcombine.low %v327_v7, %v339_v8  ;;  %v386_v59 = vld [vmem:[%s7529_s27 + $0x680] sm:$0xff] }
 0x117   : > { %v6199_v0 = vadd.f32 %v6198_v63, %v6197_v58  ;;  %4206 = vmatmul.mubr.bf16.gmra.mrb[120].mxu0 %v5535_v50  ;;  %6912 = vmatprep.subr.bf16.mxu1 %v7333_v51  ;;  %v5608_v46 = vcombine.high %v350_v30, %v362_v31  ;;  %v5610_v51 = vcombine.high %v351_v33, %v363_v35  ;;  %v374_v58 = vld [vmem:[%s7529_s27 + $0x620] sm:$0xff] }
 0x118   : > { %v3655_v1 = vadd.f32 %v6105_v62, %v7886_v14  ;;  %4343 = vmatmul.mubr.bf16.gmra.mrb[120].mxu1 %v5537_v55  ;;  %4213 = vmatprep.mubr.bf16.mxu0 %v5560_v56  ;;  %v8035_v2 = vadd.f32 %v6196_v57, %v3652_v61  ;;  %v375_v61 = vld [vmem:[%s7529_s27 + $0x628] sm:$0xff]  ;;  %v5609_v8 = vcombine.low %v351_v33, %v363_v35 }
 0x119   : > { %4350 = vmatprep.mubr.bf16.mxu1 %v5562_v60  ;;  %v387_v62 = vld [vmem:[%s7529_s27 + $0x688] sm:$0xff] }
 0x11a   : > { %v6106_v6 = vpop.f32.mrb[16].mxu0  ;;  %v8041_v9 = vadd.f32 %v6199_v0, %v3655_v1 }
 0x11b   : > { %v6200_v10 = vpop.f32.mrb[16].mxu1  ;;  %v6107_v11 = vpop.f32.mrb[17].mxu0 }
 0x11c   : > { %v6108_v15 = vadd.f32 %v6107_v11, %v6106_v6  ;;  %v6201_v16 = vpop.f32.mrb[17].mxu1  ;;  %v6109_v17 = vpop.f32.mrb[18].mxu0 }
 0x11d   : > { %v6202_v20 = vadd.f32 %v6201_v16, %v6200_v10  ;;  %v6203_v21 = vpop.f32.mrb[18].mxu1  ;;  %v6110_v22 = vpop.f32.mrb[19].mxu0  ;;  %v5632_v10 = vcombine.high %v374_v58, %v386_v59  ;;  %v5634_v16 = vcombine.high %v375_v61, %v387_v62 }
 0x11e   : > { %v3660_v24 = vadd.f32 %v6108_v15, %v7886_v14  ;;  %v6111_v25 = vadd.f32 %v6110_v22, %v6109_v17  ;;  %v6204_v26 = vpop.f32.mrb[19].mxu1 }
 0x11f   : > { %v6205_v27 = vadd.f32 %v6204_v26, %v6203_v21  ;;  %4214 = vmatmul.mubr.bf16.gmra.mrb[124].mxu0 %v5559_v13  ;;  %v399_v26 = vld [vmem:[%s7529_s27 + $0x6e8] sm:$0xff] }
 0x120   : > { %v3663_v28 = vadd.f32 %v6111_v25, %v7886_v14  ;;  %4351 = vmatmul.mubr.bf16.gmra.mrb[124].mxu1 %v5561_v18  ;;  %4221 = vmatprep.mubr.bf16.mxu0 %v5584_v19  ;;  %v8046_v29 = vadd.f32 %v6202_v20, %v3660_v24  ;;  %v410_v24 = vld [vmem:[%s7529_s27 + $0x740] sm:$0xff] }
 0x121   : > { %4358 = vmatprep.mubr.bf16.mxu1 %v5586_v23  ;;  %v398_v23 = vld [vmem:[%s7529_s27 + $0x6e0] sm:$0xff] }
 0x122   : > { %v6112_v32 = vpop.f32.mrb[20].mxu0  ;;  %v8052_v36 = vadd.f32 %v6205_v27, %v3663_v28  ;;  %v411_v27 = vld [vmem:[%s7529_s27 + $0x748] sm:$0xff] }
 0x123   : > { %v6206_v37 = vpop.f32.mrb[20].mxu1  ;;  %v6113_v39 = vpop.f32.mrb[21].mxu0 }
 0x124   : > { %v6114_v42 = vadd.f32 %v6113_v39, %v6112_v32  ;;  %v6207_v43 = vpop.f32.mrb[21].mxu1  ;;  %v6115_v44 = vpop.f32.mrb[22].mxu0  ;;  %v5631_v32 = vcombine.low %v374_v58, %v386_v59  ;;  %v5633_v39 = vcombine.low %v375_v61, %v387_v62  ;;  %v435_v58 = vld [vmem:[%s7529_s27 + $0x808] sm:$0xff]  ;;  %v5655_v62 = vcombine.low %v398_v23, %v410_v24 }
 0x125   : > { %v6208_v48 = vadd.f32 %v6207_v43, %v6206_v37  ;;  %v6209_v49 = vpop.f32.mrb[22].mxu1  ;;  %v6116_v50 = vpop.f32.mrb[23].mxu0 }
 0x126   : > { %v3668_v52 = vadd.f32 %v6114_v42, %v7886_v14  ;;  %v6117_v53 = vadd.f32 %v6116_v50, %v6115_v44  ;;  %v6210_v54 = vpop.f32.mrb[23].mxu1 }
 0x127   : > { %v6211_v55 = vadd.f32 %v6210_v54, %v6209_v49  ;;  %4222 = vmatmul.mubr.bf16.gmra.mrb[128].mxu0 %v5583_v41  ;;  %v5656_v41 = vcombine.high %v398_v23, %v410_v24  ;;  %v434_v54 = vld [vmem:[%s7529_s27 + $0x800] sm:$0xff]  ;;  %v447_v24 = vld [vmem:[%s7529_s27 + $0x868] sm:$0xff] }
 0x128   : > { %v3671_v56 = vadd.f32 %v6117_v53, %v7886_v14  ;;  %4359 = vmatmul.mubr.bf16.gmra.mrb[128].mxu1 %v5585_v45  ;;  %4229 = vmatprep.mubr.bf16.mxu0 %v5608_v46  ;;  %v8056_v57 = vadd.f32 %v6208_v48, %v3668_v52  ;;  %v5658_v45 = vcombine.high %v399_v26, %v411_v27  ;;  %v422_v53 = vld [vmem:[%s7529_s27 + $0x7a0] sm:$0xff] }
 0x129   : > { %4366 = vmatprep.mubr.bf16.mxu1 %v5610_v51 }
 0x12a   : > { %v6118_v60 = vpop.f32.mrb[24].mxu0  ;;  %v8062_v63 = vadd.f32 %v6211_v55, %v3671_v56  ;;  %v423_v56 = vld [vmem:[%s7529_s27 + $0x7a8] sm:$0xff] }
 0x12b   : > { %v6212_v0 = vpop.f32.mrb[24].mxu1  ;;  %v6119_v1 = vpop.f32.mrb[25].mxu0 }
 0x12c   : > { %v6120_v5 = vadd.f32 %v6119_v1, %v6118_v60  ;;  %v6213_v6 = vpop.f32.mrb[25].mxu1  ;;  %v6121_v7 = vpop.f32.mrb[26].mxu0 }
 0x12d   : > { %v6214_v11 = vadd.f32 %v6213_v6, %v6212_v0  ;;  %v6215_v13 = vpop.f32.mrb[26].mxu1  ;;  %v6122_v15 = vpop.f32.mrb[27].mxu0  ;;  %v5680_v6 = vcombine.high %v422_v53, %v434_v54 }
 0x12e   : > { %v3676_v17 = vadd.f32 %v6120_v5, %v7886_v14  ;;  %v6123_v18 = vadd.f32 %v6122_v15, %v6121_v7  ;;  %v6216_v19 = vpop.f32.mrb[27].mxu1  ;;  %v5657_v5 = vcombine.low %v399_v26, %v411_v27 }
 0x12f   : > { %v6217_v20 = vadd.f32 %v6216_v19, %v6215_v13  ;;  %4230 = vmatmul.mubr.bf16.gmra.mrb[132].mxu0 %v5607_v3 }
 0x130   : > { %v3679_v21 = vadd.f32 %v6123_v18, %v7886_v14  ;;  %4367 = vmatmul.mubr.bf16.gmra.mrb[132].mxu1 %v5609_v8  ;;  %4237 = vmatprep.mubr.bf16.mxu0 %v5632_v10  ;;  %v8066_v22 = vadd.f32 %v6214_v11, %v3676_v17  ;;  %v5682_v11 = vcombine.high %v423_v56, %v435_v58 }
 0x131   : > { %4374 = vmatprep.mubr.bf16.mxu1 %v5634_v16 }
 0x132   : > { %v6124_v25 = vpop.f32.mrb[28].mxu0  ;;  %v8072_v28 = vadd.f32 %v6217_v20, %v3679_v21  ;;  %v446_v20 = vld [vmem:[%s7529_s27 + $0x860] sm:$0xff] }
 0x133   : > { %v6218_v30 = vpop.f32.mrb[28].mxu1  ;;  %v6125_v31 = vpop.f32.mrb[29].mxu0  ;;  %v458_v21 = vld [vmem:[%s7529_s27 + $0x8c0] sm:$0xff] }
 0x134   : > { %v6126_v33 = vadd.f32 %v6125_v31, %v6124_v25  ;;  %v6219_v35 = vpop.f32.mrb[29].mxu1  ;;  %v6127_v37 = vpop.f32.mrb[30].mxu0  ;;  %v459_v25 = vld [vmem:[%s7529_s27 + $0x8c8] sm:$0xff]  ;;  %v5679_v31 = vcombine.low %v422_v53, %v434_v54  ;;  %v470_v53 = vld [vmem:[%s7529_s27 + $0x920] sm:$0xff] }
 0x135   : > { %v6220_v42 = vadd.f32 %v6219_v35, %v6218_v30  ;;  %v6221_v43 = vpop.f32.mrb[30].mxu1  ;;  %v6128_v44 = vpop.f32.mrb[31].mxu0  ;;  %v482_v54 = vld [vmem:[%s7529_s27 + $0x980] sm:$0xff] }
 0x136   : > { %v3684_v46 = vadd.f32 %v6126_v33, %v7886_v14  ;;  %v6129_v48 = vadd.f32 %v6128_v44, %v6127_v37  ;;  %v6222_v49 = vpop.f32.mrb[31].mxu1  ;;  %v5681_v37 = vcombine.low %v423_v56, %v435_v58  ;;  %v5706_v44 = vcombine.high %v447_v24, %v459_v25  ;;  %v471_v56 = vld [vmem:[%s7529_s27 + $0x928] sm:$0xff] }
 0x137   : > { %v6223_v50 = vadd.f32 %v6222_v49, %v6221_v43  ;;  %4238 = vmatmul.mubr.bf16.gmra.mrb[136].mxu0 %v5631_v32  ;;  %v483_v58 = vld [vmem:[%s7529_s27 + $0x988] sm:$0xff] }
 0x138   : > { %v3687_v51 = vadd.f32 %v6129_v48, %v7886_v14  ;;  %4375 = vmatmul.mubr.bf16.gmra.mrb[136].mxu1 %v5633_v39  ;;  %4245 = vmatprep.mubr.bf16.mxu0 %v5656_v41  ;;  %v8076_v52 = vadd.f32 %v6220_v42, %v3684_v46  ;;  %v5704_v39 = vcombine.high %v446_v20, %v458_v21 }
 0x139   : > { %4382 = vmatprep.mubr.bf16.mxu1 %v5658_v45 }
 0x13a   : > { %v6130_v55 = vpop.f32.mrb[32].mxu0  ;;  %v8082_v59 = vadd.f32 %v6223_v50, %v3687_v51 }
 0x13b   : > { %v6224_v60 = vpop.f32.mrb[32].mxu1  ;;  %v6131_v61 = vpop.f32.mrb[33].mxu0 }
 0x13c   : > { %v6132_v0 = vadd.f32 %v6131_v61, %v6130_v55  ;;  %v6225_v1 = vpop.f32.mrb[33].mxu1  ;;  %v6133_v3 = vpop.f32.mrb[34].mxu0 }
 0x13d   : > { %v6226_v7 = vadd.f32 %v6225_v1, %v6224_v60  ;;  %v6227_v8 = vpop.f32.mrb[34].mxu1  ;;  %v6134_v10 = vpop.f32.mrb[35].mxu0 }
 0x13e   : > { %v3692_v13 = vadd.f32 %v6132_v0, %v7886_v14  ;;  %v6135_v15 = vadd.f32 %v6134_v10, %v6133_v3  ;;  %v6228_v16 = vpop.f32.mrb[35].mxu1  ;;  %v5703_v0 = vcombine.low %v446_v20, %v458_v21 }
 0x13f   : > { %v6229_v17 = vadd.f32 %v6228_v16, %v6227_v8  ;;  %4246 = vmatmul.mubr.bf16.gmra.mrb[140].mxu0 %v5655_v62 }
 0x140   : > { %v3695_v18 = vadd.f32 %v6135_v15, %v7886_v14  ;;  %4383 = vmatmul.mubr.bf16.gmra.mrb[140].mxu1 %v5657_v5  ;;  %4253 = vmatprep.mubr.bf16.mxu0 %v5680_v6  ;;  %v8086_v19 = vadd.f32 %v6226_v7, %v3692_v13  ;;  %v5705_v6 = vcombine.low %v447_v24, %v459_v25  ;;  %v196_v24 = vld [vmem:[%s7529_s27 + $0x90] sm:$0xff] }
 0x141   : > { %4390 = vmatprep.mubr.bf16.mxu1 %v5682_v11  ;;  %v5728_v7 = vcombine.high %v470_v53, %v482_v54  ;;  %v5730_v13 = vcombine.high %v471_v56, %v483_v58 }
 0x142   : > { %v6136_v23 = vpop.f32.mrb[36].mxu0  ;;  %v8092_v26 = vadd.f32 %v6229_v17, %v3695_v18 }
 0x143   : > { %v6230_v27 = vpop.f32.mrb[36].mxu1  ;;  %v6137_v30 = vpop.f32.mrb[37].mxu0 }
 0x144   : > { %v6138_v32 = vadd.f32 %v6137_v30, %v6136_v23  ;;  %v6231_v33 = vpop.f32.mrb[37].mxu1  ;;  %v6139_v35 = vpop.f32.mrb[38].mxu0  ;;  %v184_v23 = vld [vmem:[%s7529_s27 + $0x30] sm:$0xff]  ;;  %v197_v30 = vld [vmem:[%s7529_s27 + $0x98] sm:$0xff] }
 0x145   : > { %v6232_v41 = vadd.f32 %v6231_v33, %v6230_v27  ;;  %v6233_v42 = vpop.f32.mrb[38].mxu1  ;;  %v6140_v43 = vpop.f32.mrb[39].mxu0  ;;  %v185_v27 = vld [vmem:[%s7529_s27 + $0x38] sm:$0xff] }
 0x146   : > { %v3700_v45 = vadd.f32 %v6138_v32, %v7886_v14  ;;  %v6141_v46 = vadd.f32 %v6140_v43, %v6139_v35  ;;  %v6234_v48 = vpop.f32.mrb[39].mxu1  ;;  %v5727_v35 = vcombine.low %v470_v53, %v482_v54  ;;  %v5444_v43 = vcombine.high %v184_v23, %v196_v24 }
 0x147   : > { %v6235_v49 = vadd.f32 %v6234_v48, %v6233_v42  ;;  %4254 = vmatmul.mubr.bf16.gmra.mrb[144].mxu0 %v5679_v31  ;;  %v5729_v42 = vcombine.low %v471_v56, %v483_v58  ;;  %v5446_v48 = vcombine.high %v185_v27, %v197_v30  ;;  %v8119_v58 = vld [vmem:[%s7529_s27 + $0xf0] sm:$0xff] }
 0x148   : > { %v3703_v50 = vadd.f32 %v6141_v46, %v7886_v14  ;;  %4391 = vmatmul.mubr.bf16.gmra.mrb[144].mxu1 %v5681_v37  ;;  %4261 = vmatprep.mubr.bf16.mxu0 %v5704_v39  ;;  %v8096_v51 = vadd.f32 %v6232_v41, %v3700_v45 }
 0x149   : > { %4398 = vmatprep.mubr.bf16.mxu1 %v5706_v44 }
 0x14a   : > { %v6142_v55 = vpop.f32.mrb[40].mxu0  ;;  %v8102_v60 = vadd.f32 %v6235_v49, %v3703_v50 }
 0x14b   : > { %v6236_v61 = vpop.f32.mrb[40].mxu1  ;;  %v6143_v62 = vpop.f32.mrb[41].mxu0 }
 0x14c   : > { %v6144_v1 = vadd.f32 %v6143_v62, %v6142_v55  ;;  %v6237_v3 = vpop.f32.mrb[41].mxu1  ;;  %v6145_v5 = vpop.f32.mrb[42].mxu0  ;;  %v8122_v62 = vld [vmem:[%s7529_s27 + $0x150] sm:$0xff] }
 0x14d   : > { %v6238_v8 = vadd.f32 %v6237_v3, %v6236_v61  ;;  %v6239_v10 = vpop.f32.mrb[42].mxu1  ;;  %v6146_v11 = vpop.f32.mrb[43].mxu0 }
 0x14e   : > { %v3708_v15 = vadd.f32 %v6144_v1, %v7886_v14  ;;  %v6147_v16 = vadd.f32 %v6146_v11, %v6145_v5  ;;  %v6240_v17 = vpop.f32.mrb[43].mxu1  ;;  %v5443_v5 = vcombine.low %v184_v23, %v196_v24  ;;  %v5468_v23 = vcombine.high %v8119_v58, %v8122_v62 }
 0x14f   : > { %v6241_v18 = vadd.f32 %v6240_v17, %v6239_v10  ;;  %4262 = vmatmul.mubr.bf16.gmra.mrb[148].mxu0 %v5703_v0 }
 0x150   : > { %v3711_v20 = vadd.f32 %v6147_v16, %v7886_v14  ;;  %4399 = vmatmul.mubr.bf16.gmra.mrb[148].mxu1 %v5705_v6  ;;  %4269 = vmatprep.mubr.bf16.mxu0 %v5728_v7  ;;  %v8106_v21 = vadd.f32 %v6238_v8, %v3708_v15  ;;  %v8127_v6 = vld [vmem:[%s7529_s27 + $0xf8] sm:$0xff]  ;;  %v7332_v15 = vld [vmem:[%s8961_s1 + $0x400] sm:$0xff]  }
 0x151   : > { %4406 = vmatprep.mubr.bf16.mxu1 %v5730_v13  ;;  %v8130_v7 = vld [vmem:[%s7529_s27 + $0x158] sm:$0xff]  ;;  %v5445_v13 = vcombine.low %v185_v27, %v197_v30 }
 0x152   : > { %v6148_v25 = vpop.f32.mrb[44].mxu0  ;;  %v8112_v31 = vadd.f32 %v6241_v18, %v3711_v20  ;;  %v7334_v20 = vld [vmem:[%s8961_s1 + $0x480] sm:$0xff]   ;;  %v5470_v30 = vcombine.high %v8127_v6, %v8130_v7 }
 0x153   : > { %v6242_v32 = vpop.f32.mrb[44].mxu1  ;;  %v6149_v33 = vpop.f32.mrb[45].mxu0 }
 0x154   : > { %v6150_v37 = vadd.f32 %v6149_v33, %v6148_v25  ;;  %v6243_v39 = vpop.f32.mrb[45].mxu1  ;;  %v6151_v41 = vpop.f32.mrb[46].mxu0 }
 0x155   : > { %v6244_v44 = vadd.f32 %v6243_v39, %v6242_v32  ;;  %v6245_v45 = vpop.f32.mrb[46].mxu1  ;;  %v6152_v46 = vpop.f32.mrb[47].mxu0  ;;  %v7335_v32 = vld [vmem:[%s8961_s1 + $0x448] sm:$0xff]  }
 0x156   : > { %v3716_v49 = vadd.f32 %v6150_v37, %v7886_v14  ;;  %v6153_v50 = vadd.f32 %v6152_v46, %v6151_v41  ;;  %v6246_v55 = vpop.f32.mrb[47].mxu1  ;;  %v7336_v39 = vld [vmem:[%s8961_s1 + $0x408] sm:$0xff]   ;;  %v8154_v41 = vld [vmem:[%s7529_s27 + $0x1b0] sm:$0xff]  ;;  %v8168_v46 = vld [vmem:[%s7529_s27 + $0x1b8] sm:$0xff] }
 0x157   : > { %v6247_v61 = vadd.f32 %v6246_v55, %v6245_v45  ;;  %4270 = vmatmul.mubr.bf16.gmra.mrb[152].mxu0 %v5727_v35  ;;  %v7337_v35 = vld [vmem:[%s8961_s1 + $0x4c8] sm:$0xff]  }
 0x158   : > { %v3719_v53 = vadd.f32 %v6153_v50, %v7886_v14  ;;  %4407 = vmatmul.mubr.bf16.gmra.mrb[152].mxu1 %v5729_v42  ;;  %4447 = vmatprep.mubr.bf16.mxu0 %v5444_v43  ;;  %v8116_v54 = vadd.f32 %v6244_v44, %v3716_v49  ;;  %v8159_v43 = vld [vmem:[%s7529_s27 + $0x210] sm:$0xff]  ;;  %v7338_v44 = vld [vmem:[%s8961_s1 + $0x488] sm:$0xff]  }
 0x159   : > { %4584 = vmatprep.mubr.bf16.mxu1 %v5446_v48  ;;  %v8171_v48 = vld [vmem:[%s7529_s27 + $0x218] sm:$0xff]  ;;  %v7341_v49 = vld [vmem:[%s8961_s1 + $0x4d0] sm:$0xff]  }
 0x15a   : > { %v6154_v56 = vpop.f32.mrb[48].mxu0  ;;  %v8124_v0 = vadd.f32 %v6247_v61, %v3719_v53  ;;  %v5467_v53 = vcombine.low %v8119_v58, %v8122_v62  ;;  %v7340_v58 = vld [vmem:[%s8961_s1 + $0x410] sm:$0xff]  }
 0x15b   : > { %v6248_v1 = vpop.f32.mrb[48].mxu1  ;;  %v6155_v3 = vpop.f32.mrb[49].mxu0 }
 0x15c   : > { %v6156_v8 = vadd.f32 %v6155_v3, %v6154_v56  ;;  %v6249_v10 = vpop.f32.mrb[49].mxu1  ;;  %v6157_v11 = vpop.f32.mrb[50].mxu0 }
 0x15d   : > { %v6250_v16 = vadd.f32 %v6249_v10, %v6248_v1  ;;  %v6251_v17 = vpop.f32.mrb[50].mxu1  ;;  %v6158_v18 = vpop.f32.mrb[51].mxu0 }
 0x15e   : > { %v3724_v24 = vadd.f32 %v6156_v8, %v7886_v14  ;;  %v6159_v25 = vadd.f32 %v6158_v18, %v6157_v11  ;;  %v6252_v27 = vpop.f32.mrb[51].mxu1  ;;  %v5492_v8 = vcombine.high %v8154_v41, %v8159_v43 }
 0x15f   : > { %v6253_v33 = vadd.f32 %v6252_v27, %v6251_v17  ;;  %4448 = vmatmul.mubr.bf16.vlgmr.msra.gmra.mrb[156].mxu0 %v5443_v5  ;;  %v5469_v5 = vcombine.low %v8127_v6, %v8130_v7  ;;  %v7343_v17 = vld [vmem:[%s8961_s1 + $0x458] sm:$0xff]  }
 0x160   : > { %v3727_v37 = vadd.f32 %v6159_v25, %v7886_v14  ;;  %4585 = vmatmul.mubr.bf16.vlgmr.msra.gmra.mrb[156].mxu1 %v5445_v13  ;;  %6819 = vmatpush3.bf16.msra.mxu0 %v7332_v15  ;;  %v8156_v42 = vadd.f32 %v6250_v16, %v3724_v24  ;;  %v7339_v14 = vld [vmem:[%s8961_s1 + $0x450] sm:$0xff]   ;;  %v5494_v15 = vcombine.high %v8168_v46, %v8171_v48  ;;  %v8209_v27 = vld [vmem:[%s7529_s27 + $0x278] sm:$0xff] }
 0x161   : > { %6913 = vmatpush3.bf16.msra.mxu1 %v7334_v20  ;;  %4455 = vmatprep.mubr.bf16.mxu0 %v5468_v23  ;;  %v7342_v16 = vld [vmem:[%s8961_s1 + $0x490] sm:$0xff]   ;;  %v7345_v20 = vld [vmem:[%s8961_s1 + $0x4d8] sm:$0xff]  }
 0x162   : > { %v6270_v45 = vpop.f32.mrb[52].mxu0  ;;  %4592 = vmatprep.mubr.bf16.mxu1 %v5470_v30  ;;  %6820 = vmatprep.subr.bf16.mxu0 %v7335_v32  ;;  %v8176_v50 = vadd.f32 %v6253_v33, %v3727_v37  ;;  %v8201_v23 = vld [vmem:[%s7529_s27 + $0x270] sm:$0xff]  ;;  %v7344_v30 = vld [vmem:[%s8961_s1 + $0x418] sm:$0xff]  }
 0x163   : > { %v6364_v55 = vpop.f32.mrb[52].mxu1  ;;  %v6271_v61 = vpop.f32.mrb[53].mxu0  ;;  %6914 = vmatprep.subr.bf16.mxu1 %v7337_v35  ;;  %v8206_v25 = vld [vmem:[%s7529_s27 + $0x2d0] sm:$0xff]  ;;  %v8215_v33 = vld [vmem:[%s7529_s27 + $0x2d8] sm:$0xff]  ;;  %v7347_v35 = vld [vmem:[%s8961_s1 + $0x460] sm:$0xff]  }
 0x164   : > { %v6272_v56 = vadd.f32 %v6271_v61, %v6270_v45  ;;  %v6365_v1 = vpop.f32.mrb[53].mxu1  ;;  %v6273_v3 = vpop.f32.mrb[54].mxu0  ;;  %6821 = vmatpush3.bf16.msra.mxu0 %v7336_v39  ;;  %v7349_v45 = vld [vmem:[%s8961_s1 + $0x4e0] sm:$0xff]  }
 0x165   : > { %v6366_v10 = vadd.f32 %v6365_v1, %v6364_v55  ;;  %v6367_v11 = vpop.f32.mrb[54].mxu1  ;;  %v6274_v13 = vpop.f32.mrb[55].mxu0  ;;  %6915 = vmatpush3.bf16.msra.mxu1 %v7338_v44  ;;  %6822 = vmatprep.subr.bf16.mxu0 %v7339_v14  ;;  %v5491_v14 = vcombine.low %v8154_v41, %v8159_v43  ;;  %v5518_v41 = vcombine.high %v8209_v27, %v8215_v33  ;;  %v7348_v43 = vld [vmem:[%s8961_s1 + $0x420] sm:$0xff]  }
 0x166   : > { %v3902_v62 = vadd.f32 %v6272_v56, %v7905_v34  ;;  %v6275_v6 = vadd.f32 %v6274_v13, %v6273_v3  ;;  %v6368_v7 = vpop.f32.mrb[55].mxu1  ;;  %6916 = vmatprep.subr.bf16.mxu1 %v7341_v49  ;;  %v5516_v56 = vcombine.high %v8201_v23, %v8206_v25 }
 0x167   : > { %v6369_v18 = vadd.f32 %v6368_v7, %v6367_v11  ;;  %4456 = vmatmul.mubr.bf16.gmra.mrb[160].mxu0 %v5467_v53  ;;  %v5493_v53 = vcombine.low %v8168_v46, %v8171_v48  ;;  %v7350_v48 = vld [vmem:[%s8961_s1 + $0x4a0] sm:$0xff]   ;;  %v7351_v11 = vld [vmem:[%s8961_s1 + $0x468] sm:$0xff]   ;;  %v8259_v7 = vld [vmem:[%s7529_s27 + $0x338] sm:$0xff] }
 0x168   : > { %v3905_v34 = vadd.f32 %v6275_v6, %v7920_v40  ;;  %4593 = vmatmul.mubr.bf16.gmra.mrb[160].mxu1 %v5469_v5  ;;  %4463 = vmatprep.mubr.bf16.mxu0 %v5492_v8  ;;  %v8203_v24 = vadd.f32 %v6366_v10, %v3902_v62  ;;  %v7346_v40 = vld [vmem:[%s8961_s1 + $0x498] sm:$0xff]   ;;  %v8253_v62 = vld [vmem:[%s7529_s27 + $0x330] sm:$0xff] }
 0x169   : > { %4600 = vmatprep.mubr.bf16.mxu1 %v5494_v15  ;;  %6823 = vmatpush3.bf16.msra.mxu0 %v7340_v58  ;;  %v8256_v6 = vld [vmem:[%s7529_s27 + $0x390] sm:$0xff] }
 0x16a   : > { %v6276_v32 = vpop.f32.mrb[56].mxu0  ;;  %6917 = vmatpush3.bf16.msra.mxu1 %v7342_v16  ;;  %6824 = vmatprep.subr.bf16.mxu0 %v7343_v17  ;;  %v8223_v37 = vadd.f32 %v6369_v18, %v3905_v34  ;;  %v7352_v16 = vld [vmem:[%s8961_s1 + $0x428] sm:$0xff]   ;;  %v7355_v34 = vld [vmem:[%s8961_s1 + $0x470] sm:$0xff]  }
 0x16b   : > { %v6370_v39 = vpop.f32.mrb[56].mxu1  ;;  %v6277_v44 = vpop.f32.mrb[57].mxu0  ;;  %6918 = vmatprep.subr.bf16.mxu1 %v7345_v20  ;;  %v8267_v20 = vld [vmem:[%s7529_s27 + $0x398] sm:$0xff] }
 0x16c   : > { %v6278_v49 = vadd.f32 %v6277_v44, %v6276_v32  ;;  %v6371_v55 = vpop.f32.mrb[57].mxu1  ;;  %v6279_v61 = vpop.f32.mrb[58].mxu0 }
 0x16d   : > { %v6372_v1 = vadd.f32 %v6371_v55, %v6370_v39  ;;  %v6373_v3 = vpop.f32.mrb[58].mxu1  ;;  %v6280_v5 = vpop.f32.mrb[59].mxu0  ;;  %6825 = vmatpush3.bf16.msra.mxu0 %v7344_v30 }
 0x16e   : > { %v3910_v8 = vadd.f32 %v6278_v49, %v7959_v4  ;;  %v6281_v10 = vadd.f32 %v6280_v5, %v6279_v61  ;;  %v6374_v46 = vpop.f32.mrb[59].mxu1  ;;  %6919 = vmatpush3.bf16.msra.mxu1 %v7346_v40  ;;  %6826 = vmatprep.subr.bf16.mxu0 %v7347_v35  ;;  %v7353_v4 = vld [vmem:[%s8961_s1 + $0x4e8] sm:$0xff]   ;;  %v5515_v40 = vcombine.low %v8201_v23, %v8206_v25  ;;  %v7357_v35 = vld [vmem:[%s8961_s1 + $0x4f0] sm:$0xff]  }
 0x16f   : > { %v6375_v13 = vadd.f32 %v6374_v46, %v6373_v3  ;;  %4464 = vmatmul.mubr.bf16.gmra.mrb[164].mxu0 %v5491_v14  ;;  %6920 = vmatprep.subr.bf16.mxu1 %v7349_v45  ;;  %v5517_v45 = vcombine.low %v8209_v27, %v8215_v33  ;;  %v5540_v49 = vcombine.high %v8253_v62, %v8256_v6  ;;  %v7356_v25 = vld [vmem:[%s8961_s1 + $0x430] sm:$0xff]   ;;  %v7359_v3 = vld [vmem:[%s8961_s1 + $0x478] sm:$0xff]  }
 0x170   : > { %v8249_v15 = vadd.f32 %v6372_v1, %v3910_v8  ;;  %v3913_v58 = vadd.f32 %v6281_v10, %v7979_v12  ;;  %4601 = vmatmul.mubr.bf16.gmra.mrb[164].mxu1 %v5493_v53  ;;  %4471 = vmatprep.mubr.bf16.mxu0 %v5516_v56  ;;  %v7354_v12 = vld [vmem:[%s8961_s1 + $0x4a8] sm:$0xff]   ;;  %v5542_v23 = vcombine.high %v8259_v7, %v8267_v20  ;;  %v7358_v33 = vld [vmem:[%s8961_s1 + $0x4b0] sm:$0xff]   ;;  %v8307_v46 = vld [vmem:[%s7529_s27 + $0x3f8] sm:$0xff] }
 0x171   : > { %4608 = vmatprep.mubr.bf16.mxu1 %v5518_v41  ;;  %6827 = vmatpush3.bf16.msra.mxu0 %v7348_v43  ;;  %v8303_v8 = vld [vmem:[%s7529_s27 + $0x3f0] sm:$0xff] }
 0x172   : > { %v8264_v17 = vadd.f32 %v6375_v13, %v3913_v58  ;;  %v6282_v18 = vpop.f32.mrb[60].mxu0  ;;  %6921 = vmatpush3.bf16.msra.mxu1 %v7350_v48  ;;  %6828 = vmatprep.subr.bf16.mxu0 %v7351_v11  ;;  %v316_v10 = vld [vmem:[%s7529_s27 + $0x450] sm:$0xff]  ;;  %v7360_v48 = vld [vmem:[%s8961_s1 + $0x438] sm:$0xff]   ;;  %v7363_v58 = vld [vmem:[%s8961_s1 + $0x540] sm:$0xff]  }
 0x173   : > { %v6376_v30 = vpop.f32.mrb[60].mxu1  ;;  %v6283_v32 = vpop.f32.mrb[61].mxu0  ;;  %6922 = vmatprep.subr.bf16.mxu1 %v7353_v4  ;;  %v317_v4 = vld [vmem:[%s7529_s27 + $0x458] sm:$0xff] }
 0x174   : > { %v6284_v39 = vadd.f32 %v6283_v32, %v6282_v18  ;;  %v6377_v44 = vpop.f32.mrb[61].mxu1  ;;  %v6285_v14 = vpop.f32.mrb[62].mxu0 }
 0x175   : > { %v6378_v55 = vadd.f32 %v6377_v44, %v6376_v30  ;;  %v6379_v61 = vpop.f32.mrb[62].mxu1  ;;  %v6286_v53 = vpop.f32.mrb[63].mxu0  ;;  %6829 = vmatpush3.bf16.msra.mxu0 %v7352_v16 }
 0x176   : > { %v3918_v56 = vadd.f32 %v6284_v39, %v8009_v38  ;;  %v6287_v1 = vadd.f32 %v6286_v53, %v6285_v14  ;;  %v6380_v27 = vpop.f32.mrb[63].mxu1  ;;  %6923 = vmatpush3.bf16.msra.mxu1 %v7354_v12  ;;  %6830 = vmatprep.subr.bf16.mxu0 %v7355_v34  ;;  %v7361_v38 = vld [vmem:[%s8961_s1 + $0x4f8] sm:$0xff]   ;;  %v5539_v12 = vcombine.low %v8253_v62, %v8256_v6  ;;  %v7365_v34 = vld [vmem:[%s8961_s1 + $0x5c0] sm:$0xff]   ;;  %v328_v53 = vld [vmem:[%s7529_s27 + $0x4b0] sm:$0xff] }
 0x177   : > { %v6381_v5 = vadd.f32 %v6380_v27, %v6379_v61  ;;  %4472 = vmatmul.mubr.bf16.gmra.mrb[168].mxu0 %v5515_v40  ;;  %6924 = vmatprep.subr.bf16.mxu1 %v7357_v35  ;;  %v5541_v35 = vcombine.low %v8259_v7, %v8267_v20  ;;  %v5564_v39 = vcombine.high %v8303_v8, %v316_v10 }
 0x178   : > { %v8299_v41 = vadd.f32 %v6378_v55, %v3918_v56  ;;  %v3921_v43 = vadd.f32 %v6287_v1, %v8023_v47  ;;  %4609 = vmatmul.mubr.bf16.gmra.mrb[168].mxu1 %v5517_v45  ;;  %4479 = vmatprep.mubr.bf16.mxu0 %v5540_v49  ;;  %v7362_v47 = vld [vmem:[%s8961_s1 + $0x4b8] sm:$0xff]   ;;  %v5566_v49 = vcombine.high %v8307_v46, %v317_v4 }
 0x179   : > { %4616 = vmatprep.mubr.bf16.mxu1 %v5542_v23  ;;  %6831 = vmatpush3.bf16.msra.mxu0 %v7356_v25  ;;  %v340_v23 = vld [vmem:[%s7529_s27 + $0x510] sm:$0xff]  ;;  %v329_v56 = vld [vmem:[%s7529_s27 + $0x4b8] sm:$0xff] }
 0x17a   : > { %v8312_v11 = vadd.f32 %v6381_v5, %v3921_v43  ;;  %v6288_v13 = vpop.f32.mrb[64].mxu0  ;;  %6925 = vmatpush3.bf16.msra.mxu1 %v7358_v33  ;;  %6832 = vmatprep.subr.bf16.mxu0 %v7359_v3  ;;  %v341_v1 = vld [vmem:[%s7529_s27 + $0x518] sm:$0xff]  ;;  %v5563_v3 = vcombine.low %v8303_v8, %v316_v10 }
 0x17b   : > { %v6382_v16 = vpop.f32.mrb[64].mxu1  ;;  %v6289_v18 = vpop.f32.mrb[65].mxu0  ;;  %6926 = vmatprep.subr.bf16.mxu1 %v7361_v38 }
 0x17c   : > { %v6290_v30 = vadd.f32 %v6289_v18, %v6288_v13  ;;  %v6383_v32 = vpop.f32.mrb[65].mxu1  ;;  %v6291_v40 = vpop.f32.mrb[66].mxu0 }
 0x17d   : > { %v6384_v44 = vadd.f32 %v6383_v32, %v6382_v16  ;;  %v6385_v14 = vpop.f32.mrb[66].mxu1  ;;  %v6292_v45 = vpop.f32.mrb[67].mxu0  ;;  %6833 = vmatpush3.bf16.msra.mxu0 %v7360_v48  ;;  %v5565_v48 = vcombine.low %v8307_v46, %v317_v4  ;;  %v5590_v16 = vcombine.high %v329_v56, %v341_v1  ;;  %v352_v46 = vld [vmem:[%s7529_s27 + $0x570] sm:$0xff] }
 0x17e   : > { %v3926_v62 = vadd.f32 %v6290_v30, %v8035_v2  ;;  %v6293_v6 = vadd.f32 %v6292_v45, %v6291_v40  ;;  %v6386_v55 = vpop.f32.mrb[67].mxu1  ;;  %6927 = vmatpush3.bf16.msra.mxu1 %v7362_v47  ;;  %7006 = vmatprep.subr.bf16.mxu0 %v7363_v58  ;;  %v364_v4 = vld [vmem:[%s7529_s27 + $0x5d0] sm:$0xff] }
 0x17f   : > { %v6387_v61 = vadd.f32 %v6386_v55, %v6385_v14  ;;  %4480 = vmatmul.mubr.bf16.gmra.mrb[172].mxu0 %v5539_v12  ;;  %7100 = vmatprep.subr.bf16.mxu1 %v7365_v34  ;;  %v5587_v14 = vcombine.low %v328_v53, %v340_v23  ;;  %v5612_v55 = vcombine.high %v352_v46, %v364_v4 }
 0x180   : > { %v8331_v7 = vadd.f32 %v6384_v44, %v3926_v62  ;;  %v3929_v20 = vadd.f32 %v6293_v6, %v8041_v9  ;;  %4617 = vmatmul.mubr.bf16.gmra.mrb[172].mxu1 %v5541_v35  ;;  %4487 = vmatprep.mubr.bf16.mxu0 %v5564_v39  ;;  %v5588_v9 = vcombine.high %v328_v53, %v340_v23  ;;  %v353_v35 = vld [vmem:[%s7529_s27 + $0x578] sm:$0xff] }
 0x181   : > { %4624 = vmatprep.mubr.bf16.mxu1 %v5566_v49  ;;  %v365_v39 = vld [vmem:[%s7529_s27 + $0x5d8] sm:$0xff]  ;;  %v5589_v6 = vcombine.low %v329_v56, %v341_v1  ;;  %v376_v56 = vld [vmem:[%s7529_s27 + $0x630] sm:$0xff] }
 0x182   : > { %v8336_v25 = vadd.f32 %v6387_v61, %v3929_v20  ;;  %v6294_v2 = vpop.f32.mrb[68].mxu0  ;;  %v388_v1 = vld [vmem:[%s7529_s27 + $0x690] sm:$0xff] }
 0x183   : > { %v6388_v27 = vpop.f32.mrb[68].mxu1  ;;  %v6295_v33 = vpop.f32.mrb[69].mxu0 }
 0x184   : > { %v6296_v5 = vadd.f32 %v6295_v33, %v6294_v2  ;;  %v6389_v38 = vpop.f32.mrb[69].mxu1  ;;  %v6297_v43 = vpop.f32.mrb[70].mxu0  ;;  %v5614_v2 = vcombine.high %v353_v35, %v365_v39 }
 0x185   : > { %v6390_v13 = vadd.f32 %v6389_v38, %v6388_v27  ;;  %v6391_v47 = vpop.f32.mrb[70].mxu1  ;;  %v6298_v58 = vpop.f32.mrb[71].mxu0 }
 0x186   : > { %v3934_v18 = vadd.f32 %v6296_v5, %v8046_v29  ;;  %v6299_v12 = vadd.f32 %v6298_v58, %v6297_v43  ;;  %v6392_v34 = vpop.f32.mrb[71].mxu1 }
 0x187   : > { %v6393_v30 = vadd.f32 %v6392_v34, %v6391_v47  ;;  %4488 = vmatmul.mubr.bf16.gmra.mrb[176].mxu0 %v5563_v3  ;;  %v5611_v47 = vcombine.low %v352_v46, %v364_v4  ;;  %v5636_v34 = vcombine.high %v376_v56, %v388_v1 }
 0x188   : > { %v8343_v8 = vadd.f32 %v6390_v13, %v3934_v18  ;;  %v3937_v10 = vadd.f32 %v6299_v12, %v8052_v36  ;;  %4625 = vmatmul.mubr.bf16.gmra.mrb[176].mxu1 %v5565_v48  ;;  %4495 = vmatprep.mubr.bf16.mxu0 %v5588_v9  ;;  %v377_v48 = vld [vmem:[%s7529_s27 + $0x638] sm:$0xff]  ;;  %v5613_v12 = vcombine.low %v353_v35, %v365_v39  ;;  %v400_v35 = vld [vmem:[%s7529_s27 + $0x6f0] sm:$0xff] }
 0x189   : > { %4632 = vmatprep.mubr.bf16.mxu1 %v5590_v16  ;;  %v389_v9 = vld [vmem:[%s7529_s27 + $0x698] sm:$0xff]  ;;  %v412_v39 = vld [vmem:[%s7529_s27 + $0x750] sm:$0xff] }
 0x18a   : > { %v8348_v32 = vadd.f32 %v6393_v30, %v3937_v10  ;;  %v6300_v40 = vpop.f32.mrb[72].mxu0 }
 0x18b   : > { %v6394_v44 = vpop.f32.mrb[72].mxu1  ;;  %v6301_v29 = vpop.f32.mrb[73].mxu0 }
 0x18c   : > { %v6302_v45 = vadd.f32 %v6301_v29, %v6300_v40  ;;  %v6395_v49 = vpop.f32.mrb[73].mxu1  ;;  %v6303_v62 = vpop.f32.mrb[74].mxu0  ;;  %v5638_v40 = vcombine.high %v377_v48, %v389_v9 }
 0x18d   : > { %v6396_v36 = vadd.f32 %v6395_v49, %v6394_v44  ;;  %v6397_v61 = vpop.f32.mrb[74].mxu1  ;;  %v6304_v20 = vpop.f32.mrb[75].mxu0 }
 0x18e   : > { %v3942_v27 = vadd.f32 %v6302_v45, %v8056_v57  ;;  %v6305_v33 = vadd.f32 %v6304_v20, %v6303_v62  ;;  %v6398_v3 = vpop.f32.mrb[75].mxu1 }
 0x18f   : > { %v6399_v5 = vadd.f32 %v6398_v3, %v6397_v61  ;;  %4496 = vmatmul.mubr.bf16.gmra.mrb[180].mxu0 %v5587_v14  ;;  %v5635_v61 = vcombine.low %v376_v56, %v388_v1  ;;  %v5660_v3 = vcombine.high %v400_v35, %v412_v39 }
 0x190   : > { %v8353_v53 = vadd.f32 %v6396_v36, %v3942_v27  ;;  %v3945_v23 = vadd.f32 %v6305_v33, %v8062_v63  ;;  %4633 = vmatmul.mubr.bf16.gmra.mrb[180].mxu1 %v5589_v6  ;;  %4503 = vmatprep.mubr.bf16.mxu0 %v5612_v55  ;;  %v401_v6 = vld [vmem:[%s7529_s27 + $0x6f8] sm:$0xff]  ;;  %v5637_v33 = vcombine.low %v377_v48, %v389_v9  ;;  %v424_v48 = vld [vmem:[%s7529_s27 + $0x7b0] sm:$0xff] }
 0x191   : > { %4640 = vmatprep.mubr.bf16.mxu1 %v5614_v2  ;;  %v413_v55 = vld [vmem:[%s7529_s27 + $0x758] sm:$0xff]  ;;  %v436_v9 = vld [vmem:[%s7529_s27 + $0x810] sm:$0xff] }
 0x192   : > { %v8358_v38 = vadd.f32 %v6399_v5, %v3945_v23  ;;  %v6306_v43 = vpop.f32.mrb[76].mxu0 }
 0x193   : > { %v6400_v13 = vpop.f32.mrb[76].mxu1  ;;  %v6307_v57 = vpop.f32.mrb[77].mxu0 }
 0x194   : > { %v6308_v58 = vadd.f32 %v6307_v57, %v6306_v43  ;;  %v6401_v16 = vpop.f32.mrb[77].mxu1  ;;  %v6309_v18 = vpop.f32.mrb[78].mxu0  ;;  %v5662_v43 = vcombine.high %v401_v6, %v413_v55 }
 0x195   : > { %v6402_v63 = vadd.f32 %v6401_v16, %v6400_v13  ;;  %v6403_v30 = vpop.f32.mrb[78].mxu1  ;;  %v6310_v10 = vpop.f32.mrb[79].mxu0 }
 0x196   : > { %v3950_v44 = vadd.f32 %v6308_v58, %v8066_v22  ;;  %v6311_v29 = vadd.f32 %v6310_v10, %v6309_v18  ;;  %v6404_v14 = vpop.f32.mrb[79].mxu1 }
 0x197   : > { %v6405_v45 = vadd.f32 %v6404_v14, %v6403_v30  ;;  %4504 = vmatmul.mubr.bf16.gmra.mrb[184].mxu0 %v5611_v47  ;;  %v5659_v30 = vcombine.low %v400_v35, %v412_v39  ;;  %v5684_v14 = vcombine.high %v424_v48, %v436_v9 }
 0x198   : > { %v8363_v46 = vadd.f32 %v6402_v63, %v3950_v44  ;;  %v3953_v4 = vadd.f32 %v6311_v29, %v8072_v28  ;;  %4641 = vmatmul.mubr.bf16.gmra.mrb[184].mxu1 %v5613_v12  ;;  %4511 = vmatprep.mubr.bf16.mxu0 %v5636_v34  ;;  %v425_v12 = vld [vmem:[%s7529_s27 + $0x7b8] sm:$0xff]  ;;  %v5661_v29 = vcombine.low %v401_v6, %v413_v55  ;;  %v448_v6 = vld [vmem:[%s7529_s27 + $0x870] sm:$0xff] }
 0x199   : > { %4648 = vmatprep.mubr.bf16.mxu1 %v5638_v40  ;;  %v437_v34 = vld [vmem:[%s7529_s27 + $0x818] sm:$0xff]  ;;  %v460_v55 = vld [vmem:[%s7529_s27 + $0x8d0] sm:$0xff] }
 0x19a   : > { %v8368_v49 = vadd.f32 %v6405_v45, %v3953_v4  ;;  %v6312_v62 = vpop.f32.mrb[80].mxu0 }
 0x19b   : > { %v6406_v36 = vpop.f32.mrb[80].mxu1  ;;  %v6313_v22 = vpop.f32.mrb[81].mxu0 }
 0x19c   : > { %v6314_v20 = vadd.f32 %v6313_v22, %v6312_v62  ;;  %v6407_v2 = vpop.f32.mrb[81].mxu1  ;;  %v6315_v27 = vpop.f32.mrb[82].mxu0  ;;  %v5686_v62 = vcombine.high %v425_v12, %v437_v34 }
 0x19d   : > { %v6408_v28 = vadd.f32 %v6407_v2, %v6406_v36  ;;  %v6409_v5 = vpop.f32.mrb[82].mxu1  ;;  %v6316_v23 = vpop.f32.mrb[83].mxu0 }
 0x19e   : > { %v3958_v13 = vadd.f32 %v6314_v20, %v8076_v52  ;;  %v6317_v57 = vadd.f32 %v6316_v23, %v6315_v27  ;;  %v6410_v47 = vpop.f32.mrb[83].mxu1 }
 0x19f   : > { %v6411_v58 = vadd.f32 %v6410_v47, %v6409_v5  ;;  %4512 = vmatmul.mubr.bf16.gmra.mrb[188].mxu0 %v5635_v61  ;;  %v5683_v5 = vcombine.low %v424_v48, %v436_v9  ;;  %v5708_v47 = vcombine.high %v448_v6, %v460_v55 }
 0x1a0   : > { %v8373_v56 = vadd.f32 %v6408_v28, %v3958_v13  ;;  %v3961_v1 = vadd.f32 %v6317_v57, %v8082_v59  ;;  %4649 = vmatmul.mubr.bf16.gmra.mrb[188].mxu1 %v5637_v33  ;;  %4519 = vmatprep.mubr.bf16.mxu0 %v5660_v3  ;;  %v449_v33 = vld [vmem:[%s7529_s27 + $0x878] sm:$0xff]  ;;  %v5685_v57 = vcombine.low %v425_v12, %v437_v34  ;;  %v472_v12 = vld [vmem:[%s7529_s27 + $0x930] sm:$0xff] }
 0x1a1   : > { %4656 = vmatprep.mubr.bf16.mxu1 %v5662_v43  ;;  %v461_v3 = vld [vmem:[%s7529_s27 + $0x8d8] sm:$0xff]  ;;  %v484_v34 = vld [vmem:[%s7529_s27 + $0x990] sm:$0xff] }
 0x1a2   : > { %v8378_v16 = vadd.f32 %v6411_v58, %v3961_v1  ;;  %v6318_v18 = vpop.f32.mrb[84].mxu0 }
 0x1a3   : > { %v6412_v63 = vpop.f32.mrb[84].mxu1  ;;  %v6319_v52 = vpop.f32.mrb[85].mxu0 }
 0x1a4   : > { %v6320_v10 = vadd.f32 %v6319_v52, %v6318_v18  ;;  %v6413_v40 = vpop.f32.mrb[85].mxu1  ;;  %v6321_v44 = vpop.f32.mrb[86].mxu0  ;;  %v5710_v18 = vcombine.high %v449_v33, %v461_v3 }
 0x1a5   : > { %v6414_v59 = vadd.f32 %v6413_v40, %v6412_v63  ;;  %v6415_v45 = vpop.f32.mrb[86].mxu1  ;;  %v6322_v4 = vpop.f32.mrb[87].mxu0 }
 0x1a6   : > { %v3966_v36 = vadd.f32 %v6320_v10, %v8086_v19  ;;  %v6323_v22 = vadd.f32 %v6322_v4, %v6321_v44  ;;  %v6416_v61 = vpop.f32.mrb[87].mxu1 }
 0x1a7   : > { %v6417_v20 = vadd.f32 %v6416_v61, %v6415_v45  ;;  %4520 = vmatmul.mubr.bf16.gmra.mrb[192].mxu0 %v5659_v30  ;;  %v5707_v45 = vcombine.low %v448_v6, %v460_v55  ;;  %v5732_v61 = vcombine.high %v472_v12, %v484_v34 }
 0x1a8   : > { %v8383_v35 = vadd.f32 %v6414_v59, %v3966_v36  ;;  %v3969_v39 = vadd.f32 %v6323_v22, %v8092_v26  ;;  %4657 = vmatmul.mubr.bf16.gmra.mrb[192].mxu1 %v5661_v29  ;;  %4527 = vmatprep.mubr.bf16.mxu0 %v5684_v14  ;;  %v473_v29 = vld [vmem:[%s7529_s27 + $0x938] sm:$0xff]  ;;  %v5709_v22 = vcombine.low %v449_v33, %v461_v3  ;;  %v186_v33 = vld [vmem:[%s7529_s27 + $0x40] sm:$0xff] }
 0x1a9   : > { %4664 = vmatprep.mubr.bf16.mxu1 %v5686_v62  ;;  %v485_v14 = vld [vmem:[%s7529_s27 + $0x998] sm:$0xff]  ;;  %v198_v3 = vld [vmem:[%s7529_s27 + $0xa0] sm:$0xff] }
 0x1aa   : > { %v8388_v2 = vadd.f32 %v6417_v20, %v3969_v39  ;;  %v6324_v27 = vpop.f32.mrb[88].mxu0 }
 0x1ab   : > { %v6418_v28 = vpop.f32.mrb[88].mxu1  ;;  %v6325_v19 = vpop.f32.mrb[89].mxu0 }
 0x1ac   : > { %v6326_v23 = vadd.f32 %v6325_v19, %v6324_v27  ;;  %v6419_v43 = vpop.f32.mrb[89].mxu1  ;;  %v6327_v13 = vpop.f32.mrb[90].mxu0  ;;  %v5734_v27 = vcombine.high %v473_v29, %v485_v14 }
 0x1ad   : > { %v6420_v26 = vadd.f32 %v6419_v43, %v6418_v28  ;;  %v6421_v58 = vpop.f32.mrb[90].mxu1  ;;  %v6328_v1 = vpop.f32.mrb[91].mxu0 }
 0x1ae   : > { %v3974_v63 = vadd.f32 %v6326_v23, %v8096_v51  ;;  %v6329_v52 = vadd.f32 %v6328_v1, %v6327_v13  ;;  %v6422_v30 = vpop.f32.mrb[91].mxu1 }
 0x1af   : > { %v6423_v10 = vadd.f32 %v6422_v30, %v6421_v58  ;;  %4528 = vmatmul.mubr.bf16.gmra.mrb[196].mxu0 %v5683_v5  ;;  %v5731_v58 = vcombine.low %v472_v12, %v484_v34  ;;  %v5448_v30 = vcombine.high %v186_v33, %v198_v3 }
 0x1b0   : > { %v8393_v48 = vadd.f32 %v6420_v26, %v3974_v63  ;;  %v3977_v9 = vadd.f32 %v6329_v52, %v8102_v60  ;;  %4665 = vmatmul.mubr.bf16.gmra.mrb[196].mxu1 %v5685_v57  ;;  %4535 = vmatprep.mubr.bf16.mxu0 %v5708_v47  ;;  %v187_v57 = vld [vmem:[%s7529_s27 + $0x48] sm:$0xff]  ;;  %v5733_v52 = vcombine.low %v473_v29, %v485_v14 }
 0x1b1   : > { %4672 = vmatprep.mubr.bf16.mxu1 %v5710_v18  ;;  %v199_v47 = vld [vmem:[%s7529_s27 + $0xa8] sm:$0xff] }
 0x1b2   : > { %v8398_v40 = vadd.f32 %v6423_v10, %v3977_v9  ;;  %v6330_v44 = vpop.f32.mrb[92].mxu0 }
 0x1b3   : > { %v6424_v59 = vpop.f32.mrb[92].mxu1  ;;  %v6331_v51 = vpop.f32.mrb[93].mxu0 }
 0x1b4   : > { %v6332_v4 = vadd.f32 %v6331_v51, %v6330_v44  ;;  %v6425_v62 = vpop.f32.mrb[93].mxu1  ;;  %v6333_v36 = vpop.f32.mrb[94].mxu0  ;;  %v5450_v44 = vcombine.high %v187_v57, %v199_v47 }
 0x1b5   : > { %v6426_v60 = vadd.f32 %v6425_v62, %v6424_v59  ;;  %v6427_v20 = vpop.f32.mrb[94].mxu1  ;;  %v6334_v39 = vpop.f32.mrb[95].mxu0  ;;  %v8419_v62 = vld [vmem:[%s7529_s27 + $0x100] sm:$0xff] }
 0x1b6   : > { %v3982_v28 = vadd.f32 %v6332_v4, %v8106_v21  ;;  %v6335_v19 = vadd.f32 %v6334_v39, %v6333_v36  ;;  %v6428_v5 = vpop.f32.mrb[95].mxu1  ;;  %v8422_v36 = vld [vmem:[%s7529_s27 + $0x160] sm:$0xff] }
 0x1b7   : > { %v6429_v23 = vadd.f32 %v6428_v5, %v6427_v20  ;;  %4536 = vmatmul.mubr.bf16.gmra.mrb[200].mxu0 %v5707_v45  ;;  %v8428_v20 = vld [vmem:[%s7529_s27 + $0x168] sm:$0xff] }
 0x1b8   : > { %v8403_v6 = vadd.f32 %v6426_v60, %v3982_v28  ;;  %v3985_v55 = vadd.f32 %v6335_v19, %v8112_v31  ;;  %4673 = vmatmul.mubr.bf16.gmra.mrb[200].mxu1 %v5709_v22  ;;  %4543 = vmatprep.mubr.bf16.mxu0 %v5732_v61  ;;  %v5447_v61 = vcombine.low %v186_v33, %v198_v3  ;;  %v8425_v60 = vld [vmem:[%s7529_s27 + $0x108] sm:$0xff]  ;;  %v7364_v19 = vld [vmem:[%s8961_s1 + $0x500] sm:$0xff]  }
 0x1b9   : > { %4680 = vmatprep.mubr.bf16.mxu1 %v5734_v27  ;;  %v5449_v28 = vcombine.low %v187_v57, %v199_v47  ;;  %v7366_v33 = vld [vmem:[%s8961_s1 + $0x580] sm:$0xff]   ;;  %v5472_v3 = vcombine.high %v8419_v62, %v8422_v36  ;;  %v5474_v47 = vcombine.high %v8425_v60, %v8428_v20 }
 0x1ba   : > { %v8408_v43 = vadd.f32 %v6429_v23, %v3985_v55  ;;  %v6336_v13 = vpop.f32.mrb[96].mxu0 }
 0x1bb   : > { %v6430_v26 = vpop.f32.mrb[96].mxu1  ;;  %v6337_v21 = vpop.f32.mrb[97].mxu0 }
 0x1bc   : > { %v6338_v1 = vadd.f32 %v6337_v21, %v6336_v13  ;;  %v6431_v18 = vpop.f32.mrb[97].mxu1  ;;  %v6339_v63 = vpop.f32.mrb[98].mxu0  ;;  %v7367_v21 = vld [vmem:[%s8961_s1 + $0x548] sm:$0xff]  }
 0x1bd   : > { %v6432_v10 = vadd.f32 %v6431_v18, %v6430_v26  ;;  %v6433_v31 = vpop.f32.mrb[98].mxu1  ;;  %v6340_v9 = vpop.f32.mrb[99].mxu0 }
 0x1be   : > { %v3990_v59 = vadd.f32 %v6338_v1, %v8116_v54  ;;  %v6341_v51 = vadd.f32 %v6340_v9, %v6339_v63  ;;  %v6434_v45 = vpop.f32.mrb[99].mxu1  ;;  %v7369_v1 = vld [vmem:[%s8961_s1 + $0x5c8] sm:$0xff]  }
 0x1bf   : > { %v6435_v4 = vadd.f32 %v6434_v45, %v6433_v31  ;;  %4544 = vmatmul.mubr.bf16.gmra.mrb[204].mxu0 %v5731_v58  ;;  %v7368_v63 = vld [vmem:[%s8961_s1 + $0x508] sm:$0xff]  }
 0x1c0   : > { %v8413_v12 = vadd.f32 %v6432_v10, %v3990_v59  ;;  %v3993_v34 = vadd.f32 %v6341_v51, %v8124_v0  ;;  %4681 = vmatmul.mubr.bf16.gmra.mrb[204].mxu1 %v5733_v52  ;;  %4721 = vmatprep.mubr.bf16.mxu0 %v5448_v30  ;;  %v8454_v52 = vld [vmem:[%s7529_s27 + $0x1c0] sm:$0xff]  ;;  %v7370_v10 = vld [vmem:[%s8961_s1 + $0x588] sm:$0xff]   ;;  %v7373_v51 = vld [vmem:[%s8961_s1 + $0x5d0] sm:$0xff]  }
 0x1c1   : > { %4858 = vmatprep.mubr.bf16.mxu1 %v5450_v44  ;;  %v8457_v30 = vld [vmem:[%s7529_s27 + $0x220] sm:$0xff]  ;;  %v8468_v44 = vld [vmem:[%s7529_s27 + $0x1c8] sm:$0xff] }
 0x1c2   : > { %v8416_v29 = vadd.f32 %v6435_v4, %v3993_v34  ;;  %v6342_v14 = vpop.f32.mrb[100].mxu0  ;;  %v8471_v59 = vld [vmem:[%s7529_s27 + $0x228] sm:$0xff]  ;;  %v5471_v34 = vcombine.low %v8419_v62, %v8422_v36  ;;  %v7372_v62 = vld [vmem:[%s8961_s1 + $0x510] sm:$0xff]  }
 0x1c3   : > { %v6436_v54 = vpop.f32.mrb[100].mxu1  ;;  %v6343_v22 = vpop.f32.mrb[101].mxu0 }
 0x1c4   : > { %v6344_v39 = vadd.f32 %v6343_v22, %v6342_v14  ;;  %v6437_v27 = vpop.f32.mrb[101].mxu1  ;;  %v6345_v0 = vpop.f32.mrb[102].mxu0 }
 0x1c5   : > { %v6438_v5 = vadd.f32 %v6437_v27, %v6436_v54  ;;  %v6439_v23 = vpop.f32.mrb[102].mxu1  ;;  %v6346_v55 = vpop.f32.mrb[103].mxu0 }
 0x1c6   : > { %v3998_v13 = vadd.f32 %v6344_v39, %v8156_v42  ;;  %v6347_v26 = vadd.f32 %v6346_v55, %v6345_v0  ;;  %v6440_v57 = vpop.f32.mrb[103].mxu1  ;;  %v5496_v39 = vcombine.high %v8454_v52, %v8457_v30 }
 0x1c7   : > { %v6441_v58 = vadd.f32 %v6440_v57, %v6439_v23  ;;  %4722 = vmatmul.mubr.bf16.vlgmr.msra.gmra.mrb[208].mxu0 %v5447_v61  ;;  %v5473_v61 = vcombine.low %v8425_v60, %v8428_v20  ;;  %v7375_v23 = vld [vmem:[%s8961_s1 + $0x558] sm:$0xff]   ;;  %v8507_v57 = vld [vmem:[%s7529_s27 + $0x288] sm:$0xff] }
 0x1c8   : > { %v8447_v18 = vadd.f32 %v6438_v5, %v3998_v13  ;;  %v4001_v42 = vadd.f32 %v6347_v26, %v8176_v50  ;;  %4859 = vmatmul.mubr.bf16.vlgmr.msra.gmra.mrb[208].mxu1 %v5449_v28  ;;  %7007 = vmatpush3.bf16.msra.mxu0 %v7364_v19  ;;  %v7371_v50 = vld [vmem:[%s8961_s1 + $0x550] sm:$0xff]   ;;  %v5498_v19 = vcombine.high %v8468_v44, %v8471_v59  ;;  %v8501_v13 = vld [vmem:[%s7529_s27 + $0x280] sm:$0xff] }
 0x1c9   : > { %7101 = vmatpush3.bf16.msra.mxu1 %v7366_v33  ;;  %4729 = vmatprep.mubr.bf16.mxu0 %v5472_v3  ;;  %v7374_v5 = vld [vmem:[%s8961_s1 + $0x590] sm:$0xff]   ;;  %v7377_v33 = vld [vmem:[%s8961_s1 + $0x5d8] sm:$0xff]   ;;  %v8504_v26 = vld [vmem:[%s7529_s27 + $0x2e0] sm:$0xff] }
 0x1ca   : > { %v8465_v31 = vadd.f32 %v6441_v58, %v4001_v42  ;;  %v6458_v9 = vpop.f32.mrb[104].mxu0  ;;  %4866 = vmatprep.mubr.bf16.mxu1 %v5474_v47  ;;  %7008 = vmatprep.subr.bf16.mxu0 %v7367_v21  ;;  %v7376_v47 = vld [vmem:[%s8961_s1 + $0x518] sm:$0xff]   ;;  %v7379_v42 = vld [vmem:[%s8961_s1 + $0x560] sm:$0xff]  }
 0x1cb   : > { %v6552_v45 = vpop.f32.mrb[104].mxu1  ;;  %v6459_v4 = vpop.f32.mrb[105].mxu0  ;;  %7102 = vmatprep.subr.bf16.mxu1 %v7369_v1  ;;  %v8515_v1 = vld [vmem:[%s7529_s27 + $0x2e8] sm:$0xff] }
 0x1cc   : > { %v6460_v14 = vadd.f32 %v6459_v4, %v6458_v9  ;;  %v6553_v54 = vpop.f32.mrb[105].mxu1  ;;  %v6461_v22 = vpop.f32.mrb[106].mxu0  ;;  %7009 = vmatpush3.bf16.msra.mxu0 %v7368_v63  ;;  %v7381_v9 = vld [vmem:[%s8961_s1 + $0x5e0] sm:$0xff]  }
 0x1cd   : > { %v6554_v27 = vadd.f32 %v6553_v54, %v6552_v45  ;;  %v6555_v0 = vpop.f32.mrb[106].mxu1  ;;  %v6462_v28 = vpop.f32.mrb[107].mxu0  ;;  %7103 = vmatpush3.bf16.msra.mxu1 %v7370_v10  ;;  %7010 = vmatprep.subr.bf16.mxu0 %v7371_v50  ;;  %v5495_v50 = vcombine.low %v8454_v52, %v8457_v30  ;;  %v5522_v52 = vcombine.high %v8507_v57, %v8515_v1  ;;  %v7380_v30 = vld [vmem:[%s8961_s1 + $0x520] sm:$0xff]  }
 0x1ce   : > { %v4176_v36 = vadd.f32 %v6460_v14, %v8203_v24  ;;  %v6463_v60 = vadd.f32 %v6462_v28, %v6461_v22  ;;  %v6556_v20 = vpop.f32.mrb[107].mxu1  ;;  %7104 = vmatprep.subr.bf16.mxu1 %v7373_v51  ;;  %v5520_v14 = vcombine.high %v8501_v13, %v8504_v26 }
 0x1cf   : > { %v6557_v55 = vadd.f32 %v6556_v20, %v6555_v0  ;;  %4730 = vmatmul.mubr.bf16.gmra.mrb[212].mxu0 %v5471_v34  ;;  %v5497_v34 = vcombine.low %v8468_v44, %v8471_v59  ;;  %v7382_v59 = vld [vmem:[%s8961_s1 + $0x5a0] sm:$0xff]   ;;  %v7383_v0 = vld [vmem:[%s8961_s1 + $0x568] sm:$0xff]  }
 0x1d0   : > { %v8497_v24 = vadd.f32 %v6554_v27, %v4176_v36  ;;  %v4179_v3 = vadd.f32 %v6463_v60, %v8223_v37  ;;  %4867 = vmatmul.mubr.bf16.gmra.mrb[212].mxu1 %v5473_v61  ;;  %4737 = vmatprep.mubr.bf16.mxu0 %v5496_v39  ;;  %v7378_v37 = vld [vmem:[%s8961_s1 + $0x598] sm:$0xff]   ;;  %v8551_v36 = vld [vmem:[%s7529_s27 + $0x340] sm:$0xff]  ;;  %v8557_v20 = vld [vmem:[%s7529_s27 + $0x348] sm:$0xff] }
 0x1d1   : > { %4874 = vmatprep.mubr.bf16.mxu1 %v5498_v19  ;;  %7011 = vmatpush3.bf16.msra.mxu0 %v7372_v62  ;;  %v8554_v60 = vld [vmem:[%s7529_s27 + $0x3a0] sm:$0xff] }
 0x1d2   : > { %v8512_v21 = vadd.f32 %v6557_v55, %v4179_v3  ;;  %v6464_v58 = vpop.f32.mrb[108].mxu0  ;;  %7105 = vmatpush3.bf16.msra.mxu1 %v7374_v5  ;;  %7012 = vmatprep.subr.bf16.mxu0 %v7375_v23  ;;  %v7384_v5 = vld [vmem:[%s8961_s1 + $0x528] sm:$0xff]   ;;  %v7387_v3 = vld [vmem:[%s8961_s1 + $0x570] sm:$0xff]  }
 0x1d3   : > { %v6558_v63 = vpop.f32.mrb[108].mxu1  ;;  %v6465_v10 = vpop.f32.mrb[109].mxu0  ;;  %7106 = vmatprep.subr.bf16.mxu1 %v7377_v33  ;;  %v8565_v33 = vld [vmem:[%s7529_s27 + $0x3a8] sm:$0xff] }
 0x1d4   : > { %v6466_v51 = vadd.f32 %v6465_v10, %v6464_v58  ;;  %v6559_v45 = vpop.f32.mrb[109].mxu1  ;;  %v6467_v4 = vpop.f32.mrb[110].mxu0 }
 0x1d5   : > { %v6560_v54 = vadd.f32 %v6559_v45, %v6558_v63  ;;  %v6561_v22 = vpop.f32.mrb[110].mxu1  ;;  %v6468_v61 = vpop.f32.mrb[111].mxu0  ;;  %7013 = vmatpush3.bf16.msra.mxu0 %v7376_v47 }
 0x1d6   : > { %v4184_v39 = vadd.f32 %v6466_v51, %v8249_v15  ;;  %v6469_v27 = vadd.f32 %v6468_v61, %v6467_v4  ;;  %v6562_v44 = vpop.f32.mrb[111].mxu1  ;;  %7107 = vmatpush3.bf16.msra.mxu1 %v7378_v37  ;;  %7014 = vmatprep.subr.bf16.mxu0 %v7379_v42  ;;  %v7385_v15 = vld [vmem:[%s8961_s1 + $0x5e8] sm:$0xff]   ;;  %v5519_v37 = vcombine.low %v8501_v13, %v8504_v26  ;;  %v7389_v42 = vld [vmem:[%s8961_s1 + $0x5f0] sm:$0xff]  }
 0x1d7   : > { %v6563_v28 = vadd.f32 %v6562_v44, %v6561_v22  ;;  %4738 = vmatmul.mubr.bf16.gmra.mrb[216].mxu0 %v5495_v50  ;;  %7108 = vmatprep.subr.bf16.mxu1 %v7381_v9  ;;  %v5521_v9 = vcombine.low %v8507_v57, %v8515_v1  ;;  %v5544_v51 = vcombine.high %v8551_v36, %v8554_v60  ;;  %v7388_v26 = vld [vmem:[%s8961_s1 + $0x530] sm:$0xff]   ;;  %v7391_v22 = vld [vmem:[%s8961_s1 + $0x578] sm:$0xff]  }
 0x1d8   : > { %v8547_v19 = vadd.f32 %v6560_v54, %v4184_v39  ;;  %v4187_v62 = vadd.f32 %v6469_v27, %v8264_v17  ;;  %4875 = vmatmul.mubr.bf16.gmra.mrb[216].mxu1 %v5497_v34  ;;  %4745 = vmatprep.mubr.bf16.mxu0 %v5520_v14  ;;  %v7386_v17 = vld [vmem:[%s8961_s1 + $0x5a8] sm:$0xff]   ;;  %v5546_v13 = vcombine.high %v8557_v20, %v8565_v33  ;;  %v7390_v1 = vld [vmem:[%s8961_s1 + $0x5b0] sm:$0xff]   ;;  %v306_v39 = vld [vmem:[%s7529_s27 + $0x400] sm:$0xff] }
 0x1d9   : > { %4882 = vmatprep.mubr.bf16.mxu1 %v5522_v52  ;;  %7015 = vmatpush3.bf16.msra.mxu0 %v7380_v30  ;;  %v318_v27 = vld [vmem:[%s7529_s27 + $0x460] sm:$0xff]  ;;  %v7392_v44 = vld [vmem:[%s8961_s1 + $0x538] sm:$0xff]  }
 0x1da   : > { %v8562_v23 = vadd.f32 %v6563_v28, %v4187_v62  ;;  %v6470_v55 = vpop.f32.mrb[112].mxu0  ;;  %7109 = vmatpush3.bf16.msra.mxu1 %v7382_v59  ;;  %7016 = vmatprep.subr.bf16.mxu0 %v7383_v0  ;;  %v307_v28 = vld [vmem:[%s7529_s27 + $0x408] sm:$0xff] }
 0x1db   : > { %v6564_v47 = vpop.f32.mrb[112].mxu1  ;;  %v6471_v58 = vpop.f32.mrb[113].mxu0  ;;  %7110 = vmatprep.subr.bf16.mxu1 %v7385_v15  ;;  %v319_v15 = vld [vmem:[%s7529_s27 + $0x468] sm:$0xff] }
 0x1dc   : > { %v6472_v63 = vadd.f32 %v6471_v58, %v6470_v55  ;;  %v6565_v10 = vpop.f32.mrb[113].mxu1  ;;  %v6473_v50 = vpop.f32.mrb[114].mxu0  ;;  %v5543_v55 = vcombine.low %v8551_v36, %v8554_v60  ;;  %v5545_v58 = vcombine.low %v8557_v20, %v8565_v33  ;;  %v330_v33 = vld [vmem:[%s7529_s27 + $0x4c0] sm:$0xff] }
 0x1dd   : > { %v6566_v45 = vadd.f32 %v6565_v10, %v6564_v47  ;;  %v6567_v4 = vpop.f32.mrb[114].mxu1  ;;  %v6474_v34 = vpop.f32.mrb[115].mxu0  ;;  %7017 = vmatpush3.bf16.msra.mxu0 %v7384_v5 }
 0x1de   : > { %v4192_v14 = vadd.f32 %v6472_v63, %v8299_v41  ;;  %v6475_v54 = vadd.f32 %v6474_v34, %v6473_v50  ;;  %v6568_v57 = vpop.f32.mrb[115].mxu1  ;;  %7111 = vmatpush3.bf16.msra.mxu1 %v7386_v17  ;;  %7018 = vmatprep.subr.bf16.mxu0 %v7387_v3  ;;  %v7393_v41 = vld [vmem:[%s8961_s1 + $0x5f8] sm:$0xff]   ;;  %v5570_v50 = vcombine.high %v307_v28, %v319_v15 }
 0x1df   : > { %v6569_v61 = vadd.f32 %v6568_v57, %v6567_v4  ;;  %4746 = vmatmul.mubr.bf16.gmra.mrb[220].mxu0 %v5519_v37  ;;  %7112 = vmatprep.subr.bf16.mxu1 %v7389_v42  ;;  %v5568_v37 = vcombine.high %v306_v39, %v318_v27  ;;  %v342_v4 = vld [vmem:[%s7529_s27 + $0x520] sm:$0xff]  ;;  %v5567_v57 = vcombine.low %v306_v39, %v318_v27 }
 0x1e0   : > { %v8597_v52 = vadd.f32 %v6566_v45, %v4192_v14  ;;  %v4195_v30 = vadd.f32 %v6475_v54, %v8312_v11  ;;  %4883 = vmatmul.mubr.bf16.gmra.mrb[220].mxu1 %v5521_v9  ;;  %4753 = vmatprep.mubr.bf16.mxu0 %v5544_v51  ;;  %v7394_v11 = vld [vmem:[%s8961_s1 + $0x5b8] sm:$0xff]  }
 0x1e1   : > { %4890 = vmatprep.mubr.bf16.mxu1 %v5546_v13  ;;  %7019 = vmatpush3.bf16.msra.mxu0 %v7388_v26  ;;  %v331_v26 = vld [vmem:[%s7529_s27 + $0x4c8] sm:$0xff] }
 0x1e2   : > { %v8605_v59 = vadd.f32 %v6569_v61, %v4195_v30  ;;  %v6476_v0 = vpop.f32.mrb[116].mxu0  ;;  %7113 = vmatpush3.bf16.msra.mxu1 %v7390_v1  ;;  %7020 = vmatprep.subr.bf16.mxu0 %v7391_v22  ;;  %v5592_v30 = vcombine.high %v330_v33, %v342_v4 }
 0x1e3   : > { %v6570_v62 = vpop.f32.mrb[116].mxu1  ;;  %v6477_v5 = vpop.f32.mrb[117].mxu0  ;;  %7114 = vmatprep.subr.bf16.mxu1 %v7393_v41  ;;  %v5569_v41 = vcombine.low %v307_v28, %v319_v15  ;;  %v354_v28 = vld [vmem:[%s7529_s27 + $0x580] sm:$0xff] }
 0x1e4   : > { %v6478_v17 = vadd.f32 %v6477_v5, %v6476_v0  ;;  %v6571_v3 = vpop.f32.mrb[117].mxu1  ;;  %v6479_v47 = vpop.f32.mrb[118].mxu0  ;;  %v366_v15 = vld [vmem:[%s7529_s27 + $0x5e0] sm:$0xff] }
 0x1e5   : > { %v6572_v42 = vadd.f32 %v6571_v3, %v6570_v62  ;;  %v6573_v63 = vpop.f32.mrb[118].mxu1  ;;  %v6480_v10 = vpop.f32.mrb[119].mxu0  ;;  %7021 = vmatpush3.bf16.msra.mxu0 %v7392_v44 }
 0x1e6   : > { %v4200_v9 = vadd.f32 %v6478_v17, %v8331_v7  ;;  %v6481_v36 = vadd.f32 %v6480_v10, %v6479_v47  ;;  %v6574_v60 = vpop.f32.mrb[119].mxu1  ;;  %7115 = vmatpush3.bf16.msra.mxu1 %v7394_v11  ;;  %v343_v7 = vld [vmem:[%s7529_s27 + $0x528] sm:$0xff] }
 0x1e7   : > { %v6575_v51 = vadd.f32 %v6574_v60, %v6573_v63  ;;  %4754 = vmatmul.mubr.bf16.gmra.mrb[224].mxu0 %v5543_v55  ;;  %v5594_v11 = vcombine.high %v331_v26, %v343_v7  ;;  %v5591_v63 = vcombine.low %v330_v33, %v342_v4  ;;  %v5616_v60 = vcombine.high %v354_v28, %v366_v15 }
 0x1e8   : > { %v8617_v45 = vadd.f32 %v6572_v42, %v4200_v9  ;;  %v4203_v20 = vadd.f32 %v6481_v36, %v8336_v25  ;;  %4891 = vmatmul.mubr.bf16.gmra.mrb[224].mxu1 %v5545_v58  ;;  %4761 = vmatprep.mubr.bf16.mxu0 %v5568_v37  ;;  %v355_v58 = vld [vmem:[%s7529_s27 + $0x588] sm:$0xff]  ;;  %v5593_v36 = vcombine.low %v331_v26, %v343_v7  ;;  %v378_v26 = vld [vmem:[%s7529_s27 + $0x640] sm:$0xff] }
 0x1e9   : > { %4898 = vmatprep.mubr.bf16.mxu1 %v5570_v50  ;;  %v367_v37 = vld [vmem:[%s7529_s27 + $0x5e8] sm:$0xff]  ;;  %v390_v7 = vld [vmem:[%s7529_s27 + $0x6a0] sm:$0xff] }
 0x1ea   : > { %v8622_v34 = vadd.f32 %v6575_v51, %v4203_v20  ;;  %v6482_v13 = vpop.f32.mrb[120].mxu0 }
 0x1eb   : > { %v6576_v14 = vpop.f32.mrb[120].mxu1  ;;  %v6483_v54 = vpop.f32.mrb[121].mxu0 }
 0x1ec   : > { %v6484_v1 = vadd.f32 %v6483_v54, %v6482_v13  ;;  %v6577_v22 = vpop.f32.mrb[121].mxu1  ;;  %v6485_v61 = vpop.f32.mrb[122].mxu0  ;;  %v5618_v13 = vcombine.high %v355_v58, %v367_v37 }
 0x1ed   : > { %v6578_v25 = vadd.f32 %v6577_v22, %v6576_v14  ;;  %v6579_v44 = vpop.f32.mrb[122].mxu1  ;;  %v6486_v0 = vpop.f32.mrb[123].mxu0 }
 0x1ee   : > { %v4208_v62 = vadd.f32 %v6484_v1, %v8343_v8  ;;  %v6487_v5 = vadd.f32 %v6486_v0, %v6485_v61  ;;  %v6580_v55 = vpop.f32.mrb[123].mxu1 }
 0x1ef   : > { %v6581_v17 = vadd.f32 %v6580_v55, %v6579_v44  ;;  %4762 = vmatmul.mubr.bf16.gmra.mrb[228].mxu0 %v5567_v57  ;;  %v5615_v44 = vcombine.low %v354_v28, %v366_v15  ;;  %v5640_v55 = vcombine.high %v378_v26, %v390_v7 }
 0x1f0   : > { %v8627_v39 = vadd.f32 %v6578_v25, %v4208_v62  ;;  %v4211_v27 = vadd.f32 %v6487_v5, %v8348_v32  ;;  %4899 = vmatmul.mubr.bf16.gmra.mrb[228].mxu1 %v5569_v41  ;;  %4769 = vmatprep.mubr.bf16.mxu0 %v5592_v30  ;;  %v379_v41 = vld [vmem:[%s7529_s27 + $0x648] sm:$0xff]  ;;  %v5617_v5 = vcombine.low %v355_v58, %v367_v37  ;;  %v402_v58 = vld [vmem:[%s7529_s27 + $0x700] sm:$0xff] }
 0x1f1   : > { %4906 = vmatprep.mubr.bf16.mxu1 %v5594_v11  ;;  %v391_v30 = vld [vmem:[%s7529_s27 + $0x6a8] sm:$0xff]  ;;  %v414_v37 = vld [vmem:[%s7529_s27 + $0x760] sm:$0xff] }
 0x1f2   : > { %v8632_v3 = vadd.f32 %v6581_v17, %v4211_v27  ;;  %v6488_v47 = vpop.f32.mrb[124].mxu0 }
 0x1f3   : > { %v6582_v42 = vpop.f32.mrb[124].mxu1  ;;  %v6489_v8 = vpop.f32.mrb[125].mxu0 }
 0x1f4   : > { %v6490_v10 = vadd.f32 %v6489_v8, %v6488_v47  ;;  %v6583_v50 = vpop.f32.mrb[125].mxu1  ;;  %v6491_v9 = vpop.f32.mrb[126].mxu0  ;;  %v5642_v47 = vcombine.high %v379_v41, %v391_v30 }
 0x1f5   : > { %v6584_v32 = vadd.f32 %v6583_v50, %v6582_v42  ;;  %v6585_v51 = vpop.f32.mrb[126].mxu1  ;;  %v6492_v20 = vpop.f32.mrb[127].mxu0 }
 0x1f6   : > { %v4216_v14 = vadd.f32 %v6490_v10, %v8353_v53  ;;  %v6493_v54 = vadd.f32 %v6492_v20, %v6491_v9  ;;  %v6586_v57 = vpop.f32.mrb[127].mxu1 }
 0x1f7   : > { %v6587_v1 = vadd.f32 %v6586_v57, %v6585_v51  ;;  %4770 = vmatmul.mubr.bf16.gmra.mrb[232].mxu0 %v5591_v63  ;;  %v5639_v51 = vcombine.low %v378_v26, %v390_v7  ;;  %v5664_v57 = vcombine.high %v402_v58, %v414_v37 }
 0x1f8   : > { %v8637_v33 = vadd.f32 %v6584_v32, %v4216_v14  ;;  %v4219_v4 = vadd.f32 %v6493_v54, %v8358_v38  ;;  %4907 = vmatmul.mubr.bf16.gmra.mrb[232].mxu1 %v5593_v36  ;;  %4777 = vmatprep.mubr.bf16.mxu0 %v5616_v60  ;;  %v403_v36 = vld [vmem:[%s7529_s27 + $0x708] sm:$0xff]  ;;  %v5641_v54 = vcombine.low %v379_v41, %v391_v30  ;;  %v426_v41 = vld [vmem:[%s7529_s27 + $0x7c0] sm:$0xff] }
 0x1f9   : > { %4914 = vmatprep.mubr.bf16.mxu1 %v5618_v13  ;;  %v415_v60 = vld [vmem:[%s7529_s27 + $0x768] sm:$0xff]  ;;  %v438_v30 = vld [vmem:[%s7529_s27 + $0x820] sm:$0xff] }
 0x1fa   : > { %v8642_v22 = vadd.f32 %v6587_v1, %v4219_v4  ;;  %v6494_v61 = vpop.f32.mrb[128].mxu0 }
 0x1fb   : > { %v6588_v25 = vpop.f32.mrb[128].mxu1  ;;  %v6495_v53 = vpop.f32.mrb[129].mxu0 }
 0x1fc   : > { %v6496_v0 = vadd.f32 %v6495_v53, %v6494_v61  ;;  %v6589_v11 = vpop.f32.mrb[129].mxu1  ;;  %v6497_v62 = vpop.f32.mrb[130].mxu0  ;;  %v5666_v61 = vcombine.high %v403_v36, %v415_v60 }
 0x1fd   : > { %v6590_v38 = vadd.f32 %v6589_v11, %v6588_v25  ;;  %v6591_v17 = vpop.f32.mrb[130].mxu1  ;;  %v6498_v27 = vpop.f32.mrb[131].mxu0 }
 0x1fe   : > { %v4224_v42 = vadd.f32 %v6496_v0, %v8363_v46  ;;  %v6499_v8 = vadd.f32 %v6498_v27, %v6497_v62  ;;  %v6592_v63 = vpop.f32.mrb[131].mxu1 }
 0x1ff   : > { %v6593_v10 = vadd.f32 %v6592_v63, %v6591_v17  ;;  %4778 = vmatmul.mubr.bf16.gmra.mrb[236].mxu0 %v5615_v44  ;;  %v5663_v17 = vcombine.low %v402_v58, %v414_v37  ;;  %v5688_v63 = vcombine.high %v426_v41, %v438_v30 }
 0x200   : > { %v8647_v28 = vadd.f32 %v6590_v38, %v4224_v42  ;;  %v4227_v15 = vadd.f32 %v6499_v8, %v8368_v49  ;;  %4915 = vmatmul.mubr.bf16.gmra.mrb[236].mxu1 %v5617_v5  ;;  %4785 = vmatprep.mubr.bf16.mxu0 %v5640_v55  ;;  %v427_v5 = vld [vmem:[%s7529_s27 + $0x7c8] sm:$0xff]  ;;  %v5665_v8 = vcombine.low %v403_v36, %v415_v60  ;;  %v450_v36 = vld [vmem:[%s7529_s27 + $0x880] sm:$0xff] }
 0x201   : > { %4922 = vmatprep.mubr.bf16.mxu1 %v5642_v47  ;;  %v439_v55 = vld [vmem:[%s7529_s27 + $0x828] sm:$0xff]  ;;  %v462_v60 = vld [vmem:[%s7529_s27 + $0x8e0] sm:$0xff] }
 0x202   : > { %v8652_v50 = vadd.f32 %v6593_v10, %v4227_v15  ;;  %v6500_v9 = vpop.f32.mrb[132].mxu0 }
 0x203   : > { %v6594_v32 = vpop.f32.mrb[132].mxu1  ;;  %v6501_v46 = vpop.f32.mrb[133].mxu0 }
 0x204   : > { %v6502_v20 = vadd.f32 %v6501_v46, %v6500_v9  ;;  %v6595_v13 = vpop.f32.mrb[133].mxu1  ;;  %v6503_v14 = vpop.f32.mrb[134].mxu0  ;;  %v5690_v9 = vcombine.high %v427_v5, %v439_v55 }
 0x205   : > { %v6596_v49 = vadd.f32 %v6595_v13, %v6594_v32  ;;  %v6597_v1 = vpop.f32.mrb[134].mxu1  ;;  %v6504_v4 = vpop.f32.mrb[135].mxu0 }
 0x206   : > { %v4232_v25 = vadd.f32 %v6502_v20, %v8373_v56  ;;  %v6505_v53 = vadd.f32 %v6504_v4, %v6503_v14  ;;  %v6598_v44 = vpop.f32.mrb[135].mxu1 }
 0x207   : > { %v6599_v0 = vadd.f32 %v6598_v44, %v6597_v1  ;;  %4786 = vmatmul.mubr.bf16.gmra.mrb[240].mxu0 %v5639_v51  ;;  %v5687_v1 = vcombine.low %v426_v41, %v438_v30  ;;  %v5712_v44 = vcombine.high %v450_v36, %v462_v60 }
 0x208   : > { %v8657_v26 = vadd.f32 %v6596_v49, %v4232_v25  ;;  %v4235_v7 = vadd.f32 %v6505_v53, %v8378_v16  ;;  %4923 = vmatmul.mubr.bf16.gmra.mrb[240].mxu1 %v5641_v54  ;;  %4793 = vmatprep.mubr.bf16.mxu0 %v5664_v57  ;;  %v451_v54 = vld [vmem:[%s7529_s27 + $0x888] sm:$0xff]  ;;  %v5689_v53 = vcombine.low %v427_v5, %v439_v55  ;;  %v474_v5 = vld [vmem:[%s7529_s27 + $0x940] sm:$0xff] }
 0x209   : > { %4930 = vmatprep.mubr.bf16.mxu1 %v5666_v61  ;;  %v463_v57 = vld [vmem:[%s7529_s27 + $0x8e8] sm:$0xff]  ;;  %v486_v55 = vld [vmem:[%s7529_s27 + $0x9a0] sm:$0xff] }
 0x20a   : > { %v8662_v11 = vadd.f32 %v6599_v0, %v4235_v7  ;;  %v6506_v62 = vpop.f32.mrb[136].mxu0 }
 0x20b   : > { %v6600_v38 = vpop.f32.mrb[136].mxu1  ;;  %v6507_v56 = vpop.f32.mrb[137].mxu0 }
 0x20c   : > { %v6508_v27 = vadd.f32 %v6507_v56, %v6506_v62  ;;  %v6601_v47 = vpop.f32.mrb[137].mxu1  ;;  %v6509_v42 = vpop.f32.mrb[138].mxu0  ;;  %v5714_v62 = vcombine.high %v451_v54, %v463_v57 }
 0x20d   : > { %v6602_v16 = vadd.f32 %v6601_v47, %v6600_v38  ;;  %v6603_v10 = vpop.f32.mrb[138].mxu1  ;;  %v6510_v15 = vpop.f32.mrb[139].mxu0 }
 0x20e   : > { %v4240_v32 = vadd.f32 %v6508_v27, %v8383_v35  ;;  %v6511_v46 = vadd.f32 %v6510_v15, %v6509_v42  ;;  %v6604_v51 = vpop.f32.mrb[139].mxu1 }
 0x20f   : > { %v6605_v20 = vadd.f32 %v6604_v51, %v6603_v10  ;;  %4794 = vmatmul.mubr.bf16.gmra.mrb[244].mxu0 %v5663_v17  ;;  %v5711_v10 = vcombine.low %v450_v36, %v462_v60  ;;  %v5736_v51 = vcombine.high %v474_v5, %v486_v55 }
 0x210   : > { %v8667_v58 = vadd.f32 %v6602_v16, %v4240_v32  ;;  %v4243_v37 = vadd.f32 %v6511_v46, %v8388_v2  ;;  %4931 = vmatmul.mubr.bf16.gmra.mrb[244].mxu1 %v5665_v8  ;;  %4801 = vmatprep.mubr.bf16.mxu0 %v5688_v63  ;;  %v475_v8 = vld [vmem:[%s7529_s27 + $0x948] sm:$0xff]  ;;  %v5713_v46 = vcombine.low %v451_v54, %v463_v57  ;;  %v188_v54 = vld [vmem:[%s7529_s27 + $0x50] sm:$0xff] }
 0x211   : > { %4938 = vmatprep.mubr.bf16.mxu1 %v5690_v9  ;;  %v487_v63 = vld [vmem:[%s7529_s27 + $0x9a8] sm:$0xff]  ;;  %v200_v57 = vld [vmem:[%s7529_s27 + $0xb0] sm:$0xff] }
 0x212   : > { %v8672_v13 = vadd.f32 %v6605_v20, %v4243_v37  ;;  %v6512_v14 = vpop.f32.mrb[140].mxu0 }
 0x213   : > { %v6606_v49 = vpop.f32.mrb[140].mxu1  ;;  %v6513_v35 = vpop.f32.mrb[141].mxu0 }
 0x214   : > { %v6514_v4 = vadd.f32 %v6513_v35, %v6512_v14  ;;  %v6607_v61 = vpop.f32.mrb[141].mxu1  ;;  %v6515_v25 = vpop.f32.mrb[142].mxu0  ;;  %v5738_v14 = vcombine.high %v475_v8, %v487_v63 }
 0x215   : > { %v6608_v2 = vadd.f32 %v6607_v61, %v6606_v49  ;;  %v6609_v0 = vpop.f32.mrb[142].mxu1  ;;  %v6516_v7 = vpop.f32.mrb[143].mxu0 }
 0x216   : > { %v4248_v38 = vadd.f32 %v6514_v4, %v8393_v48  ;;  %v6517_v56 = vadd.f32 %v6516_v7, %v6515_v25  ;;  %v6610_v17 = vpop.f32.mrb[143].mxu1 }
 0x217   : > { %v6611_v27 = vadd.f32 %v6610_v17, %v6609_v0  ;;  %4802 = vmatmul.mubr.bf16.gmra.mrb[248].mxu0 %v5687_v1  ;;  %v5735_v0 = vcombine.low %v474_v5, %v486_v55  ;;  %v5452_v17 = vcombine.high %v188_v54, %v200_v57 }
 0x218   : > { %v8677_v41 = vadd.f32 %v6608_v2, %v4248_v38  ;;  %v4251_v30 = vadd.f32 %v6517_v56, %v8398_v40  ;;  %4939 = vmatmul.mubr.bf16.gmra.mrb[248].mxu1 %v5689_v53  ;;  %4809 = vmatprep.mubr.bf16.mxu0 %v5712_v44  ;;  %v189_v53 = vld [vmem:[%s7529_s27 + $0x58] sm:$0xff]  ;;  %v5737_v56 = vcombine.low %v475_v8, %v487_v63  ;;  %v212_v8 = vld [vmem:[%s7529_s27 + $0x110] sm:$0xff] }
 0x219   : > { %4946 = vmatprep.mubr.bf16.mxu1 %v5714_v62  ;;  %v201_v44 = vld [vmem:[%s7529_s27 + $0xb8] sm:$0xff]  ;;  %v224_v63 = vld [vmem:[%s7529_s27 + $0x170] sm:$0xff] }
 0x21a   : > { %v8682_v47 = vadd.f32 %v6611_v27, %v4251_v30  ;;  %v6518_v42 = vpop.f32.mrb[144].mxu0 }
 0x21b   : > { %v6612_v16 = vpop.f32.mrb[144].mxu1  ;;  %v6519_v48 = vpop.f32.mrb[145].mxu0 }
 0x21c   : > { %v6520_v15 = vadd.f32 %v6519_v48, %v6518_v42  ;;  %v6613_v9 = vpop.f32.mrb[145].mxu1  ;;  %v6521_v32 = vpop.f32.mrb[146].mxu0  ;;  %v5454_v42 = vcombine.high %v189_v53, %v201_v44 }
 0x21d   : > { %v6614_v40 = vadd.f32 %v6613_v9, %v6612_v16  ;;  %v6615_v20 = vpop.f32.mrb[146].mxu1  ;;  %v6522_v37 = vpop.f32.mrb[147].mxu0 }
 0x21e   : > { %v4256_v49 = vadd.f32 %v6520_v15, %v8403_v6  ;;  %v6523_v35 = vadd.f32 %v6522_v37, %v6521_v32  ;;  %v6616_v1 = vpop.f32.mrb[147].mxu1 }
 0x21f   : > { %v6617_v4 = vadd.f32 %v6616_v1, %v6615_v20  ;;  %4810 = vmatmul.mubr.bf16.gmra.mrb[252].mxu0 %v5711_v10  ;;  %v5451_v20 = vcombine.low %v188_v54, %v200_v57  ;;  %v5476_v1 = vcombine.high %v212_v8, %v224_v63 }
 0x220   : > { %v8687_v36 = vadd.f32 %v6614_v40, %v4256_v49  ;;  %v4259_v60 = vadd.f32 %v6523_v35, %v8408_v43  ;;  %4947 = vmatmul.mubr.bf16.gmra.mrb[252].mxu1 %v5713_v46  ;;  %4817 = vmatprep.mubr.bf16.mxu0 %v5736_v51  ;;  %v213_v46 = vld [vmem:[%s7529_s27 + $0x118] sm:$0xff]  ;;  %v5453_v35 = vcombine.low %v189_v53, %v201_v44  ;;  %v236_v53 = vld [vmem:[%s7529_s27 + $0x1d0] sm:$0xff] }
 0x221   : > { %4954 = vmatprep.mubr.bf16.mxu1 %v5738_v14  ;;  %v225_v51 = vld [vmem:[%s7529_s27 + $0x178] sm:$0xff]  ;;  %v248_v44 = vld [vmem:[%s7529_s27 + $0x230] sm:$0xff] }
 0x222   : > { %v8692_v61 = vadd.f32 %v6617_v4, %v4259_v60  ;;  %v6524_v25 = vpop.f32.mrb[148].mxu0 }
 0x223   : > { %v6618_v2 = vpop.f32.mrb[148].mxu1  ;;  %v6525_v6 = vpop.f32.mrb[149].mxu0 }
 0x224   : > { %v6526_v7 = vadd.f32 %v6525_v6, %v6524_v25  ;;  %v6619_v62 = vpop.f32.mrb[149].mxu1  ;;  %v6527_v38 = vpop.f32.mrb[150].mxu0  ;;  %v5478_v25 = vcombine.high %v213_v46, %v225_v51 }
 0x225   : > { %v6620_v43 = vadd.f32 %v6619_v62, %v6618_v2  ;;  %v6621_v27 = vpop.f32.mrb[150].mxu1  ;;  %v6528_v30 = vpop.f32.mrb[151].mxu0 }
 0x226   : > { %v4264_v16 = vadd.f32 %v6526_v7, %v8413_v12  ;;  %v6529_v48 = vadd.f32 %v6528_v30, %v6527_v38  ;;  %v6622_v10 = vpop.f32.mrb[151].mxu1 }
 0x227   : > { %v6623_v15 = vadd.f32 %v6622_v10, %v6621_v27  ;;  %4818 = vmatmul.mubr.bf16.gmra.mrb[0].mxu0 %v5735_v0  ;;  %v5475_v27 = vcombine.low %v212_v8, %v224_v63  ;;  %v5500_v10 = vcombine.high %v236_v53, %v248_v44 }
 0x228   : > { %v8697_v5 = vadd.f32 %v6620_v43, %v4264_v16  ;;  %v4267_v55 = vadd.f32 %v6529_v48, %v8416_v29  ;;  %4955 = vmatmul.mubr.bf16.gmra.mrb[0].mxu1 %v5737_v56  ;;  %4995 = vmatprep.mubr.bf16.mxu0 %v5452_v17  ;;  %v237_v56 = vld [vmem:[%s7529_s27 + $0x1d8] sm:$0xff]  ;;  %v5477_v48 = vcombine.low %v213_v46, %v225_v51  ;;  %v260_v46 = vld [vmem:[%s7529_s27 + $0x290] sm:$0xff] }
 0x229   : > { %5132 = vmatprep.mubr.bf16.mxu1 %v5454_v42  ;;  %v249_v17 = vld [vmem:[%s7529_s27 + $0x238] sm:$0xff]  ;;  %v272_v51 = vld [vmem:[%s7529_s27 + $0x2f0] sm:$0xff] }
 0x22a   : > { %v8702_v9 = vadd.f32 %v6623_v15, %v4267_v55  ;;  %v6530_v32 = vpop.f32.mrb[152].mxu0 }
 0x22b   : > { %v6624_v40 = vpop.f32.mrb[152].mxu1  ;;  %v6531_v12 = vpop.f32.mrb[153].mxu0 }
 0x22c   : > { %v6532_v37 = vadd.f32 %v6531_v12, %v6530_v32  ;;  %v6625_v14 = vpop.f32.mrb[153].mxu1  ;;  %v6533_v49 = vpop.f32.mrb[154].mxu0  ;;  %v5502_v32 = vcombine.high %v237_v56, %v249_v17 }
 0x22d   : > { %v6626_v29 = vadd.f32 %v6625_v14, %v6624_v40  ;;  %v6627_v4 = vpop.f32.mrb[154].mxu1  ;;  %v6534_v60 = vpop.f32.mrb[155].mxu0 }
 0x22e   : > { %v4272_v2 = vadd.f32 %v6532_v37, %v8447_v18  ;;  %v6535_v6 = vadd.f32 %v6534_v60, %v6533_v49  ;;  %v6628_v0 = vpop.f32.mrb[155].mxu1 }
 0x22f   : > { %v6629_v7 = vadd.f32 %v6628_v0, %v6627_v4  ;;  %4996 = vmatmul.mubr.bf16.vlgmr.msra.gmra.mrb[4].mxu0 %v5451_v20  ;;  %v5499_v4 = vcombine.low %v236_v53, %v248_v44  ;;  %v5524_v0 = vcombine.high %v260_v46, %v272_v51 }
 0x230   : > { %v8707_v54 = vadd.f32 %v6626_v29, %v4272_v2  ;;  %v4275_v57 = vadd.f32 %v6535_v6, %v8465_v31  ;;  %5133 = vmatmul.mubr.bf16.vlgmr.msra.gmra.mrb[4].mxu1 %v5453_v35  ;;  %5003 = vmatprep.mubr.bf16.mxu0 %v5476_v1  ;;  %v261_v35 = vld [vmem:[%s7529_s27 + $0x298] sm:$0xff]  ;;  %v5501_v6 = vcombine.low %v237_v56, %v249_v17  ;;  %v284_v56 = vld [vmem:[%s7529_s27 + $0x350] sm:$0xff] }
 0x231   : > { %5140 = vmatprep.mubr.bf16.mxu1 %v5478_v25  ;;  %v273_v1 = vld [vmem:[%s7529_s27 + $0x2f8] sm:$0xff]  ;;  %v296_v17 = vld [vmem:[%s7529_s27 + $0x3b0] sm:$0xff] }
 0x232   : > { %v8712_v62 = vadd.f32 %v6629_v7, %v4275_v57  ;;  %v6646_v38 = vpop.f32.mrb[156].mxu0 }
 0x233   : > { %v6740_v43 = vpop.f32.mrb[156].mxu1  ;;  %v6647_v18 = vpop.f32.mrb[157].mxu0 }
 0x234   : > { %v6648_v30 = vadd.f32 %v6647_v18, %v6646_v38  ;;  %v6741_v42 = vpop.f32.mrb[157].mxu1  ;;  %v6649_v16 = vpop.f32.mrb[158].mxu0  ;;  %v5526_v38 = vcombine.high %v261_v35, %v273_v1 }
 0x235   : > { %v6742_v31 = vadd.f32 %v6741_v42, %v6740_v43  ;;  %v6743_v15 = vpop.f32.mrb[158].mxu1  ;;  %v6650_v55 = vpop.f32.mrb[159].mxu0 }
 0x236   : > { %v4450_v40 = vadd.f32 %v6648_v30, %v8497_v24  ;;  %v6651_v12 = vadd.f32 %v6650_v55, %v6649_v16  ;;  %v6744_v20 = vpop.f32.mrb[159].mxu1 }
 0x237   : > { %v6745_v37 = vadd.f32 %v6744_v20, %v6743_v15  ;;  %5004 = vmatmul.mubr.bf16.gmra.mrb[8].mxu0 %v5475_v27  ;;  %v5523_v15 = vcombine.low %v260_v46, %v272_v51  ;;  %v5548_v20 = vcombine.high %v284_v56, %v296_v17 }
 0x238   : > { %v8717_v8 = vadd.f32 %v6742_v31, %v4450_v40  ;;  %v4453_v63 = vadd.f32 %v6651_v12, %v8512_v21  ;;  %5141 = vmatmul.mubr.bf16.gmra.mrb[8].mxu1 %v5477_v48  ;;  %5011 = vmatprep.mubr.bf16.mxu0 %v5500_v10  ;;  %v285_v48 = vld [vmem:[%s7529_s27 + $0x358] sm:$0xff]  ;;  %v5525_v12 = vcombine.low %v261_v35, %v273_v1  ;;  %v308_v35 = vld [vmem:[%s7529_s27 + $0x410] sm:$0xff] }
 0x239   : > { %5148 = vmatprep.mubr.bf16.mxu1 %v5502_v32  ;;  %v297_v10 = vld [vmem:[%s7529_s27 + $0x3b8] sm:$0xff]  ;;  %v320_v1 = vld [vmem:[%s7529_s27 + $0x470] sm:$0xff] }
 0x23a   : > { %v8722_v14 = vadd.f32 %v6745_v37, %v4453_v63  ;;  %v6652_v49 = vpop.f32.mrb[160].mxu0 }
 0x23b   : > { %v6746_v29 = vpop.f32.mrb[160].mxu1  ;;  %v6653_v24 = vpop.f32.mrb[161].mxu0 }
 0x23c   : > { %v6654_v60 = vadd.f32 %v6653_v24, %v6652_v49  ;;  %v6747_v25 = vpop.f32.mrb[161].mxu1  ;;  %v6655_v2 = vpop.f32.mrb[162].mxu0  ;;  %v5550_v49 = vcombine.high %v285_v48, %v297_v10 }
 0x23d   : > { %v6748_v21 = vadd.f32 %v6747_v25, %v6746_v29  ;;  %v6749_v7 = vpop.f32.mrb[162].mxu1  ;;  %v6656_v57 = vpop.f32.mrb[163].mxu0 }
 0x23e   : > { %v4458_v43 = vadd.f32 %v6654_v60, %v8547_v19  ;;  %v6657_v18 = vadd.f32 %v6656_v57, %v6655_v2  ;;  %v6750_v27 = vpop.f32.mrb[163].mxu1 }
 0x23f   : > { %v6751_v30 = vadd.f32 %v6750_v27, %v6749_v7  ;;  %5012 = vmatmul.mubr.bf16.gmra.mrb[12].mxu0 %v5499_v4  ;;  %v5547_v7 = vcombine.low %v284_v56, %v296_v17  ;;  %v5572_v27 = vcombine.high %v308_v35, %v320_v1 }
 0x240   : > { %v8727_v53 = vadd.f32 %v6748_v21, %v4458_v43  ;;  %v4461_v44 = vadd.f32 %v6657_v18, %v8562_v23  ;;  %5149 = vmatmul.mubr.bf16.gmra.mrb[12].mxu1 %v5501_v6  ;;  %5019 = vmatprep.mubr.bf16.mxu0 %v5524_v0  ;;  %v309_v6 = vld [vmem:[%s7529_s27 + $0x418] sm:$0xff]  ;;  %v5549_v18 = vcombine.low %v285_v48, %v297_v10  ;;  %v332_v48 = vld [vmem:[%s7529_s27 + $0x4d0] sm:$0xff] }
 0x241   : > { %5156 = vmatprep.mubr.bf16.mxu1 %v5526_v38  ;;  %v321_v0 = vld [vmem:[%s7529_s27 + $0x478] sm:$0xff]  ;;  %v344_v10 = vld [vmem:[%s7529_s27 + $0x530] sm:$0xff] }
 0x242   : > { %v8732_v42 = vadd.f32 %v6751_v30, %v4461_v44  ;;  %v6658_v16 = vpop.f32.mrb[164].mxu0 }
 0x243   : > { %v6752_v31 = vpop.f32.mrb[164].mxu1  ;;  %v6659_v19 = vpop.f32.mrb[165].mxu0 }
 0x244   : > { %v6660_v55 = vadd.f32 %v6659_v19, %v6658_v16  ;;  %v6753_v32 = vpop.f32.mrb[165].mxu1  ;;  %v6661_v40 = vpop.f32.mrb[166].mxu0  ;;  %v5574_v16 = vcombine.high %v309_v6, %v321_v0 }
 0x245   : > { %v6754_v23 = vadd.f32 %v6753_v32, %v6752_v31  ;;  %v6755_v37 = vpop.f32.mrb[166].mxu1  ;;  %v6662_v63 = vpop.f32.mrb[167].mxu0 }
 0x246   : > { %v4466_v29 = vadd.f32 %v6660_v55, %v8597_v52  ;;  %v6663_v24 = vadd.f32 %v6662_v63, %v6661_v40  ;;  %v6756_v4 = vpop.f32.mrb[167].mxu1 }
 0x247   : > { %v6757_v60 = vadd.f32 %v6756_v4, %v6755_v37  ;;  %5020 = vmatmul.mubr.bf16.gmra.mrb[16].mxu0 %v5523_v15  ;;  %v5571_v37 = vcombine.low %v308_v35, %v320_v1  ;;  %v5596_v4 = vcombine.high %v332_v48, %v344_v10 }
 0x248   : > { %v8737_v46 = vadd.f32 %v6754_v23, %v4466_v29  ;;  %v4469_v51 = vadd.f32 %v6663_v24, %v8605_v59  ;;  %5157 = vmatmul.mubr.bf16.gmra.mrb[16].mxu1 %v5525_v12  ;;  %5027 = vmatprep.mubr.bf16.mxu0 %v5548_v20  ;;  %v333_v12 = vld [vmem:[%s7529_s27 + $0x4d8] sm:$0xff]  ;;  %v5573_v24 = vcombine.low %v309_v6, %v321_v0  ;;  %v356_v6 = vld [vmem:[%s7529_s27 + $0x590] sm:$0xff] }
 0x249   : > { %5164 = vmatprep.mubr.bf16.mxu1 %v5550_v49  ;;  %v345_v20 = vld [vmem:[%s7529_s27 + $0x538] sm:$0xff]  ;;  %v368_v0 = vld [vmem:[%s7529_s27 + $0x5f0] sm:$0xff] }
 0x24a   : > { %v8742_v25 = vadd.f32 %v6757_v60, %v4469_v51  ;;  %v6664_v2 = vpop.f32.mrb[168].mxu0 }
 0x24b   : > { %v6758_v21 = vpop.f32.mrb[168].mxu1  ;;  %v6665_v52 = vpop.f32.mrb[169].mxu0 }
 0x24c   : > { %v6666_v57 = vadd.f32 %v6665_v52, %v6664_v2  ;;  %v6759_v38 = vpop.f32.mrb[169].mxu1  ;;  %v6667_v43 = vpop.f32.mrb[170].mxu0  ;;  %v5598_v2 = vcombine.high %v333_v12, %v345_v20 }
 0x24d   : > { %v6760_v59 = vadd.f32 %v6759_v38, %v6758_v21  ;;  %v6761_v30 = vpop.f32.mrb[170].mxu1  ;;  %v6668_v44 = vpop.f32.mrb[171].mxu0 }
 0x24e   : > { %v4474_v31 = vadd.f32 %v6666_v57, %v8617_v45  ;;  %v6669_v19 = vadd.f32 %v6668_v44, %v6667_v43  ;;  %v6762_v15 = vpop.f32.mrb[171].mxu1 }
 0x24f   : > { %v6763_v55 = vadd.f32 %v6762_v15, %v6761_v30  ;;  %5028 = vmatmul.mubr.bf16.gmra.mrb[20].mxu0 %v5547_v7  ;;  %v5595_v30 = vcombine.low %v332_v48, %v344_v10  ;;  %v5620_v15 = vcombine.high %v356_v6, %v368_v0 }
 0x250   : > { %v8747_v56 = vadd.f32 %v6760_v59, %v4474_v31  ;;  %v4477_v17 = vadd.f32 %v6669_v19, %v8622_v34  ;;  %5165 = vmatmul.mubr.bf16.gmra.mrb[20].mxu1 %v5549_v18  ;;  %5035 = vmatprep.mubr.bf16.mxu0 %v5572_v27  ;;  %v357_v18 = vld [vmem:[%s7529_s27 + $0x598] sm:$0xff]  ;;  %v5597_v19 = vcombine.low %v333_v12, %v345_v20  ;;  %v380_v12 = vld [vmem:[%s7529_s27 + $0x650] sm:$0xff] }
 0x251   : > { %5172 = vmatprep.mubr.bf16.mxu1 %v5574_v16  ;;  %v369_v27 = vld [vmem:[%s7529_s27 + $0x5f8] sm:$0xff]  ;;  %v392_v20 = vld [vmem:[%s7529_s27 + $0x6b0] sm:$0xff] }
 0x252   : > { %v8752_v32 = vadd.f32 %v6763_v55, %v4477_v17  ;;  %v6670_v40 = vpop.f32.mrb[172].mxu0 }
 0x253   : > { %v6764_v23 = vpop.f32.mrb[172].mxu1  ;;  %v6671_v45 = vpop.f32.mrb[173].mxu0 }
 0x254   : > { %v6672_v63 = vadd.f32 %v6671_v45, %v6670_v40  ;;  %v6765_v49 = vpop.f32.mrb[173].mxu1  ;;  %v6673_v29 = vpop.f32.mrb[174].mxu0  ;;  %v5622_v40 = vcombine.high %v357_v18, %v369_v27 }
 0x255   : > { %v6766_v34 = vadd.f32 %v6765_v49, %v6764_v23  ;;  %v6767_v60 = vpop.f32.mrb[174].mxu1  ;;  %v6674_v51 = vpop.f32.mrb[175].mxu0 }
 0x256   : > { %v4482_v21 = vadd.f32 %v6672_v63, %v8627_v39  ;;  %v6675_v52 = vadd.f32 %v6674_v51, %v6673_v29  ;;  %v6768_v7 = vpop.f32.mrb[175].mxu1 }
 0x257   : > { %v6769_v57 = vadd.f32 %v6768_v7, %v6767_v60  ;;  %5036 = vmatmul.mubr.bf16.gmra.mrb[24].mxu0 %v5571_v37  ;;  %v5619_v60 = vcombine.low %v356_v6, %v368_v0  ;;  %v5644_v7 = vcombine.high %v380_v12, %v392_v20 }
 0x258   : > { %v8757_v35 = vadd.f32 %v6766_v34, %v4482_v21  ;;  %v4485_v1 = vadd.f32 %v6675_v52, %v8632_v3  ;;  %5173 = vmatmul.mubr.bf16.gmra.mrb[24].mxu1 %v5573_v24  ;;  %5043 = vmatprep.mubr.bf16.mxu0 %v5596_v4  ;;  %v381_v24 = vld [vmem:[%s7529_s27 + $0x658] sm:$0xff]  ;;  %v5621_v52 = vcombine.low %v357_v18, %v369_v27  ;;  %v404_v18 = vld [vmem:[%s7529_s27 + $0x710] sm:$0xff] }
 0x259   : > { %5180 = vmatprep.mubr.bf16.mxu1 %v5598_v2  ;;  %v393_v4 = vld [vmem:[%s7529_s27 + $0x6b8] sm:$0xff]  ;;  %v416_v27 = vld [vmem:[%s7529_s27 + $0x770] sm:$0xff] }
 0x25a   : > { %v8762_v38 = vadd.f32 %v6769_v57, %v4485_v1  ;;  %v6676_v43 = vpop.f32.mrb[176].mxu0 }
 0x25b   : > { %v6770_v59 = vpop.f32.mrb[176].mxu1  ;;  %v6677_v39 = vpop.f32.mrb[177].mxu0 }
 0x25c   : > { %v6678_v44 = vadd.f32 %v6677_v39, %v6676_v43  ;;  %v6771_v16 = vpop.f32.mrb[177].mxu1  ;;  %v6679_v31 = vpop.f32.mrb[178].mxu0  ;;  %v5646_v43 = vcombine.high %v381_v24, %v393_v4 }
 0x25d   : > { %v6772_v3 = vadd.f32 %v6771_v16, %v6770_v59  ;;  %v6773_v55 = vpop.f32.mrb[178].mxu1  ;;  %v6680_v17 = vpop.f32.mrb[179].mxu0 }
 0x25e   : > { %v4490_v23 = vadd.f32 %v6678_v44, %v8637_v33  ;;  %v6681_v45 = vadd.f32 %v6680_v17, %v6679_v31  ;;  %v6774_v37 = vpop.f32.mrb[179].mxu1 }
 0x25f   : > { %v6775_v63 = vadd.f32 %v6774_v37, %v6773_v55  ;;  %5044 = vmatmul.mubr.bf16.gmra.mrb[28].mxu0 %v5595_v30  ;;  %v5643_v55 = vcombine.low %v380_v12, %v392_v20  ;;  %v5668_v37 = vcombine.high %v404_v18, %v416_v27 }
 0x260   : > { %v8767_v48 = vadd.f32 %v6772_v3, %v4490_v23  ;;  %v4493_v10 = vadd.f32 %v6681_v45, %v8642_v22  ;;  %5181 = vmatmul.mubr.bf16.gmra.mrb[28].mxu1 %v5597_v19  ;;  %5051 = vmatprep.mubr.bf16.mxu0 %v5620_v15  ;;  %v405_v19 = vld [vmem:[%s7529_s27 + $0x718] sm:$0xff]  ;;  %v5645_v45 = vcombine.low %v381_v24, %v393_v4  ;;  %v428_v24 = vld [vmem:[%s7529_s27 + $0x7d0] sm:$0xff] }
 0x261   : > { %5188 = vmatprep.mubr.bf16.mxu1 %v5622_v40  ;;  %v417_v15 = vld [vmem:[%s7529_s27 + $0x778] sm:$0xff]  ;;  %v440_v4 = vld [vmem:[%s7529_s27 + $0x830] sm:$0xff] }
 0x262   : > { %v8772_v49 = vadd.f32 %v6775_v63, %v4493_v10  ;;  %v6682_v29 = vpop.f32.mrb[180].mxu0 }
 0x263   : > { %v6776_v34 = vpop.f32.mrb[180].mxu1  ;;  %v6683_v33 = vpop.f32.mrb[181].mxu0 }
 0x264   : > { %v6684_v51 = vadd.f32 %v6683_v33, %v6682_v29  ;;  %v6777_v2 = vpop.f32.mrb[181].mxu1  ;;  %v6685_v21 = vpop.f32.mrb[182].mxu0  ;;  %v5670_v29 = vcombine.high %v405_v19, %v417_v15 }
 0x265   : > { %v6778_v22 = vadd.f32 %v6777_v2, %v6776_v34  ;;  %v6779_v57 = vpop.f32.mrb[182].mxu1  ;;  %v6686_v1 = vpop.f32.mrb[183].mxu0 }
 0x266   : > { %v4498_v59 = vadd.f32 %v6684_v51, %v8647_v28  ;;  %v6687_v39 = vadd.f32 %v6686_v1, %v6685_v21  ;;  %v6780_v30 = vpop.f32.mrb[183].mxu1 }
 0x267   : > { %v6781_v44 = vadd.f32 %v6780_v30, %v6779_v57  ;;  %5052 = vmatmul.mubr.bf16.gmra.mrb[32].mxu0 %v5619_v60  ;;  %v5667_v57 = vcombine.low %v404_v18, %v416_v27  ;;  %v5692_v30 = vcombine.high %v428_v24, %v440_v4 }
 0x268   : > { %v8777_v6 = vadd.f32 %v6778_v22, %v4498_v59  ;;  %v4501_v0 = vadd.f32 %v6687_v39, %v8652_v50  ;;  %5189 = vmatmul.mubr.bf16.gmra.mrb[32].mxu1 %v5621_v52  ;;  %5059 = vmatprep.mubr.bf16.mxu0 %v5644_v7  ;;  %v429_v52 = vld [vmem:[%s7529_s27 + $0x7d8] sm:$0xff]  ;;  %v5669_v39 = vcombine.low %v405_v19, %v417_v15  ;;  %v452_v19 = vld [vmem:[%s7529_s27 + $0x890] sm:$0xff] }
 0x269   : > { %5196 = vmatprep.mubr.bf16.mxu1 %v5646_v43  ;;  %v441_v7 = vld [vmem:[%s7529_s27 + $0x838] sm:$0xff]  ;;  %v464_v15 = vld [vmem:[%s7529_s27 + $0x8f0] sm:$0xff] }
 0x26a   : > { %v8782_v16 = vadd.f32 %v6781_v44, %v4501_v0  ;;  %v6688_v31 = vpop.f32.mrb[184].mxu0 }
 0x26b   : > { %v6782_v3 = vpop.f32.mrb[184].mxu1  ;;  %v6689_v28 = vpop.f32.mrb[185].mxu0 }
 0x26c   : > { %v6690_v17 = vadd.f32 %v6689_v28, %v6688_v31  ;;  %v6783_v40 = vpop.f32.mrb[185].mxu1  ;;  %v6691_v23 = vpop.f32.mrb[186].mxu0  ;;  %v5694_v31 = vcombine.high %v429_v52, %v441_v7 }
 0x26d   : > { %v6784_v50 = vadd.f32 %v6783_v40, %v6782_v3  ;;  %v6785_v63 = vpop.f32.mrb[186].mxu1  ;;  %v6692_v10 = vpop.f32.mrb[187].mxu0 }
 0x26e   : > { %v4506_v34 = vadd.f32 %v6690_v17, %v8657_v26  ;;  %v6693_v33 = vadd.f32 %v6692_v10, %v6691_v23  ;;  %v6786_v60 = vpop.f32.mrb[187].mxu1 }
 0x26f   : > { %v6787_v51 = vadd.f32 %v6786_v60, %v6785_v63  ;;  %5060 = vmatmul.mubr.bf16.gmra.mrb[36].mxu0 %v5643_v55  ;;  %v5691_v63 = vcombine.low %v428_v24, %v440_v4  ;;  %v5716_v60 = vcombine.high %v452_v19, %v464_v15 }
 0x270   : > { %v8787_v12 = vadd.f32 %v6784_v50, %v4506_v34  ;;  %v4509_v20 = vadd.f32 %v6693_v33, %v8662_v11  ;;  %5197 = vmatmul.mubr.bf16.gmra.mrb[36].mxu1 %v5645_v45  ;;  %5067 = vmatprep.mubr.bf16.mxu0 %v5668_v37  ;;  %v453_v45 = vld [vmem:[%s7529_s27 + $0x898] sm:$0xff]  ;;  %v5693_v33 = vcombine.low %v429_v52, %v441_v7  ;;  %v476_v52 = vld [vmem:[%s7529_s27 + $0x950] sm:$0xff] }
 0x271   : > { %5204 = vmatprep.mubr.bf16.mxu1 %v5670_v29  ;;  %v465_v37 = vld [vmem:[%s7529_s27 + $0x8f8] sm:$0xff]  ;;  %v488_v7 = vld [vmem:[%s7529_s27 + $0x9b0] sm:$0xff] }
 0x272   : > { %v8792_v2 = vadd.f32 %v6787_v51, %v4509_v20  ;;  %v6694_v21 = vpop.f32.mrb[188].mxu0 }
 0x273   : > { %v6788_v22 = vpop.f32.mrb[188].mxu1  ;;  %v6695_v26 = vpop.f32.mrb[189].mxu0 }
 0x274   : > { %v6696_v1 = vadd.f32 %v6695_v26, %v6694_v21  ;;  %v6789_v43 = vpop.f32.mrb[189].mxu1  ;;  %v6697_v59 = vpop.f32.mrb[190].mxu0  ;;  %v5718_v21 = vcombine.high %v453_v45, %v465_v37 }
 0x275   : > { %v6790_v11 = vadd.f32 %v6789_v43, %v6788_v22  ;;  %v6791_v44 = vpop.f32.mrb[190].mxu1  ;;  %v6698_v0 = vpop.f32.mrb[191].mxu0 }
 0x276   : > { %v4514_v3 = vadd.f32 %v6696_v1, %v8667_v58  ;;  %v6699_v28 = vadd.f32 %v6698_v0, %v6697_v59  ;;  %v6792_v55 = vpop.f32.mrb[191].mxu1 }
 0x277   : > { %v6793_v17 = vadd.f32 %v6792_v55, %v6791_v44  ;;  %5068 = vmatmul.mubr.bf16.gmra.mrb[40].mxu0 %v5667_v57  ;;  %v5715_v44 = vcombine.low %v452_v19, %v464_v15  ;;  %v5740_v55 = vcombine.high %v476_v52, %v488_v7 }
 0x278   : > { %v8797_v18 = vadd.f32 %v6790_v11, %v4514_v3  ;;  %v4517_v27 = vadd.f32 %v6699_v28, %v8672_v13  ;;  %5205 = vmatmul.mubr.bf16.gmra.mrb[40].mxu1 %v5669_v39  ;;  %5075 = vmatprep.mubr.bf16.mxu0 %v5692_v30  ;;  %v477_v39 = vld [vmem:[%s7529_s27 + $0x958] sm:$0xff]  ;;  %v5717_v28 = vcombine.low %v453_v45, %v465_v37 }
 0x279   : > { %5212 = vmatprep.mubr.bf16.mxu1 %v5694_v31  ;;  %v489_v30 = vld [vmem:[%s7529_s27 + $0x9b8] sm:$0xff]  ;;  %s5429_s27 = sshll.u32 %s8965_s17, 2 }
 0x27a   : > { %v8802_v40 = vadd.f32 %v6793_v17, %v4517_v27  ;;  %v6700_v23 = vpop.f32.mrb[192].mxu0  ;;  %s8918_s20 = scalar_lea.vmem %s8963_s3, %s5429_s27 }
 0x27b   : > { %v6794_v50 = vpop.f32.mrb[192].mxu1  ;;  %v6701_v58 = vpop.f32.mrb[193].mxu0 }
 0x27c   : > { %v6702_v10 = vadd.f32 %v6701_v58, %v6700_v23  ;;  %v6795_v29 = vpop.f32.mrb[193].mxu1  ;;  %v6703_v34 = vpop.f32.mrb[194].mxu0  ;;  %v5742_v23 = vcombine.high %v477_v39, %v489_v30 }
 0x27d   : > { %v6796_v13 = vadd.f32 %v6795_v29, %v6794_v50  ;;  %v6797_v51 = vpop.f32.mrb[194].mxu1  ;;  %v6704_v20 = vpop.f32.mrb[195].mxu0 }
 0x27e   : > { %v4522_v22 = vadd.f32 %v6702_v10, %v8677_v41  ;;  %v6705_v26 = vadd.f32 %v6704_v20, %v6703_v34  ;;  %v6798_v57 = vpop.f32.mrb[195].mxu1 }
 0x27f   : > { %v6799_v1 = vadd.f32 %v6798_v57, %v6797_v51  ;;  %5076 = vmatmul.mubr.bf16.gmra.mrb[44].mxu0 %v5691_v63  ;;  %v5741_v51 = vcombine.low %v477_v39, %v489_v30 }
 0x280   : > { %v8807_v24 = vadd.f32 %v6796_v13, %v4522_v22  ;;  %v4525_v4 = vadd.f32 %v6705_v26, %v8682_v47  ;;  %5213 = vmatmul.mubr.bf16.gmra.mrb[44].mxu1 %v5693_v33  ;;  %5083 = vmatprep.mubr.bf16.mxu0 %v5716_v60  ;;  %v5739_v33 = vcombine.low %v476_v52, %v488_v7 }
 0x281   : > { %5220 = vmatprep.mubr.bf16.mxu1 %v5718_v21 }
 0x282   : > { %v8812_v43 = vadd.f32 %v6799_v1, %v4525_v4  ;;  %v6706_v59 = vpop.f32.mrb[196].mxu0 }
 0x283   : > { %v6800_v11 = vpop.f32.mrb[196].mxu1  ;;  %v6707_v41 = vpop.f32.mrb[197].mxu0 }
 0x284   : > { %v6708_v0 = vadd.f32 %v6707_v41, %v6706_v59  ;;  %v6801_v31 = vpop.f32.mrb[197].mxu1  ;;  %v6709_v3 = vpop.f32.mrb[198].mxu0 }
 0x285   : > { %v6802_v17 = vadd.f32 %v6801_v31, %v6800_v11  ;;  %v6803_v47 = vpop.f32.mrb[198].mxu1  ;;  %v6710_v27 = vpop.f32.mrb[199].mxu0 }
 0x286   : > { %v4530_v50 = vadd.f32 %v6708_v0, %v8687_v36  ;;  %v6711_v58 = vadd.f32 %v6710_v27, %v6709_v3  ;;  %v6804_v63 = vpop.f32.mrb[199].mxu1 }
 0x287   : > { %v6805_v10 = vadd.f32 %v6804_v63, %v6803_v47  ;;  %5084 = vmatmul.mubr.bf16.gmra.mrb[48].mxu0 %v5715_v44 }
 0x288   : > { %v8817_v29 = vadd.f32 %v6802_v17, %v4530_v50  ;;  %v4533_v34 = vadd.f32 %v6711_v58, %v8692_v61  ;;  %5221 = vmatmul.mubr.bf16.gmra.mrb[48].mxu1 %v5717_v28  ;;  %5091 = vmatprep.mubr.bf16.mxu0 %v5740_v55 }
 0x289   : > { %5228 = vmatprep.mubr.bf16.mxu1 %v5742_v23 }
 0x28a   : > { %v8820_v19 = vadd.f32 %v6805_v10, %v4533_v34  ;;  %v6712_v15 = vpop.f32.mrb[200].mxu0 }
 0x28b   : > { %v6806_v45 = vpop.f32.mrb[200].mxu1  ;;  %v6713_v37 = vpop.f32.mrb[201].mxu0 }
 0x28c   : > { %v6714_v60 = vadd.f32 %v6713_v37, %v6712_v15  ;;  %v6807_v13 = vpop.f32.mrb[201].mxu1  ;;  %v6715_v36 = vpop.f32.mrb[202].mxu0 }
 0x28d   : > { %v6808_v20 = vadd.f32 %v6807_v13, %v6806_v45  ;;  %v6809_v21 = vpop.f32.mrb[202].mxu1  ;;  %v6716_v22 = vpop.f32.mrb[203].mxu0 }
 0x28e   : > { %v4538_v26 = vadd.f32 %v6714_v60, %v8697_v5  ;;  %v6717_v57 = vadd.f32 %v6716_v22, %v6715_v36  ;;  %v6810_v61 = vpop.f32.mrb[203].mxu1 }
 0x28f   : > { %v6811_v1 = vadd.f32 %v6810_v61, %v6809_v21  ;;  %5092 = vmatmul.mubr.bf16.gmra.mrb[52].mxu0 %v5739_v33 }
 0x290   : > { %v8823_v4 = vadd.f32 %v6808_v20, %v4538_v26  ;;  %v4541_v59 = vadd.f32 %v6717_v57, %v8702_v9  ;;  %5229 = vmatmul.mubr.bf16.gmra.mrb[52].mxu1 %v5741_v51 }
 0x292   : > { %v8826_v11 = vadd.f32 %v6811_v1, %v4541_v59  ;;  %v6718_v52 = vpop.f32.mrb[204].mxu0 }
 0x293   : > { %v6812_v7 = vpop.f32.mrb[204].mxu1  ;;  %v6719_v41 = vpop.f32.mrb[205].mxu0 }
 0x294   : > { %v6720_v39 = vadd.f32 %v6719_v41, %v6718_v52  ;;  %v6813_v30 = vpop.f32.mrb[205].mxu1  ;;  %v6721_v44 = vpop.f32.mrb[206].mxu0 }
 0x295   : > { %v6814_v0 = vadd.f32 %v6813_v30, %v6812_v7  ;;  %v6815_v31 = vpop.f32.mrb[206].mxu1  ;;  %v6722_v5 = vpop.f32.mrb[207].mxu0 }
 0x296   : > { %v4546_v3 = vadd.f32 %v6720_v39, %v8707_v54  ;;  %v6723_v28 = vadd.f32 %v6722_v5, %v6721_v44  ;;  %v6816_v55 = vpop.f32.mrb[207].mxu1 }
 0x297   : > { %v6817_v17 = vadd.f32 %v6816_v55, %v6815_v31 }
 0x298   : > { %v8829_v47 = vadd.f32 %v6814_v0, %v4546_v3  ;;  %v4549_v9 = vadd.f32 %v6723_v28, %v8712_v62 }
 0x29a   : > { %v8832_v27 = vadd.f32 %v6817_v17, %v4549_v9  ;;  %v6834_v23 = vpop.f32.mrb[208].mxu0 }
 0x29b   : > { %v6928_v50 = vpop.f32.mrb[208].mxu1  ;;  %v6835_v58 = vpop.f32.mrb[209].mxu0 }
 0x29c   : > { %v6836_v63 = vadd.f32 %v6835_v58, %v6834_v23  ;;  %v6929_v10 = vpop.f32.mrb[209].mxu1  ;;  %v6837_v34 = vpop.f32.mrb[210].mxu0 }
 0x29d   : > { %v6930_v15 = vadd.f32 %v6929_v10, %v6928_v50  ;;  %v6931_v45 = vpop.f32.mrb[210].mxu1  ;;  %v6838_v37 = vpop.f32.mrb[211].mxu0 }
 0x29e   : > { %v4724_v54 = vadd.f32 %v6836_v63, %v8717_v8  ;;  %v6839_v33 = vadd.f32 %v6838_v37, %v6837_v34  ;;  %v6932_v60 = vpop.f32.mrb[211].mxu1 }
 0x29f   : > { %v6933_v13 = vadd.f32 %v6932_v60, %v6931_v45 }
 0x2a0   : > { %v8835_v36 = vadd.f32 %v6930_v15, %v4724_v54  ;;  %v4727_v62 = vadd.f32 %v6839_v33, %v8722_v14 }
 0x2a2   : > { %v8838_v51 = vadd.f32 %v6933_v13, %v4727_v62  ;;  %v6840_v20 = vpop.f32.mrb[212].mxu0 }
 0x2a3   : > { %v6934_v21 = vpop.f32.mrb[212].mxu1  ;;  %v6841_v22 = vpop.f32.mrb[213].mxu0 }
 0x2a4   : > { %v6842_v26 = vadd.f32 %v6841_v22, %v6840_v20  ;;  %v6935_v57 = vpop.f32.mrb[213].mxu1  ;;  %v6843_v61 = vpop.f32.mrb[214].mxu0 }
 0x2a5   : > { %v6936_v1 = vadd.f32 %v6935_v57, %v6934_v21  ;;  %v6937_v59 = vpop.f32.mrb[214].mxu1  ;;  %v6844_v52 = vpop.f32.mrb[215].mxu0 }
 0x2a6   : > { %v4732_v8 = vadd.f32 %v6842_v26, %v8727_v53  ;;  %v6845_v7 = vadd.f32 %v6844_v52, %v6843_v61  ;;  %v6938_v41 = vpop.f32.mrb[215].mxu1 }
 0x2a7   : > { %v6939_v39 = vadd.f32 %v6938_v41, %v6937_v59 }
 0x2a8   : > { %v8841_v30 = vadd.f32 %v6936_v1, %v4732_v8  ;;  %v4735_v14 = vadd.f32 %v6845_v7, %v8732_v42 }
 0x2aa   : > { %v8844_v44 = vadd.f32 %v6939_v39, %v4735_v14  ;;  %v6846_v0 = vpop.f32.mrb[216].mxu0 }
 0x2ab   : > { %v6940_v31 = vpop.f32.mrb[216].mxu1  ;;  %v6847_v5 = vpop.f32.mrb[217].mxu0 }
 0x2ac   : > { %v6848_v3 = vadd.f32 %v6847_v5, %v6846_v0  ;;  %v6941_v28 = vpop.f32.mrb[217].mxu1  ;;  %v6849_v55 = vpop.f32.mrb[218].mxu0 }
 0x2ad   : > { %v6942_v17 = vadd.f32 %v6941_v28, %v6940_v31  ;;  %v6943_v9 = vpop.f32.mrb[218].mxu1  ;;  %v6850_v23 = vpop.f32.mrb[219].mxu0 }
 0x2ae   : > { %v4740_v53 = vadd.f32 %v6848_v3, %v8737_v46  ;;  %v6851_v50 = vadd.f32 %v6850_v23, %v6849_v55  ;;  %v6944_v58 = vpop.f32.mrb[219].mxu1 }
 0x2af   : > { %v6945_v63 = vadd.f32 %v6944_v58, %v6943_v9 }
 0x2b0   : > { %v8847_v10 = vadd.f32 %v6942_v17, %v4740_v53  ;;  %v4743_v42 = vadd.f32 %v6851_v50, %v8742_v25 }
 0x2b2   : > { %v8850_v34 = vadd.f32 %v6945_v63, %v4743_v42  ;;  %v6852_v15 = vpop.f32.mrb[220].mxu0 }
 0x2b3   : > { %v6946_v45 = vpop.f32.mrb[220].mxu1  ;;  %v6853_v37 = vpop.f32.mrb[221].mxu0 }
 0x2b4   : > { %v6854_v54 = vadd.f32 %v6853_v37, %v6852_v15  ;;  %v6947_v33 = vpop.f32.mrb[221].mxu1  ;;  %v6855_v60 = vpop.f32.mrb[222].mxu0 }
 0x2b5   : > { %v6948_v13 = vadd.f32 %v6947_v33, %v6946_v45  ;;  %v6949_v62 = vpop.f32.mrb[222].mxu1  ;;  %v6856_v20 = vpop.f32.mrb[223].mxu0 }
 0x2b6   : > { %v4748_v46 = vadd.f32 %v6854_v54, %v8747_v56  ;;  %v6857_v21 = vadd.f32 %v6856_v20, %v6855_v60  ;;  %v6950_v22 = vpop.f32.mrb[223].mxu1 }
 0x2b7   : > { %v6951_v26 = vadd.f32 %v6950_v22, %v6949_v62 }
 0x2b8   : > { %v8853_v57 = vadd.f32 %v6948_v13, %v4748_v46  ;;  %v4751_v25 = vadd.f32 %v6857_v21, %v8752_v32 }
 0x2ba   : > { %v8856_v61 = vadd.f32 %v6951_v26, %v4751_v25  ;;  %v6858_v1 = vpop.f32.mrb[224].mxu0 }
 0x2bb   : > { %v6952_v59 = vpop.f32.mrb[224].mxu1  ;;  %v6859_v52 = vpop.f32.mrb[225].mxu0 }
 0x2bc   : > { %v6860_v8 = vadd.f32 %v6859_v52, %v6858_v1  ;;  %v6953_v7 = vpop.f32.mrb[225].mxu1  ;;  %v6861_v41 = vpop.f32.mrb[226].mxu0 }
 0x2bd   : > { %v6954_v39 = vadd.f32 %v6953_v7, %v6952_v59  ;;  %v6955_v14 = vpop.f32.mrb[226].mxu1  ;;  %v6862_v0 = vpop.f32.mrb[227].mxu0 }
 0x2be   : > { %v4756_v56 = vadd.f32 %v6860_v8, %v8757_v35  ;;  %v6863_v31 = vadd.f32 %v6862_v0, %v6861_v41  ;;  %v6956_v5 = vpop.f32.mrb[227].mxu1 }
 0x2bf   : > { %v6957_v3 = vadd.f32 %v6956_v5, %v6955_v14 }
 0x2c0   : > { %v8859_v28 = vadd.f32 %v6954_v39, %v4756_v56  ;;  %v4759_v32 = vadd.f32 %v6863_v31, %v8762_v38 }
 0x2c2   : > { %v8862_v55 = vadd.f32 %v6957_v3, %v4759_v32  ;;  %v6864_v17 = vpop.f32.mrb[228].mxu0 }
 0x2c3   : > { %v6958_v9 = vpop.f32.mrb[228].mxu1  ;;  %v6865_v23 = vpop.f32.mrb[229].mxu0 }
 0x2c4   : > { %v6866_v53 = vadd.f32 %v6865_v23, %v6864_v17  ;;  %v6959_v50 = vpop.f32.mrb[229].mxu1  ;;  %v6867_v58 = vpop.f32.mrb[230].mxu0 }
 0x2c5   : > { %v6960_v63 = vadd.f32 %v6959_v50, %v6958_v9  ;;  %v6961_v42 = vpop.f32.mrb[230].mxu1  ;;  %v6868_v15 = vpop.f32.mrb[231].mxu0 }
 0x2c6   : > { %v4764_v35 = vadd.f32 %v6866_v53, %v8767_v48  ;;  %v6869_v45 = vadd.f32 %v6868_v15, %v6867_v58  ;;  %v6962_v37 = vpop.f32.mrb[231].mxu1 }
 0x2c7   : > { %v6963_v54 = vadd.f32 %v6962_v37, %v6961_v42 }
 0x2c8   : > { %v8865_v33 = vadd.f32 %v6960_v63, %v4764_v35  ;;  %v4767_v38 = vadd.f32 %v6869_v45, %v8772_v49 }
 0x2ca   : > { %v8868_v60 = vadd.f32 %v6963_v54, %v4767_v38  ;;  %v6870_v13 = vpop.f32.mrb[232].mxu0 }
 0x2cb   : > { %v6964_v62 = vpop.f32.mrb[232].mxu1  ;;  %v6871_v20 = vpop.f32.mrb[233].mxu0 }
 0x2cc   : > { %v6872_v46 = vadd.f32 %v6871_v20, %v6870_v13  ;;  %v6965_v21 = vpop.f32.mrb[233].mxu1  ;;  %v6873_v22 = vpop.f32.mrb[234].mxu0 }
 0x2cd   : > { %v6966_v26 = vadd.f32 %v6965_v21, %v6964_v62  ;;  %v6967_v25 = vpop.f32.mrb[234].mxu1  ;;  %v6874_v1 = vpop.f32.mrb[235].mxu0 }
 0x2ce   : > { %v4772_v48 = vadd.f32 %v6872_v46, %v8777_v6  ;;  %v6875_v59 = vadd.f32 %v6874_v1, %v6873_v22  ;;  %v6968_v52 = vpop.f32.mrb[235].mxu1 }
 0x2cf   : > { %v6969_v8 = vadd.f32 %v6968_v52, %v6967_v25 }
 0x2d0   : > { %v8871_v7 = vadd.f32 %v6966_v26, %v4772_v48  ;;  %v4775_v49 = vadd.f32 %v6875_v59, %v8782_v16 }
 0x2d2   : > { %v8874_v41 = vadd.f32 %v6969_v8, %v4775_v49  ;;  %v6876_v39 = vpop.f32.mrb[236].mxu0 }
 0x2d3   : > { %v6970_v14 = vpop.f32.mrb[236].mxu1  ;;  %v6877_v0 = vpop.f32.mrb[237].mxu0 }
 0x2d4   : > { %v6878_v56 = vadd.f32 %v6877_v0, %v6876_v39  ;;  %v6971_v31 = vpop.f32.mrb[237].mxu1  ;;  %v6879_v5 = vpop.f32.mrb[238].mxu0 }
 0x2d5   : > { %v6972_v3 = vadd.f32 %v6971_v31, %v6970_v14  ;;  %v6973_v32 = vpop.f32.mrb[238].mxu1  ;;  %v6880_v17 = vpop.f32.mrb[239].mxu0 }
 0x2d6   : > { %v4780_v6 = vadd.f32 %v6878_v56, %v8787_v12  ;;  %v6881_v9 = vadd.f32 %v6880_v17, %v6879_v5  ;;  %v6974_v23 = vpop.f32.mrb[239].mxu1 }
 0x2d7   : > { %v6975_v53 = vadd.f32 %v6974_v23, %v6973_v32 }
 0x2d8   : > { %v8877_v50 = vadd.f32 %v6972_v3, %v4780_v6  ;;  %v4783_v16 = vadd.f32 %v6881_v9, %v8792_v2 }
 0x2da   : > { %v8880_v58 = vadd.f32 %v6975_v53, %v4783_v16  ;;  %v6882_v63 = vpop.f32.mrb[240].mxu0 }
 0x2db   : > { %v6976_v42 = vpop.f32.mrb[240].mxu1  ;;  %v6883_v15 = vpop.f32.mrb[241].mxu0 }
 0x2dc   : > { %v6884_v35 = vadd.f32 %v6883_v15, %v6882_v63  ;;  %v6977_v45 = vpop.f32.mrb[241].mxu1  ;;  %v6885_v37 = vpop.f32.mrb[242].mxu0 }
 0x2dd   : > { %v6978_v54 = vadd.f32 %v6977_v45, %v6976_v42  ;;  %v6979_v38 = vpop.f32.mrb[242].mxu1  ;;  %v6886_v13 = vpop.f32.mrb[243].mxu0 }
 0x2de   : > { %v4788_v12 = vadd.f32 %v6884_v35, %v8797_v18  ;;  %v6887_v62 = vadd.f32 %v6886_v13, %v6885_v37  ;;  %v6980_v20 = vpop.f32.mrb[243].mxu1 }
 0x2df   : > { %v6981_v46 = vadd.f32 %v6980_v20, %v6979_v38 }
 0x2e0   : > { %v8883_v21 = vadd.f32 %v6978_v54, %v4788_v12  ;;  %v4791_v2 = vadd.f32 %v6887_v62, %v8802_v40 }
 0x2e2   : > { %v8886_v22 = vadd.f32 %v6981_v46, %v4791_v2  ;;  %v6888_v26 = vpop.f32.mrb[244].mxu0 }
 0x2e3   : > { %v6982_v25 = vpop.f32.mrb[244].mxu1  ;;  %v6889_v1 = vpop.f32.mrb[245].mxu0 }
 0x2e4   : > { %v6890_v48 = vadd.f32 %v6889_v1, %v6888_v26  ;;  %v6983_v59 = vpop.f32.mrb[245].mxu1  ;;  %v6891_v52 = vpop.f32.mrb[246].mxu0 }
 0x2e5   : > { %v6984_v8 = vadd.f32 %v6983_v59, %v6982_v25  ;;  %v6985_v49 = vpop.f32.mrb[246].mxu1  ;;  %v6892_v39 = vpop.f32.mrb[247].mxu0 }
 0x2e6   : > { %v4796_v18 = vadd.f32 %v6890_v48, %v8807_v24  ;;  %v6893_v14 = vadd.f32 %v6892_v39, %v6891_v52  ;;  %v6986_v0 = vpop.f32.mrb[247].mxu1 }
 0x2e7   : > { %v6987_v56 = vadd.f32 %v6986_v0, %v6985_v49 }
 0x2e8   : > { %v8889_v31 = vadd.f32 %v6984_v8, %v4796_v18  ;;  %v4799_v40 = vadd.f32 %v6893_v14, %v8812_v43 }
 0x2ea   : > { %v8892_v5 = vadd.f32 %v6987_v56, %v4799_v40  ;;  %v6894_v3 = vpop.f32.mrb[248].mxu0 }
 0x2eb   : > { %v6988_v32 = vpop.f32.mrb[248].mxu1  ;;  %v6895_v17 = vpop.f32.mrb[249].mxu0 }
 0x2ec   : > { %v6896_v6 = vadd.f32 %v6895_v17, %v6894_v3  ;;  %v6989_v9 = vpop.f32.mrb[249].mxu1  ;;  %v6897_v23 = vpop.f32.mrb[250].mxu0 }
 0x2ed   : > { %v6990_v53 = vadd.f32 %v6989_v9, %v6988_v32  ;;  %v6991_v16 = vpop.f32.mrb[250].mxu1  ;;  %v6898_v63 = vpop.f32.mrb[251].mxu0 }
 0x2ee   : > { %v4804_v24 = vadd.f32 %v6896_v6, %v8817_v29  ;;  %v6899_v42 = vadd.f32 %v6898_v63, %v6897_v23  ;;  %v6992_v15 = vpop.f32.mrb[251].mxu1 }
 0x2ef   : > { %v6993_v35 = vadd.f32 %v6992_v15, %v6991_v16 }
 0x2f0   : > { %v8895_v45 = vadd.f32 %v6990_v53, %v4804_v24  ;;  %v4807_v43 = vadd.f32 %v6899_v42, %v8820_v19 }
 0x2f2   : > { %v8898_v37 = vadd.f32 %v6993_v35, %v4807_v43  ;;  %v6900_v54 = vpop.f32.mrb[252].mxu0 }
 0x2f3   : > { %v6994_v38 = vpop.f32.mrb[252].mxu1  ;;  %v6901_v13 = vpop.f32.mrb[253].mxu0 }
 0x2f4   : > { %v6902_v12 = vadd.f32 %v6901_v13, %v6900_v54  ;;  %v6995_v62 = vpop.f32.mrb[253].mxu1  ;;  %v6903_v20 = vpop.f32.mrb[254].mxu0 }
 0x2f5   : > { %v6996_v46 = vadd.f32 %v6995_v62, %v6994_v38  ;;  %v6997_v2 = vpop.f32.mrb[254].mxu1  ;;  %v6904_v26 = vpop.f32.mrb[255].mxu0 }
 0x2f6   : > { %v4812_v29 = vadd.f32 %v6902_v12, %v8823_v4  ;;  %v6905_v25 = vadd.f32 %v6904_v26, %v6903_v20  ;;  %v6998_v1 = vpop.f32.mrb[255].mxu1 }
 0x2f7   : > { %v6999_v48 = vadd.f32 %v6998_v1, %v6997_v2 }
 0x2f8   : > { %v8901_v59 = vadd.f32 %v6996_v46, %v4812_v29  ;;  %v4815_v19 = vadd.f32 %v6905_v25, %v8826_v11 }
 0x2fa   : > { %v8904_v52 = vadd.f32 %v6999_v48, %v4815_v19  ;;  %v6906_v8 = vpop.f32.mrb[0].mxu0 }
 0x2fb   : > { %v7000_v49 = vpop.f32.mrb[0].mxu1  ;;  %v6907_v39 = vpop.f32.mrb[1].mxu0 }
 0x2fc   : > { %v6908_v18 = vadd.f32 %v6907_v39, %v6906_v8  ;;  %v7001_v14 = vpop.f32.mrb[1].mxu1  ;;  %v6909_v0 = vpop.f32.mrb[2].mxu0 }
 0x2fd   : > { %v7002_v56 = vadd.f32 %v7001_v14, %v7000_v49  ;;  %v7003_v40 = vpop.f32.mrb[2].mxu1  ;;  %v6910_v3 = vpop.f32.mrb[3].mxu0 }
 0x2fe   : > { %v4820_v4 = vadd.f32 %v6908_v18, %v8829_v47  ;;  %v6911_v32 = vadd.f32 %v6910_v3, %v6909_v0  ;;  %v7004_v17 = vpop.f32.mrb[3].mxu1 }
 0x2ff   : > { %v7005_v6 = vadd.f32 %v7004_v17, %v7003_v40 }
 0x300   : > { %v8907_v9 = vadd.f32 %v7002_v56, %v4820_v4  ;;  %v4823_v11 = vadd.f32 %v6911_v32, %v8832_v27 }
 0x302   : > { %v8910_v23 = vadd.f32 %v7005_v6, %v4823_v11  ;;  %v7022_v53 = vpop.f32.mrb[4].mxu0 }
 0x303   : > { %v7116_v16 = vpop.f32.mrb[4].mxu1  ;;  %v7023_v63 = vpop.f32.mrb[5].mxu0 }
 0x304   : > { %v7024_v24 = vadd.f32 %v7023_v63, %v7022_v53  ;;  %v7117_v42 = vpop.f32.mrb[5].mxu1  ;;  %v7025_v15 = vpop.f32.mrb[6].mxu0 }
 0x305   : > { %v7118_v35 = vadd.f32 %v7117_v42, %v7116_v16  ;;  %v7119_v43 = vpop.f32.mrb[6].mxu1  ;;  %v7026_v54 = vpop.f32.mrb[7].mxu0 }
 0x306   : > { %v4998_v47 = vadd.f32 %v7024_v24, %v8835_v36  ;;  %v7027_v38 = vadd.f32 %v7026_v54, %v7025_v15  ;;  %v7120_v13 = vpop.f32.mrb[7].mxu1 }
 0x307   : > { %v7121_v12 = vadd.f32 %v7120_v13, %v7119_v43 }
 0x308   : > { %v5135_v62 = vadd.f32 %v7118_v35, %v4998_v47  ;;  %v5001_v27 = vadd.f32 %v7027_v38, %v8838_v51 }
 0x30a   : > { %v5138_v20 = vadd.f32 %v7121_v12, %v5001_v27  ;;  %v7028_v46 = vpop.f32.mrb[8].mxu0 }
 0x30b   : > { %v7122_v2 = vpop.f32.mrb[8].mxu1  ;;  %v7029_v26 = vpop.f32.mrb[9].mxu0 }
 0x30c   : > { %v5992_v29 = vpack.c.bf16 %v5138_v20, %v5135_v62  ;;  %v7030_v25 = vadd.f32 %v7029_v26, %v7028_v46  ;;  %v7123_v36 = vpop.f32.mrb[9].mxu1  ;;  %v7031_v1 = vpop.f32.mrb[10].mxu0 }
 0x30d   : > { %v7124_v48 = vadd.f32 %v7123_v36, %v7122_v2  ;;  %v7125_v19 = vpop.f32.mrb[10].mxu1  ;;  %v7032_v8 = vpop.f32.mrb[11].mxu0 }
 0x30e   : > { %5993 = vst [vmem:[%s8918_s20] sm:$0xff] %v5992_v29   ;;  %v5006_v51 = vadd.f32 %v7030_v25, %v8841_v30  ;;  %v7033_v49 = vadd.f32 %v7032_v8, %v7031_v1  ;;  %v7126_v39 = vpop.f32.mrb[11].mxu1 }
 0x30f   : > { %v7127_v18 = vadd.f32 %v7126_v39, %v7125_v19 }
 0x310   : > { %v5143_v14 = vadd.f32 %v7124_v48, %v5006_v51  ;;  %v5009_v0 = vadd.f32 %v7033_v49, %v8844_v44 }
 0x312   : > { %v5146_v56 = vadd.f32 %v7127_v18, %v5009_v0  ;;  %v7034_v40 = vpop.f32.mrb[12].mxu0 }
 0x313   : > { %v7128_v3 = vpop.f32.mrb[12].mxu1  ;;  %v7035_v4 = vpop.f32.mrb[13].mxu0 }
 0x314   : > { %v5997_v32 = vpack.c.bf16 %v5146_v56, %v5143_v14  ;;  %v7036_v17 = vadd.f32 %v7035_v4, %v7034_v40  ;;  %v7129_v6 = vpop.f32.mrb[13].mxu1  ;;  %v7037_v11 = vpop.f32.mrb[14].mxu0 }
 0x315   : > { %v7130_v53 = vadd.f32 %v7129_v6, %v7128_v3  ;;  %v7131_v16 = vpop.f32.mrb[14].mxu1  ;;  %v7038_v63 = vpop.f32.mrb[15].mxu0 }
 0x316   : > { %6054 = vst [vmem:[%s8918_s20 + $0x8] sm:$0xff] %v5997_v32   ;;  %v5014_v30 = vadd.f32 %v7036_v17, %v8847_v10  ;;  %v7039_v24 = vadd.f32 %v7038_v63, %v7037_v11  ;;  %v7132_v42 = vpop.f32.mrb[15].mxu1 }
 0x317   : > { %v7133_v15 = vadd.f32 %v7132_v42, %v7131_v16 }
 0x318   : > { %v5151_v35 = vadd.f32 %v7130_v53, %v5014_v30  ;;  %v5017_v44 = vadd.f32 %v7039_v24, %v8850_v34 }
 0x31a   : > { %v5154_v43 = vadd.f32 %v7133_v15, %v5017_v44  ;;  %v7040_v54 = vpop.f32.mrb[16].mxu0 }
 0x31b   : > { %v7134_v47 = vpop.f32.mrb[16].mxu1  ;;  %v7041_v38 = vpop.f32.mrb[17].mxu0 }
 0x31c   : > { %v6002_v13 = vpack.c.bf16 %v5154_v43, %v5151_v35  ;;  %v7042_v12 = vadd.f32 %v7041_v38, %v7040_v54  ;;  %v7135_v62 = vpop.f32.mrb[17].mxu1  ;;  %v7043_v27 = vpop.f32.mrb[18].mxu0 }
 0x31d   : > { %v7136_v20 = vadd.f32 %v7135_v62, %v7134_v47  ;;  %v7137_v46 = vpop.f32.mrb[18].mxu1  ;;  %v7044_v2 = vpop.f32.mrb[19].mxu0 }
 0x31e   : > { %6055 = vst [vmem:[%s8918_s20 + $0x10] sm:$0xff] %v6002_v13   ;;  %v5022_v10 = vadd.f32 %v7042_v12, %v8853_v57  ;;  %v7045_v26 = vadd.f32 %v7044_v2, %v7043_v27  ;;  %v7138_v29 = vpop.f32.mrb[19].mxu1 }
 0x31f   : > { %v7139_v25 = vadd.f32 %v7138_v29, %v7137_v46 }
 0x320   : > { %v5159_v36 = vadd.f32 %v7136_v20, %v5022_v10  ;;  %v5025_v34 = vadd.f32 %v7045_v26, %v8856_v61 }
 0x322   : > { %v5162_v1 = vadd.f32 %v7139_v25, %v5025_v34  ;;  %v7046_v48 = vpop.f32.mrb[20].mxu0 }
 0x323   : > { %v7140_v19 = vpop.f32.mrb[20].mxu1  ;;  %v7047_v8 = vpop.f32.mrb[21].mxu0 }
 0x324   : > { %v6007_v51 = vpack.c.bf16 %v5162_v1, %v5159_v36  ;;  %v7048_v49 = vadd.f32 %v7047_v8, %v7046_v48  ;;  %v7141_v39 = vpop.f32.mrb[21].mxu1  ;;  %v7049_v18 = vpop.f32.mrb[22].mxu0 }
 0x325   : > { %v7142_v14 = vadd.f32 %v7141_v39, %v7140_v19  ;;  %v7143_v0 = vpop.f32.mrb[22].mxu1  ;;  %v7050_v56 = vpop.f32.mrb[23].mxu0 }
 0x326   : > { %6056 = vst [vmem:[%s8918_s20 + $0x18] sm:$0xff] %v6007_v51   ;;  %v5030_v57 = vadd.f32 %v7048_v49, %v8859_v28  ;;  %v7051_v40 = vadd.f32 %v7050_v56, %v7049_v18  ;;  %v7144_v3 = vpop.f32.mrb[23].mxu1 }
 0x327   : > { %v7145_v4 = vadd.f32 %v7144_v3, %v7143_v0 }
 0x328   : > { %v5167_v32 = vadd.f32 %v7142_v14, %v5030_v57  ;;  %v5033_v61 = vadd.f32 %v7051_v40, %v8862_v55 }
 0x32a   : > { %v5170_v17 = vadd.f32 %v7145_v4, %v5033_v61  ;;  %v7052_v6 = vpop.f32.mrb[24].mxu0 }
 0x32b   : > { %v7146_v11 = vpop.f32.mrb[24].mxu1  ;;  %v7053_v53 = vpop.f32.mrb[25].mxu0 }
 0x32c   : > { %v6012_v16 = vpack.c.bf16 %v5170_v17, %v5167_v32  ;;  %v7054_v63 = vadd.f32 %v7053_v53, %v7052_v6  ;;  %v7147_v30 = vpop.f32.mrb[25].mxu1  ;;  %v7055_v24 = vpop.f32.mrb[26].mxu0 }
 0x32d   : > { %v7148_v42 = vadd.f32 %v7147_v30, %v7146_v11  ;;  %v7149_v15 = vpop.f32.mrb[26].mxu1  ;;  %v7056_v35 = vpop.f32.mrb[27].mxu0 }
 0x32e   : > { %6057 = vst [vmem:[%s8918_s20 + $0x20] sm:$0xff] %v6012_v16   ;;  %v5038_v28 = vadd.f32 %v7054_v63, %v8865_v33  ;;  %v7057_v44 = vadd.f32 %v7056_v35, %v7055_v24  ;;  %v7150_v43 = vpop.f32.mrb[27].mxu1 }
 0x32f   : > { %v7151_v54 = vadd.f32 %v7150_v43, %v7149_v15 }
 0x330   : > { %v5175_v47 = vadd.f32 %v7148_v42, %v5038_v28  ;;  %v5041_v55 = vadd.f32 %v7057_v44, %v8868_v60 }
 0x332   : > { %v5178_v38 = vadd.f32 %v7151_v54, %v5041_v55  ;;  %v7058_v13 = vpop.f32.mrb[28].mxu0 }
 0x333   : > { %v7152_v12 = vpop.f32.mrb[28].mxu1  ;;  %v7059_v62 = vpop.f32.mrb[29].mxu0 }
 0x334   : > { %v6017_v27 = vpack.c.bf16 %v5178_v38, %v5175_v47  ;;  %v7060_v20 = vadd.f32 %v7059_v62, %v7058_v13  ;;  %v7153_v46 = vpop.f32.mrb[29].mxu1  ;;  %v7061_v2 = vpop.f32.mrb[30].mxu0 }
 0x335   : > { %v7154_v10 = vadd.f32 %v7153_v46, %v7152_v12  ;;  %v7155_v26 = vpop.f32.mrb[30].mxu1  ;;  %v7062_v29 = vpop.f32.mrb[31].mxu0 }
 0x336   : > { %6058 = vst [vmem:[%s8918_s20 + $0x28] sm:$0xff] %v6017_v27   ;;  %v5046_v33 = vadd.f32 %v7060_v20, %v8871_v7  ;;  %v7063_v25 = vadd.f32 %v7062_v29, %v7061_v2  ;;  %v7156_v36 = vpop.f32.mrb[31].mxu1 }
 0x337   : > { %v7157_v34 = vadd.f32 %v7156_v36, %v7155_v26 }
 0x338   : > { %v5183_v1 = vadd.f32 %v7154_v10, %v5046_v33  ;;  %v5049_v60 = vadd.f32 %v7063_v25, %v8874_v41 }
 0x33a   : > { %v5186_v48 = vadd.f32 %v7157_v34, %v5049_v60  ;;  %v7064_v19 = vpop.f32.mrb[32].mxu0 }
 0x33b   : > { %v7158_v8 = vpop.f32.mrb[32].mxu1  ;;  %v7065_v51 = vpop.f32.mrb[33].mxu0 }
 0x33c   : > { %v6022_v49 = vpack.c.bf16 %v5186_v48, %v5183_v1  ;;  %v7066_v39 = vadd.f32 %v7065_v51, %v7064_v19  ;;  %v7159_v18 = vpop.f32.mrb[33].mxu1  ;;  %v7067_v14 = vpop.f32.mrb[34].mxu0 }
 0x33d   : > { %v7160_v0 = vadd.f32 %v7159_v18, %v7158_v8  ;;  %v7161_v56 = vpop.f32.mrb[34].mxu1  ;;  %v7068_v57 = vpop.f32.mrb[35].mxu0 }
 0x33e   : > { %6059 = vst [vmem:[%s8918_s20 + $0x30] sm:$0xff] %v6022_v49   ;;  %v5054_v7 = vadd.f32 %v7066_v39, %v8877_v50  ;;  %v7069_v40 = vadd.f32 %v7068_v57, %v7067_v14  ;;  %v7162_v3 = vpop.f32.mrb[35].mxu1 }
 0x33f   : > { %v7163_v4 = vadd.f32 %v7162_v3, %v7161_v56 }
 0x340   : > { %v5191_v32 = vadd.f32 %v7160_v0, %v5054_v7  ;;  %v5057_v41 = vadd.f32 %v7069_v40, %v8880_v58 }
 0x342   : > { %v5194_v61 = vadd.f32 %v7163_v4, %v5057_v41  ;;  %v7070_v17 = vpop.f32.mrb[36].mxu0 }
 0x343   : > { %v7164_v6 = vpop.f32.mrb[36].mxu1  ;;  %v7071_v11 = vpop.f32.mrb[37].mxu0 }
 0x344   : > { %v6027_v53 = vpack.c.bf16 %v5194_v61, %v5191_v32  ;;  %v7072_v16 = vadd.f32 %v7071_v11, %v7070_v17  ;;  %v7165_v63 = vpop.f32.mrb[37].mxu1  ;;  %v7073_v30 = vpop.f32.mrb[38].mxu0 }
 0x345   : > { %v7166_v24 = vadd.f32 %v7165_v63, %v7164_v6  ;;  %v7167_v42 = vpop.f32.mrb[38].mxu1  ;;  %v7074_v15 = vpop.f32.mrb[39].mxu0 }
 0x346   : > { %6060 = vst [vmem:[%s8918_s20 + $0x38] sm:$0xff] %v6027_v53   ;;  %v5062_v50 = vadd.f32 %v7072_v16, %v8883_v21  ;;  %v7075_v35 = vadd.f32 %v7074_v15, %v7073_v30  ;;  %v7168_v28 = vpop.f32.mrb[39].mxu1 }
 0x347   : > { %v7169_v44 = vadd.f32 %v7168_v28, %v7167_v42 }
 0x348   : > { %v5199_v43 = vadd.f32 %v7166_v24, %v5062_v50  ;;  %v5065_v58 = vadd.f32 %v7075_v35, %v8886_v22 }
 0x34a   : > { %v5202_v54 = vadd.f32 %v7169_v44, %v5065_v58  ;;  %v7076_v47 = vpop.f32.mrb[40].mxu0 }
 0x34b   : > { %v7170_v55 = vpop.f32.mrb[40].mxu1  ;;  %v7077_v38 = vpop.f32.mrb[41].mxu0 }
 0x34c   : > { %v6032_v13 = vpack.c.bf16 %v5202_v54, %v5199_v43  ;;  %v7078_v12 = vadd.f32 %v7077_v38, %v7076_v47  ;;  %v7171_v62 = vpop.f32.mrb[41].mxu1  ;;  %v7079_v27 = vpop.f32.mrb[42].mxu0 }
 0x34d   : > { %v7172_v20 = vadd.f32 %v7171_v62, %v7170_v55  ;;  %v7173_v46 = vpop.f32.mrb[42].mxu1  ;;  %v7080_v2 = vpop.f32.mrb[43].mxu0 }
 0x34e   : > { %6061 = vst [vmem:[%s8918_s20 + $0x40] sm:$0xff] %v6032_v13   ;;  %v5070_v21 = vadd.f32 %v7078_v12, %v8889_v31  ;;  %v7081_v10 = vadd.f32 %v7080_v2, %v7079_v27  ;;  %v7174_v26 = vpop.f32.mrb[43].mxu1 }
 0x34f   : > { %v7175_v29 = vadd.f32 %v7174_v26, %v7173_v46 }
 0x350   : > { %v5207_v33 = vadd.f32 %v7172_v20, %v5070_v21  ;;  %v5073_v22 = vadd.f32 %v7081_v10, %v8892_v5 }
 0x352   : > { %v5210_v25 = vadd.f32 %v7175_v29, %v5073_v22  ;;  %v7082_v36 = vpop.f32.mrb[44].mxu0 }
 0x353   : > { %v7176_v34 = vpop.f32.mrb[44].mxu1  ;;  %v7083_v1 = vpop.f32.mrb[45].mxu0 }
 0x354   : > { %v6037_v60 = vpack.c.bf16 %v5210_v25, %v5207_v33  ;;  %v7084_v48 = vadd.f32 %v7083_v1, %v7082_v36  ;;  %v7177_v19 = vpop.f32.mrb[45].mxu1  ;;  %v7085_v8 = vpop.f32.mrb[46].mxu0 }
 0x355   : > { %v7178_v51 = vadd.f32 %v7177_v19, %v7176_v34  ;;  %v7179_v49 = vpop.f32.mrb[46].mxu1  ;;  %v7086_v39 = vpop.f32.mrb[47].mxu0 }
 0x356   : > { %6062 = vst [vmem:[%s8918_s20 + $0x48] sm:$0xff] %v6037_v60   ;;  %v5078_v31 = vadd.f32 %v7084_v48, %v8895_v45  ;;  %v7087_v18 = vadd.f32 %v7086_v39, %v7085_v8  ;;  %v7180_v14 = vpop.f32.mrb[47].mxu1 }
 0x357   : > { %v7181_v0 = vadd.f32 %v7180_v14, %v7179_v49 }
 0x358   : > { %v5215_v56 = vadd.f32 %v7178_v51, %v5078_v31  ;;  %v5081_v5 = vadd.f32 %v7087_v18, %v8898_v37 }
 0x35a   : > { %v5218_v57 = vadd.f32 %v7181_v0, %v5081_v5  ;;  %v7088_v7 = vpop.f32.mrb[48].mxu0 }
 0x35b   : > { %v7182_v40 = vpop.f32.mrb[48].mxu1  ;;  %v7089_v3 = vpop.f32.mrb[49].mxu0 }
 0x35c   : > { %v6042_v4 = vpack.c.bf16 %v5218_v57, %v5215_v56  ;;  %v7090_v32 = vadd.f32 %v7089_v3, %v7088_v7  ;;  %v7183_v41 = vpop.f32.mrb[49].mxu1  ;;  %v7091_v61 = vpop.f32.mrb[50].mxu0 }
 0x35d   : > { %v7184_v17 = vadd.f32 %v7183_v41, %v7182_v40  ;;  %v7185_v6 = vpop.f32.mrb[50].mxu1  ;;  %v7092_v11 = vpop.f32.mrb[51].mxu0 }
 0x35e   : > { %6063 = vst [vmem:[%s8918_s20 + $0x50] sm:$0xff] %v6042_v4   ;;  %v5086_v45 = vadd.f32 %v7090_v32, %v8901_v59  ;;  %v7093_v53 = vadd.f32 %v7092_v11, %v7091_v61  ;;  %v7186_v16 = vpop.f32.mrb[51].mxu1 }
 0x35f   : > { %v7187_v63 = vadd.f32 %v7186_v16, %v7185_v6 }
 0x360   : > { %v5223_v30 = vadd.f32 %v7184_v17, %v5086_v45  ;;  %v5089_v37 = vadd.f32 %v7093_v53, %v8904_v52 }
 0x362   : > { %v5226_v24 = vadd.f32 %v7187_v63, %v5089_v37  ;;  %v7094_v42 = vpop.f32.mrb[52].mxu0 }
 0x363   : > { %v7188_v15 = vpop.f32.mrb[52].mxu1  ;;  %v7095_v50 = vpop.f32.mrb[53].mxu0 }
 0x364   : > { %v6047_v35 = vpack.c.bf16 %v5226_v24, %v5223_v30  ;;  %v7096_v28 = vadd.f32 %v7095_v50, %v7094_v42  ;;  %v7189_v44 = vpop.f32.mrb[53].mxu1  ;;  %v7097_v43 = vpop.f32.mrb[54].mxu0 }
 0x365   : > { %v7190_v58 = vadd.f32 %v7189_v44, %v7188_v15  ;;  %v7191_v54 = vpop.f32.mrb[54].mxu1  ;;  %v7098_v47 = vpop.f32.mrb[55].mxu0 }
 0x366   : > { %6064 = vst [vmem:[%s8918_s20 + $0x58] sm:$0xff] %v6047_v35   ;;  %v5094_v59 = vadd.f32 %v7096_v28, %v8907_v9  ;;  %v7099_v55 = vadd.f32 %v7098_v47, %v7097_v43  ;;  %v7192_v38 = vpop.f32.mrb[55].mxu1 }
 0x367   : > { %v7193_v13 = vadd.f32 %v7192_v38, %v7191_v54 }
 0x368   : > { %v5231_v12 = vadd.f32 %v7190_v58, %v5094_v59  ;;  %v5097_v52 = vadd.f32 %v7099_v55, %v8910_v23 }
 0x36a   : > { %v5234_v62 = vadd.f32 %v7193_v13, %v5097_v52 }
 0x36c   : > { %v6052_v27 = vpack.c.bf16 %v5234_v62, %v5231_v12 }
 0x36e   : > { %6065 = vst [vmem:[%s8918_s20 + $0x60] sm:$0xff] %v6052_v27  }
 0x36f PF: > { %s13_s12 = sadd.s32 1, %s7401_s12  }
 0x370   : > { %p10_p4 = scmp.ge.s32.totalorder %s13_s12, 5  }
 0x372   :  { %12 = sbr.rel (!%p10_p4) target bundleno = 1 (0x1), region = 62 }

// kernel: conv_forward.4
= control target key start
LH: loop header
LB: loop body
LE: loop exit
PB: predicated region body
PF: predicated region fallthrough
CT: control target
= control target key end

     0   :  { %s3330_s1 = inlined_call_operand.vmem [shape: bf16[2048,128], index: 1, kind: input, shape index: {}]   ;;  %s3331_s0 = inlined_call_operand.vmem [shape: bf16[64,2048], index: 0, kind: input, shape index: {}]   ;;  %s3332_s2 = inlined_call_operand.vmem [shape: f32[1,128], index: 2, kind: input, shape index: {}]   ;;  %s3333_s3 = inlined_call_operand.vmem [shape: bf16[64,128], index: 3, kind: output, shape index: {}]  }
   0x1   :  { %v2546_v0 = vld [vmem:[%s3330_s1 + $0x40] sm:$0xff]   ;;  %v2550_v4 = vld [vmem:[%s3330_s1 + $0x48] sm:$0xff]   ;;  %v2554_v8 = vld [vmem:[%s3330_s1 + $0x50] sm:$0xff]  }
   0x2   :  { %v2547_v1 = vld [vmem:[%s3330_s1 + $0xc0] sm:$0xff]   ;;  %2226 = vmatprep.subr.bf16.mxu0 %v2546_v0  ;;  %v2551_v5 = vld [vmem:[%s3330_s1 + $0xc8] sm:$0xff]   ;;  %v2555_v9 = vld [vmem:[%s3330_s1 + $0xd0] sm:$0xff]  }
   0x3   :  { %v2548_v2 = vld [vmem:[%s3330_s1] sm:$0xff]   ;;  %2266 = vmatprep.subr.bf16.mxu1 %v2547_v1  ;;  %v2552_v6 = vld [vmem:[%s3330_s1 + $0x8] sm:$0xff]   ;;  %v2556_v10 = vld [vmem:[%s3330_s1 + $0x10] sm:$0xff]  }
   0x4   :  { %v2549_v3 = vld [vmem:[%s3330_s1 + $0x80] sm:$0xff]   ;;  %2227 = vmatpush3.bf16.msra.mxu0 %v2548_v2  ;;  %v2553_v7 = vld [vmem:[%s3330_s1 + $0x88] sm:$0xff]   ;;  %v2557_v11 = vld [vmem:[%s3330_s1 + $0x90] sm:$0xff]  }
   0x5   :  { %2267 = vmatpush3.bf16.msra.mxu1 %v2549_v3  ;;  %2228 = vmatprep.subr.bf16.mxu0 %v2550_v4  ;;  %v2558_v12 = vld [vmem:[%s3330_s1 + $0x58] sm:$0xff]   ;;  %v2562_v16 = vld [vmem:[%s3330_s1 + $0x60] sm:$0xff]   ;;  %v2566_v20 = vld [vmem:[%s3330_s1 + $0x68] sm:$0xff]  }
   0x6   :  { %2268 = vmatprep.subr.bf16.mxu1 %v2551_v5  ;;  %v2559_v13 = vld [vmem:[%s3330_s1 + $0xd8] sm:$0xff]   ;;  %v2563_v17 = vld [vmem:[%s3330_s1 + $0xe0] sm:$0xff]   ;;  %v2567_v21 = vld [vmem:[%s3330_s1 + $0xe8] sm:$0xff]  }
   0x7   :  { %v2560_v14 = vld [vmem:[%s3330_s1 + $0x18] sm:$0xff]   ;;  %v2564_v18 = vld [vmem:[%s3330_s1 + $0x20] sm:$0xff]   ;;  %v2568_v22 = vld [vmem:[%s3330_s1 + $0x28] sm:$0xff]  }
   0x8   :  { %2229 = vmatpush3.bf16.msra.mxu0 %v2552_v6  ;;  %v2561_v15 = vld [vmem:[%s3330_s1 + $0x98] sm:$0xff]   ;;  %v2565_v19 = vld [vmem:[%s3330_s1 + $0xa0] sm:$0xff]   ;;  %v2569_v23 = vld [vmem:[%s3330_s1 + $0xa8] sm:$0xff]  }
   0x9   :  { %2269 = vmatpush3.bf16.msra.mxu1 %v2553_v7  ;;  %2230 = vmatprep.subr.bf16.mxu0 %v2554_v8  ;;  %v2570_v24 = vld [vmem:[%s3330_s1 + $0x70] sm:$0xff]   ;;  %v2574_v28 = vld [vmem:[%s3330_s1 + $0x78] sm:$0xff]   ;;  %v15_v32 = vld [vmem:[%s3331_s0] sm:$0xff] }
   0xa   :  { %2270 = vmatprep.subr.bf16.mxu1 %v2555_v9  ;;  %v2571_v25 = vld [vmem:[%s3330_s1 + $0xf0] sm:$0xff]   ;;  %v2575_v29 = vld [vmem:[%s3330_s1 + $0xf8] sm:$0xff]   ;;  %v23_v33 = vld [vmem:[%s3331_s0 + $0x40] sm:$0xff] }
   0xb   :  { %v2572_v26 = vld [vmem:[%s3330_s1 + $0x30] sm:$0xff]   ;;  %v2576_v30 = vld [vmem:[%s3330_s1 + $0x38] sm:$0xff]   ;;  %v16_v34 = vld [vmem:[%s3331_s0 + $0x8] sm:$0xff]  ;;  %v1995_v35 = vcombine.low %v15_v32, %v23_v33  ;;  %v1996_v36 = vcombine.high %v15_v32, %v23_v33 }
   0xc   :  { %2231 = vmatpush3.bf16.msra.mxu0 %v2556_v10  ;;  %v2573_v27 = vld [vmem:[%s3330_s1 + $0xb0] sm:$0xff]   ;;  %v2577_v31 = vld [vmem:[%s3330_s1 + $0xb8] sm:$0xff]   ;;  %v24_v37 = vld [vmem:[%s3331_s0 + $0x48] sm:$0xff] }
   0xd   :  { %2271 = vmatpush3.bf16.msra.mxu1 %v2557_v11  ;;  %2232 = vmatprep.subr.bf16.mxu0 %v2558_v12  ;;  %v1997_v38 = vcombine.low %v16_v34, %v24_v37  ;;  %v1998_v39 = vcombine.high %v16_v34, %v24_v37  ;;  %v2578_v40 = vld [vmem:[%s3330_s1 + $0x140] sm:$0xff]   ;;  %v2582_v44 = vld [vmem:[%s3330_s1 + $0x148] sm:$0xff]   ;;  %v2586_v56 = vld [vmem:[%s3330_s1 + $0x150] sm:$0xff]  }
   0xe   :  { %2272 = vmatprep.subr.bf16.mxu1 %v2559_v13  ;;  %1462 = vmatprep.mubr.bf16.mxu0 %v1996_v36  ;;  %v2579_v41 = vld [vmem:[%s3330_s1 + $0x1c0] sm:$0xff]   ;;  %v2583_v45 = vld [vmem:[%s3330_s1 + $0x1c8] sm:$0xff]   ;;  %v2587_v57 = vld [vmem:[%s3330_s1 + $0x1d0] sm:$0xff]  }
   0xf   :  { %1527 = vmatprep.mubr.bf16.mxu1 %v1998_v39  ;;  %v2580_v42 = vld [vmem:[%s3330_s1 + $0x100] sm:$0xff]   ;;  %v2584_v46 = vld [vmem:[%s3330_s1 + $0x108] sm:$0xff]   ;;  %v2588_v58 = vld [vmem:[%s3330_s1 + $0x110] sm:$0xff]  }
  0x10   :  { %2233 = vmatpush3.bf16.msra.mxu0 %v2560_v14  ;;  %v2581_v43 = vld [vmem:[%s3330_s1 + $0x180] sm:$0xff]   ;;  %v2585_v47 = vld [vmem:[%s3330_s1 + $0x188] sm:$0xff]   ;;  %v2589_v59 = vld [vmem:[%s3330_s1 + $0x190] sm:$0xff]  }
  0x11   :  { %2273 = vmatpush3.bf16.msra.mxu1 %v2561_v15  ;;  %2234 = vmatprep.subr.bf16.mxu0 %v2562_v16  ;;  %v31_v48 = vld [vmem:[%s3331_s0 + $0x80] sm:$0xff]  ;;  %v32_v51 = vld [vmem:[%s3331_s0 + $0x88] sm:$0xff]  ;;  %v2590_v60 = vld [vmem:[%s3330_s1 + $0x158] sm:$0xff]  }
  0x12   :  { %2274 = vmatprep.subr.bf16.mxu1 %v2563_v17  ;;  %v39_v49 = vld [vmem:[%s3331_s0 + $0xc0] sm:$0xff]  ;;  %v40_v52 = vld [vmem:[%s3331_s0 + $0xc8] sm:$0xff]  ;;  %v2591_v61 = vld [vmem:[%s3330_s1 + $0x1d8] sm:$0xff]  }
  0x13   :  { %v2012_v50 = vcombine.high %v31_v48, %v39_v49  ;;  %v2011_v53 = vcombine.low %v31_v48, %v39_v49  ;;  %v2014_v54 = vcombine.high %v32_v51, %v40_v52  ;;  %v2013_v55 = vcombine.low %v32_v51, %v40_v52  ;;  %v2592_v62 = vld [vmem:[%s3330_s1 + $0x118] sm:$0xff]   ;;  %v47_v0 = vld [vmem:[%s3331_s0 + $0x100] sm:$0xff]  ;;  %v48_v2 = vld [vmem:[%s3331_s0 + $0x108] sm:$0xff] }
  0x14   :  { %2235 = vmatpush3.bf16.msra.mxu0 %v2564_v18  ;;  %v2593_v63 = vld [vmem:[%s3330_s1 + $0x198] sm:$0xff]   ;;  %v55_v1 = vld [vmem:[%s3331_s0 + $0x140] sm:$0xff]  ;;  %v56_v3 = vld [vmem:[%s3331_s0 + $0x148] sm:$0xff] }
  0x15   :  { %2275 = vmatpush3.bf16.msra.mxu1 %v2565_v19  ;;  %2236 = vmatprep.subr.bf16.mxu0 %v2566_v20  ;;  %v2028_v4 = vcombine.high %v47_v0, %v55_v1  ;;  %v2030_v5 = vcombine.high %v48_v2, %v56_v3  ;;  %v2027_v6 = vcombine.low %v47_v0, %v55_v1  ;;  %v2594_v8 = vld [vmem:[%s3330_s1 + $0x160] sm:$0xff]   ;;  %v2598_v12 = vld [vmem:[%s3330_s1 + $0x168] sm:$0xff]   ;;  %v17_v32 = vld [vmem:[%s3331_s0 + $0x10] sm:$0xff] }
  0x16   :  { %2276 = vmatprep.subr.bf16.mxu1 %v2567_v21  ;;  %v2029_v7 = vcombine.low %v48_v2, %v56_v3  ;;  %v2595_v9 = vld [vmem:[%s3330_s1 + $0x1e0] sm:$0xff]   ;;  %v2599_v13 = vld [vmem:[%s3330_s1 + $0x1e8] sm:$0xff]   ;;  %v25_v33 = vld [vmem:[%s3331_s0 + $0x50] sm:$0xff] }
  0x17   :  { %v2596_v10 = vld [vmem:[%s3330_s1 + $0x120] sm:$0xff]   ;;  %v2600_v14 = vld [vmem:[%s3330_s1 + $0x128] sm:$0xff]   ;;  %v1999_v34 = vcombine.low %v17_v32, %v25_v33  ;;  %v18_v36 = vld [vmem:[%s3331_s0 + $0x18] sm:$0xff] }
  0x18   :  { %2237 = vmatpush3.bf16.msra.mxu0 %v2568_v22  ;;  %v2597_v11 = vld [vmem:[%s3330_s1 + $0x1a0] sm:$0xff]   ;;  %v2601_v15 = vld [vmem:[%s3330_s1 + $0x1a8] sm:$0xff]   ;;  %v26_v37 = vld [vmem:[%s3331_s0 + $0x58] sm:$0xff] }
  0x19   :  { %2277 = vmatpush3.bf16.msra.mxu1 %v2569_v23  ;;  %2238 = vmatprep.subr.bf16.mxu0 %v2570_v24  ;;  %v63_v16 = vld [vmem:[%s3331_s0 + $0x180] sm:$0xff]  ;;  %v64_v18 = vld [vmem:[%s3331_s0 + $0x188] sm:$0xff]  ;;  %v2602_v24 = vld [vmem:[%s3330_s1 + $0x170] sm:$0xff]   ;;  %v2002_v39 = vcombine.high %v18_v36, %v26_v37 }
  0x1a   :  { %2278 = vmatprep.subr.bf16.mxu1 %v2571_v25  ;;  %v71_v17 = vld [vmem:[%s3331_s0 + $0x1c0] sm:$0xff]  ;;  %v72_v20 = vld [vmem:[%s3331_s0 + $0x1c8] sm:$0xff]  ;;  %v2603_v25 = vld [vmem:[%s3330_s1 + $0x1f0] sm:$0xff]  }
  0x1b   :  { %v2044_v19 = vcombine.high %v63_v16, %v71_v17  ;;  %v2043_v21 = vcombine.low %v63_v16, %v71_v17  ;;  %v2046_v22 = vcombine.high %v64_v18, %v72_v20  ;;  %v2045_v23 = vcombine.low %v64_v18, %v72_v20  ;;  %v33_v48 = vld [vmem:[%s3331_s0 + $0x90] sm:$0xff]  ;;  %v42_v51 = vld [vmem:[%s3331_s0 + $0xd8] sm:$0xff] }
  0x1c   :  { %2239 = vmatpush3.bf16.msra.mxu0 %v2572_v26  ;;  %v2604_v26 = vld [vmem:[%s3330_s1 + $0x130] sm:$0xff]   ;;  %v50_v2 = vld [vmem:[%s3331_s0 + $0x118] sm:$0xff] }
  0x1d   :  { %2279 = vmatpush3.bf16.msra.mxu1 %v2573_v27  ;;  %2240 = vmatprep.subr.bf16.mxu0 %v2574_v28  ;;  %v2605_v27 = vld [vmem:[%s3330_s1 + $0x1b0] sm:$0xff]   ;;  %v2606_v28 = vld [vmem:[%s3330_s1 + $0x178] sm:$0xff]  }
  0x1e   :  { %2280 = vmatprep.subr.bf16.mxu1 %v2575_v29  ;;  %v2607_v29 = vld [vmem:[%s3330_s1 + $0x1f8] sm:$0xff]   ;;  %v41_v49 = vld [vmem:[%s3331_s0 + $0xd0] sm:$0xff] }
  0x1f   :  { %v2016_v52 = vcombine.high %v33_v48, %v41_v49  ;;  %v49_v0 = vld [vmem:[%s3331_s0 + $0x110] sm:$0xff]  ;;  %v74_v20 = vld [vmem:[%s3331_s0 + $0x1d8] sm:$0xff] }
  0x20   :  { %2241 = vmatpush3.bf16.msra.mxu0 %v2576_v30  ;;  %v2608_v30 = vld [vmem:[%s3330_s1 + $0x138] sm:$0xff]   ;;  %v57_v1 = vld [vmem:[%s3331_s0 + $0x150] sm:$0xff] }
  0x21   :  { %2281 = vmatpush3.bf16.msra.mxu1 %v2577_v31  ;;  %2306 = vmatprep.subr.bf16.mxu0 %v2578_v40  ;;  %v2609_v31 = vld [vmem:[%s3330_s1 + $0x1b8] sm:$0xff]   ;;  %v2610_v40 = vld [vmem:[%s3330_s1 + $0x240] sm:$0xff]   ;;  %v2032_v3 = vcombine.high %v49_v0, %v57_v1  ;;  %v65_v16 = vld [vmem:[%s3331_s0 + $0x190] sm:$0xff] }
  0x22   :  { %2346 = vmatprep.subr.bf16.mxu1 %v2579_v41  ;;  %v2611_v41 = vld [vmem:[%s3330_s1 + $0x2c0] sm:$0xff]   ;;  %v73_v17 = vld [vmem:[%s3331_s0 + $0x1d0] sm:$0xff] }
  0x23   :  { %1463 = vmatmul.mubr.bf16.vlgmr.msra.gmra.mrb[0].mxu0 %v1995_v35  ;;  %v2000_v35 = vcombine.high %v17_v32, %v25_v33  ;;  %v2048_v18 = vcombine.high %v65_v16, %v73_v17  ;;  %v19_v32 = vld [vmem:[%s3331_s0 + $0x20] sm:$0xff] }
  0x24   :  { %1528 = vmatmul.mubr.bf16.vlgmr.msra.gmra.mrb[0].mxu1 %v1997_v38  ;;  %2307 = vmatpush3.bf16.msra.mxu0 %v2580_v42  ;;  %v2001_v38 = vcombine.low %v18_v36, %v26_v37  ;;  %v2612_v42 = vld [vmem:[%s3330_s1 + $0x200] sm:$0xff]  }
  0x25   :  { %2347 = vmatpush3.bf16.msra.mxu1 %v2581_v43  ;;  %2308 = vmatprep.subr.bf16.mxu0 %v2582_v44  ;;  %v2613_v43 = vld [vmem:[%s3330_s1 + $0x280] sm:$0xff]   ;;  %v2614_v44 = vld [vmem:[%s3330_s1 + $0x248] sm:$0xff]  }
  0x26   :  { %2348 = vmatprep.subr.bf16.mxu1 %v2583_v45  ;;  %1470 = vmatprep.mubr.bf16.mxu0 %v2012_v50  ;;  %v2615_v45 = vld [vmem:[%s3330_s1 + $0x2c8] sm:$0xff]   ;;  %v34_v50 = vld [vmem:[%s3331_s0 + $0x98] sm:$0xff]  ;;  %v27_v33 = vld [vmem:[%s3331_s0 + $0x60] sm:$0xff] }
  0x27   :  { %1535 = vmatprep.mubr.bf16.mxu1 %v2014_v54  ;;  %v2015_v54 = vcombine.low %v33_v48, %v41_v49  ;;  %v2003_v36 = vcombine.low %v19_v32, %v27_v33  ;;  %v2004_v37 = vcombine.high %v19_v32, %v27_v33  ;;  %v35_v48 = vld [vmem:[%s3331_s0 + $0xa0] sm:$0xff]  ;;  %v21_v32 = vld [vmem:[%s3331_s0 + $0x30] sm:$0xff] }
  0x28   :  { %2309 = vmatpush3.bf16.msra.mxu0 %v2584_v46  ;;  %v2616_v46 = vld [vmem:[%s3330_s1 + $0x208] sm:$0xff]   ;;  %v43_v49 = vld [vmem:[%s3331_s0 + $0xe0] sm:$0xff]  ;;  %v29_v33 = vld [vmem:[%s3331_s0 + $0x70] sm:$0xff] }
  0x29   :  { %2349 = vmatpush3.bf16.msra.mxu1 %v2585_v47  ;;  %2310 = vmatprep.subr.bf16.mxu0 %v2586_v56  ;;  %v2617_v47 = vld [vmem:[%s3330_s1 + $0x288] sm:$0xff]   ;;  %v2618_v56 = vld [vmem:[%s3330_s1 + $0x250] sm:$0xff]  }
  0x2a   :  { %2350 = vmatprep.subr.bf16.mxu1 %v2587_v57  ;;  %v2619_v57 = vld [vmem:[%s3330_s1 + $0x2d0] sm:$0xff]  }
  0x2b   :  { %1471 = vmatmul.mubr.bf16.gmra.mrb[4].mxu0 %v2011_v53  ;;  %v2018_v53 = vcombine.high %v34_v50, %v42_v51 }
  0x2c   :  { %1536 = vmatmul.mubr.bf16.gmra.mrb[4].mxu1 %v2013_v55  ;;  %2311 = vmatpush3.bf16.msra.mxu0 %v2588_v58  ;;  %v2017_v55 = vcombine.low %v34_v50, %v42_v51  ;;  %v2620_v58 = vld [vmem:[%s3330_s1 + $0x210] sm:$0xff]   ;;  %v36_v50 = vld [vmem:[%s3331_s0 + $0xa8] sm:$0xff]  ;;  %v2020_v51 = vcombine.high %v35_v48, %v43_v49 }
  0x2d   :  { %2351 = vmatpush3.bf16.msra.mxu1 %v2589_v59  ;;  %2312 = vmatprep.subr.bf16.mxu0 %v2590_v60  ;;  %v2621_v59 = vld [vmem:[%s3330_s1 + $0x290] sm:$0xff]   ;;  %v2622_v60 = vld [vmem:[%s3330_s1 + $0x258] sm:$0xff]  }
  0x2e   :  { %2352 = vmatprep.subr.bf16.mxu1 %v2591_v61  ;;  %1478 = vmatprep.mubr.bf16.mxu0 %v2028_v4  ;;  %v2623_v61 = vld [vmem:[%s3330_s1 + $0x2d8] sm:$0xff]  }
  0x2f   :  { %1543 = vmatprep.mubr.bf16.mxu1 %v2030_v5  ;;  %v58_v4 = vld [vmem:[%s3331_s0 + $0x158] sm:$0xff]  ;;  %v2031_v5 = vcombine.low %v49_v0, %v57_v1  ;;  %v51_v0 = vld [vmem:[%s3331_s0 + $0x120] sm:$0xff] }
  0x30   :  { %2313 = vmatpush3.bf16.msra.mxu0 %v2592_v62  ;;  %v2624_v62 = vld [vmem:[%s3330_s1 + $0x218] sm:$0xff]   ;;  %v59_v1 = vld [vmem:[%s3331_s0 + $0x160] sm:$0xff] }
  0x31   :  { %2353 = vmatpush3.bf16.msra.mxu1 %v2593_v63  ;;  %2314 = vmatprep.subr.bf16.mxu0 %v2594_v8  ;;  %v2625_v63 = vld [vmem:[%s3330_s1 + $0x298] sm:$0xff]   ;;  %v2626_v8 = vld [vmem:[%s3330_s1 + $0x260] sm:$0xff]  }
  0x32   :  { %2354 = vmatprep.subr.bf16.mxu1 %v2595_v9  ;;  %v2627_v9 = vld [vmem:[%s3330_s1 + $0x2e0] sm:$0xff]  }
  0x33   :  { %1479 = vmatmul.mubr.bf16.gmra.mrb[8].mxu0 %v2027_v6  ;;  %v2034_v6 = vcombine.high %v50_v2, %v58_v4 }
  0x34   :  { %1544 = vmatmul.mubr.bf16.gmra.mrb[8].mxu1 %v2029_v7  ;;  %2315 = vmatpush3.bf16.msra.mxu0 %v2596_v10  ;;  %v2033_v7 = vcombine.low %v50_v2, %v58_v4  ;;  %v2628_v10 = vld [vmem:[%s3330_s1 + $0x220] sm:$0xff]   ;;  %v2036_v2 = vcombine.high %v51_v0, %v59_v1  ;;  %v60_v4 = vld [vmem:[%s3331_s0 + $0x168] sm:$0xff] }
  0x35   :  { %2355 = vmatpush3.bf16.msra.mxu1 %v2597_v11  ;;  %2316 = vmatprep.subr.bf16.mxu0 %v2598_v12  ;;  %v2629_v11 = vld [vmem:[%s3330_s1 + $0x2a0] sm:$0xff]   ;;  %v2630_v12 = vld [vmem:[%s3330_s1 + $0x268] sm:$0xff]  }
  0x36   :  { %2356 = vmatprep.subr.bf16.mxu1 %v2599_v13  ;;  %1486 = vmatprep.mubr.bf16.mxu0 %v2044_v19  ;;  %v2631_v13 = vld [vmem:[%s3330_s1 + $0x2e8] sm:$0xff]   ;;  %v66_v19 = vld [vmem:[%s3331_s0 + $0x198] sm:$0xff] }
  0x37   :  { %1551 = vmatprep.mubr.bf16.mxu1 %v2046_v22  ;;  %v2050_v22 = vcombine.high %v66_v19, %v74_v20 }
  0x38   :  { %2317 = vmatpush3.bf16.msra.mxu0 %v2600_v14  ;;  %v2632_v14 = vld [vmem:[%s3330_s1 + $0x228] sm:$0xff]  }
  0x39   :  { %2357 = vmatpush3.bf16.msra.mxu1 %v2601_v15  ;;  %2318 = vmatprep.subr.bf16.mxu0 %v2602_v24  ;;  %v2633_v15 = vld [vmem:[%s3330_s1 + $0x2a8] sm:$0xff]   ;;  %v2634_v24 = vld [vmem:[%s3330_s1 + $0x270] sm:$0xff]  }
  0x3a   :  { %2358 = vmatprep.subr.bf16.mxu1 %v2603_v25  ;;  %v2635_v25 = vld [vmem:[%s3330_s1 + $0x2f0] sm:$0xff]  }
  0x3b   :  { %1487 = vmatmul.mubr.bf16.gmra.mrb[12].mxu0 %v2043_v21  ;;  %v2047_v21 = vcombine.low %v65_v16, %v73_v17  ;;  %v67_v16 = vld [vmem:[%s3331_s0 + $0x1a0] sm:$0xff] }
  0x3c   :  { %1552 = vmatmul.mubr.bf16.gmra.mrb[12].mxu1 %v2045_v23  ;;  %2319 = vmatpush3.bf16.msra.mxu0 %v2604_v26  ;;  %v2049_v23 = vcombine.low %v66_v19, %v74_v20  ;;  %v2636_v26 = vld [vmem:[%s3330_s1 + $0x230] sm:$0xff]   ;;  %v75_v17 = vld [vmem:[%s3331_s0 + $0x1e0] sm:$0xff]  ;;  %v76_v19 = vld [vmem:[%s3331_s0 + $0x1e8] sm:$0xff] }
  0x3d   :  { %2359 = vmatpush3.bf16.msra.mxu1 %v2605_v27  ;;  %2320 = vmatprep.subr.bf16.mxu0 %v2606_v28  ;;  %v2637_v27 = vld [vmem:[%s3330_s1 + $0x2b0] sm:$0xff]   ;;  %v2638_v28 = vld [vmem:[%s3330_s1 + $0x278] sm:$0xff]   ;;  %v2052_v20 = vcombine.high %v67_v16, %v75_v17 }
  0x3e   :  { %2360 = vmatprep.subr.bf16.mxu1 %v2607_v29  ;;  %1592 = vmatprep.mubr.bf16.mxu0 %v2000_v35  ;;  %v2639_v29 = vld [vmem:[%s3330_s1 + $0x2f8] sm:$0xff]   ;;  %v28_v35 = vld [vmem:[%s3331_s0 + $0x68] sm:$0xff] }
  0x3f   :  { %1657 = vmatprep.mubr.bf16.mxu1 %v2002_v39 }
  0x40   :  { %2321 = vmatpush3.bf16.msra.mxu0 %v2608_v30  ;;  %v2640_v30 = vld [vmem:[%s3330_s1 + $0x238] sm:$0xff]  }
  0x41   :  { %2361 = vmatpush3.bf16.msra.mxu1 %v2609_v31  ;;  %2386 = vmatprep.subr.bf16.mxu0 %v2610_v40  ;;  %v2641_v31 = vld [vmem:[%s3330_s1 + $0x2b8] sm:$0xff]   ;;  %v2642_v40 = vld [vmem:[%s3330_s1 + $0x340] sm:$0xff]  }
  0x42   :  { %2426 = vmatprep.subr.bf16.mxu1 %v2611_v41  ;;  %v2643_v41 = vld [vmem:[%s3330_s1 + $0x3c0] sm:$0xff]  }
  0x43   :  { %1593 = vmatmul.mubr.bf16.vlgmr.msra.gmra.mrb[16].mxu0 %v1999_v34  ;;  %v20_v34 = vld [vmem:[%s3331_s0 + $0x28] sm:$0xff] }
  0x44   :  { %1658 = vmatmul.mubr.bf16.vlgmr.msra.gmra.mrb[16].mxu1 %v2001_v38  ;;  %2387 = vmatpush3.bf16.msra.mxu0 %v2612_v42  ;;  %v2005_v38 = vcombine.low %v20_v34, %v28_v35  ;;  %v2006_v39 = vcombine.high %v20_v34, %v28_v35  ;;  %v2644_v42 = vld [vmem:[%s3330_s1 + $0x300] sm:$0xff]   ;;  %v22_v34 = vld [vmem:[%s3331_s0 + $0x38] sm:$0xff]  ;;  %v2007_v35 = vcombine.low %v21_v32, %v29_v33 }
  0x45   :  { %2427 = vmatpush3.bf16.msra.mxu1 %v2613_v43  ;;  %2388 = vmatprep.subr.bf16.mxu0 %v2614_v44  ;;  %v2645_v43 = vld [vmem:[%s3330_s1 + $0x380] sm:$0xff]   ;;  %v2646_v44 = vld [vmem:[%s3330_s1 + $0x348] sm:$0xff]  }
  0x46   :  { %2428 = vmatprep.subr.bf16.mxu1 %v2615_v45  ;;  %1600 = vmatprep.mubr.bf16.mxu0 %v2016_v52  ;;  %v2647_v45 = vld [vmem:[%s3330_s1 + $0x3c8] sm:$0xff]  }
  0x47   :  { %1665 = vmatprep.mubr.bf16.mxu1 %v2018_v53  ;;  %v44_v52 = vld [vmem:[%s3331_s0 + $0xe8] sm:$0xff]  ;;  %v2019_v53 = vcombine.low %v35_v48, %v43_v49  ;;  %v54_v48 = vld [vmem:[%s3331_s0 + $0x138] sm:$0xff] }
  0x48   :  { %2389 = vmatpush3.bf16.msra.mxu0 %v2616_v46  ;;  %v2648_v46 = vld [vmem:[%s3330_s1 + $0x308] sm:$0xff]   ;;  %v62_v49 = vld [vmem:[%s3331_s0 + $0x178] sm:$0xff] }
  0x49   :  { %2429 = vmatpush3.bf16.msra.mxu1 %v2617_v47  ;;  %2390 = vmatprep.subr.bf16.mxu0 %v2618_v56  ;;  %v2649_v47 = vld [vmem:[%s3330_s1 + $0x388] sm:$0xff]   ;;  %v2650_v56 = vld [vmem:[%s3330_s1 + $0x350] sm:$0xff]  }
  0x4a   :  { %2430 = vmatprep.subr.bf16.mxu1 %v2619_v57  ;;  %v2651_v57 = vld [vmem:[%s3330_s1 + $0x3d0] sm:$0xff]  }
  0x4b   :  { %1601 = vmatmul.mubr.bf16.gmra.mrb[20].mxu0 %v2015_v54  ;;  %v2022_v54 = vcombine.high %v36_v50, %v44_v52 }
  0x4c   :  { %1666 = vmatmul.mubr.bf16.gmra.mrb[20].mxu1 %v2017_v55  ;;  %2391 = vmatpush3.bf16.msra.mxu0 %v2620_v58  ;;  %v2021_v55 = vcombine.low %v36_v50, %v44_v52  ;;  %v2652_v58 = vld [vmem:[%s3330_s1 + $0x310] sm:$0xff]  }
  0x4d   :  { %2431 = vmatpush3.bf16.msra.mxu1 %v2621_v59  ;;  %2392 = vmatprep.subr.bf16.mxu0 %v2622_v60  ;;  %v2653_v59 = vld [vmem:[%s3330_s1 + $0x390] sm:$0xff]   ;;  %v2654_v60 = vld [vmem:[%s3330_s1 + $0x358] sm:$0xff]  }
  0x4e   :  { %2432 = vmatprep.subr.bf16.mxu1 %v2623_v61  ;;  %1608 = vmatprep.mubr.bf16.mxu0 %v2032_v3  ;;  %v2655_v61 = vld [vmem:[%s3330_s1 + $0x3d8] sm:$0xff]   ;;  %v52_v3 = vld [vmem:[%s3331_s0 + $0x128] sm:$0xff] }
  0x4f   :  { %1673 = vmatprep.mubr.bf16.mxu1 %v2034_v6  ;;  %v2038_v6 = vcombine.high %v52_v3, %v60_v4 }
  0x50   :  { %2393 = vmatpush3.bf16.msra.mxu0 %v2624_v62  ;;  %v2656_v62 = vld [vmem:[%s3330_s1 + $0x318] sm:$0xff]  }
  0x51   :  { %2433 = vmatpush3.bf16.msra.mxu1 %v2625_v63  ;;  %2394 = vmatprep.subr.bf16.mxu0 %v2626_v8  ;;  %v2657_v63 = vld [vmem:[%s3330_s1 + $0x398] sm:$0xff]   ;;  %v2658_v8 = vld [vmem:[%s3330_s1 + $0x360] sm:$0xff]  }
  0x52   :  { %2434 = vmatprep.subr.bf16.mxu1 %v2627_v9  ;;  %v2659_v9 = vld [vmem:[%s3330_s1 + $0x3e0] sm:$0xff]  }
  0x53   :  { %1609 = vmatmul.mubr.bf16.gmra.mrb[24].mxu0 %v2031_v5  ;;  %v2035_v5 = vcombine.low %v51_v0, %v59_v1 }
  0x54   :  { %1674 = vmatmul.mubr.bf16.gmra.mrb[24].mxu1 %v2033_v7  ;;  %2395 = vmatpush3.bf16.msra.mxu0 %v2628_v10  ;;  %v2037_v7 = vcombine.low %v52_v3, %v60_v4  ;;  %v2660_v10 = vld [vmem:[%s3330_s1 + $0x320] sm:$0xff]  }
  0x55   :  { %2435 = vmatpush3.bf16.msra.mxu1 %v2629_v11  ;;  %2396 = vmatprep.subr.bf16.mxu0 %v2630_v12  ;;  %v2661_v11 = vld [vmem:[%s3330_s1 + $0x3a0] sm:$0xff]   ;;  %v2662_v12 = vld [vmem:[%s3330_s1 + $0x368] sm:$0xff]  }
  0x56   :  { %2436 = vmatprep.subr.bf16.mxu1 %v2631_v13  ;;  %1616 = vmatprep.mubr.bf16.mxu0 %v2048_v18  ;;  %v2663_v13 = vld [vmem:[%s3330_s1 + $0x3e8] sm:$0xff]  }
  0x57   :  { %1681 = vmatprep.mubr.bf16.mxu1 %v2050_v22  ;;  %v68_v18 = vld [vmem:[%s3331_s0 + $0x1a8] sm:$0xff]  ;;  %v2051_v22 = vcombine.low %v67_v16, %v75_v17 }
  0x58   :  { %2397 = vmatpush3.bf16.msra.mxu0 %v2632_v14  ;;  %v2664_v14 = vld [vmem:[%s3330_s1 + $0x328] sm:$0xff]  }
  0x59   :  { %2437 = vmatpush3.bf16.msra.mxu1 %v2633_v15  ;;  %2398 = vmatprep.subr.bf16.mxu0 %v2634_v24  ;;  %v2665_v15 = vld [vmem:[%s3330_s1 + $0x3a8] sm:$0xff]   ;;  %v2666_v24 = vld [vmem:[%s3330_s1 + $0x370] sm:$0xff]  }
  0x5a   :  { %2438 = vmatprep.subr.bf16.mxu1 %v2635_v25  ;;  %v2667_v25 = vld [vmem:[%s3330_s1 + $0x3f0] sm:$0xff]  }
  0x5b   :  { %1617 = vmatmul.mubr.bf16.gmra.mrb[28].mxu0 %v2047_v21  ;;  %v2054_v21 = vcombine.high %v68_v18, %v76_v19 }
  0x5c   :  { %1682 = vmatmul.mubr.bf16.gmra.mrb[28].mxu1 %v2049_v23  ;;  %2399 = vmatpush3.bf16.msra.mxu0 %v2636_v26  ;;  %v2053_v23 = vcombine.low %v68_v18, %v76_v19  ;;  %v2668_v26 = vld [vmem:[%s3330_s1 + $0x330] sm:$0xff]  }
  0x5d   :  { %2439 = vmatpush3.bf16.msra.mxu1 %v2637_v27  ;;  %2400 = vmatprep.subr.bf16.mxu0 %v2638_v28  ;;  %v2669_v27 = vld [vmem:[%s3330_s1 + $0x3b0] sm:$0xff]   ;;  %v2670_v28 = vld [vmem:[%s3330_s1 + $0x378] sm:$0xff]  }
  0x5e   :  { %2440 = vmatprep.subr.bf16.mxu1 %v2639_v29  ;;  %1722 = vmatprep.mubr.bf16.mxu0 %v2004_v37  ;;  %v2671_v29 = vld [vmem:[%s3330_s1 + $0x3f8] sm:$0xff]  }
  0x5f   :  { %1787 = vmatprep.mubr.bf16.mxu1 %v2006_v39  ;;  %v30_v37 = vld [vmem:[%s3331_s0 + $0x78] sm:$0xff]  ;;  %v45_v39 = vld [vmem:[%s3331_s0 + $0xf0] sm:$0xff] }
  0x60   :  { %2401 = vmatpush3.bf16.msra.mxu0 %v2640_v30  ;;  %v2672_v30 = vld [vmem:[%s3330_s1 + $0x338] sm:$0xff]  }
  0x61   :  { %2441 = vmatpush3.bf16.msra.mxu1 %v2641_v31  ;;  %2466 = vmatprep.subr.bf16.mxu0 %v2642_v40  ;;  %v2673_v31 = vld [vmem:[%s3330_s1 + $0x3b8] sm:$0xff]   ;;  %v2009_v40 = vcombine.low %v22_v34, %v30_v37 }
  0x62   :  { %2506 = vmatprep.subr.bf16.mxu1 %v2643_v41  ;;  %v2010_v41 = vcombine.high %v22_v34, %v30_v37 }
  0x63   :  { %1723 = vmatmul.mubr.bf16.vlgmr.msra.gmra.mrb[32].mxu0 %v2003_v36  ;;  %v2008_v36 = vcombine.high %v21_v32, %v29_v33 }
  0x64   :  { %1788 = vmatmul.mubr.bf16.vlgmr.msra.gmra.mrb[32].mxu1 %v2005_v38  ;;  %2467 = vmatpush3.bf16.msra.mxu0 %v2644_v42  ;;  %v37_v38 = vld [vmem:[%s3331_s0 + $0xb0] sm:$0xff] }
  0x65   :  { %2507 = vmatpush3.bf16.msra.mxu1 %v2645_v43  ;;  %2468 = vmatprep.subr.bf16.mxu0 %v2646_v44  ;;  %v2024_v42 = vcombine.high %v37_v38, %v45_v39  ;;  %v38_v43 = vld [vmem:[%s3331_s0 + $0xb8] sm:$0xff]  ;;  %v2023_v50 = vcombine.low %v37_v38, %v45_v39 }
  0x66   :  { %2508 = vmatprep.subr.bf16.mxu1 %v2647_v45  ;;  %1730 = vmatprep.mubr.bf16.mxu0 %v2020_v51  ;;  %v46_v44 = vld [vmem:[%s3331_s0 + $0xf8] sm:$0xff] }
  0x67   :  { %1795 = vmatprep.mubr.bf16.mxu1 %v2022_v54  ;;  %v2026_v45 = vcombine.high %v38_v43, %v46_v44  ;;  %v2025_v51 = vcombine.low %v38_v43, %v46_v44  ;;  %v69_v54 = vld [vmem:[%s3331_s0 + $0x1b0] sm:$0xff] }
  0x68   :  { %2469 = vmatpush3.bf16.msra.mxu0 %v2648_v46  ;;  %v53_v46 = vld [vmem:[%s3331_s0 + $0x130] sm:$0xff] }
  0x69   :  { %2509 = vmatpush3.bf16.msra.mxu1 %v2649_v47  ;;  %2470 = vmatprep.subr.bf16.mxu0 %v2650_v56  ;;  %v61_v47 = vld [vmem:[%s3331_s0 + $0x170] sm:$0xff]  ;;  %v70_v56 = vld [vmem:[%s3331_s0 + $0x1b8] sm:$0xff] }
  0x6a   :  { %2510 = vmatprep.subr.bf16.mxu1 %v2651_v57  ;;  %v2040_v52 = vcombine.high %v53_v46, %v61_v47  ;;  %v78_v57 = vld [vmem:[%s3331_s0 + $0x1f8] sm:$0xff] }
  0x6b   :  { %1731 = vmatmul.mubr.bf16.gmra.mrb[36].mxu0 %v2019_v53  ;;  %v2042_v53 = vcombine.high %v54_v48, %v62_v49 }
  0x6c   :  { %1796 = vmatmul.mubr.bf16.gmra.mrb[36].mxu1 %v2021_v55  ;;  %2471 = vmatpush3.bf16.msra.mxu0 %v2652_v58  ;;  %v77_v55 = vld [vmem:[%s3331_s0 + $0x1f0] sm:$0xff]  ;;  %v2039_v58 = vcombine.low %v53_v46, %v61_v47 }
  0x6d   :  { %2511 = vmatpush3.bf16.msra.mxu1 %v2653_v59  ;;  %2472 = vmatprep.subr.bf16.mxu0 %v2654_v60  ;;  %v2041_v59 = vcombine.low %v54_v48, %v62_v49  ;;  %v2056_v60 = vcombine.high %v69_v54, %v77_v55 }
  0x6e   :  { %2512 = vmatprep.subr.bf16.mxu1 %v2655_v61  ;;  %1738 = vmatprep.mubr.bf16.mxu0 %v2036_v2  ;;  %v2058_v61 = vcombine.high %v70_v56, %v78_v57  ;;  %v1994_v2 = vld [vmem:[%s3332_s2] ss:$0 sm:$0xff] }
  0x6f   :  { %1803 = vmatprep.mubr.bf16.mxu1 %v2038_v6 }
  0x70   :  { %2473 = vmatpush3.bf16.msra.mxu0 %v2656_v62  ;;  %v2055_v62 = vcombine.low %v69_v54, %v77_v55 }
  0x71   :  { %2513 = vmatpush3.bf16.msra.mxu1 %v2657_v63  ;;  %2474 = vmatprep.subr.bf16.mxu0 %v2658_v8  ;;  %v2057_v63 = vcombine.low %v70_v56, %v78_v57 }
  0x72   :  { %2514 = vmatprep.subr.bf16.mxu1 %v2659_v9 }
  0x73   :  { %1739 = vmatmul.mubr.bf16.gmra.mrb[40].mxu0 %v2035_v5 }
  0x74   :  { %1804 = vmatmul.mubr.bf16.gmra.mrb[40].mxu1 %v2037_v7  ;;  %2475 = vmatpush3.bf16.msra.mxu0 %v2660_v10 }
  0x75   :  { %2515 = vmatpush3.bf16.msra.mxu1 %v2661_v11  ;;  %2476 = vmatprep.subr.bf16.mxu0 %v2662_v12 }
  0x76   :  { %2516 = vmatprep.subr.bf16.mxu1 %v2663_v13  ;;  %1746 = vmatprep.mubr.bf16.mxu0 %v2052_v20 }
  0x77   :  { %1811 = vmatprep.mubr.bf16.mxu1 %v2054_v21 }
  0x78   :  { %2477 = vmatpush3.bf16.msra.mxu0 %v2664_v14 }
  0x79   :  { %2517 = vmatpush3.bf16.msra.mxu1 %v2665_v15  ;;  %2478 = vmatprep.subr.bf16.mxu0 %v2666_v24 }
  0x7a   :  { %2518 = vmatprep.subr.bf16.mxu1 %v2667_v25 }
  0x7b   :  { %1747 = vmatmul.mubr.bf16.gmra.mrb[44].mxu0 %v2051_v22 }
  0x7c   :  { %1812 = vmatmul.mubr.bf16.gmra.mrb[44].mxu1 %v2053_v23  ;;  %2479 = vmatpush3.bf16.msra.mxu0 %v2668_v26 }
  0x7d   :  { %2519 = vmatpush3.bf16.msra.mxu1 %v2669_v27  ;;  %2480 = vmatprep.subr.bf16.mxu0 %v2670_v28 }
  0x7e   :  { %2520 = vmatprep.subr.bf16.mxu1 %v2671_v29  ;;  %1852 = vmatprep.mubr.bf16.mxu0 %v2008_v36 }
  0x7f   :  { %1917 = vmatprep.mubr.bf16.mxu1 %v2010_v41 }
  0x80   :  { %2481 = vmatpush3.bf16.msra.mxu0 %v2672_v30 }
  0x81   :  { %2521 = vmatpush3.bf16.msra.mxu1 %v2673_v31 }
  0x83   :  { %1853 = vmatmul.mubr.bf16.vlgmr.msra.gmra.mrb[48].mxu0 %v2007_v35 }
  0x84   :  { %1918 = vmatmul.mubr.bf16.vlgmr.msra.gmra.mrb[48].mxu1 %v2009_v40  ;;  %1860 = vmatprep.mubr.bf16.mxu0 %v2024_v42 }
  0x85   :  { %1925 = vmatprep.mubr.bf16.mxu1 %v2026_v45 }
  0x8b   :  { %1861 = vmatmul.mubr.bf16.gmra.mrb[52].mxu0 %v2023_v50 }
  0x8c   :  { %1926 = vmatmul.mubr.bf16.gmra.mrb[52].mxu1 %v2025_v51  ;;  %1868 = vmatprep.mubr.bf16.mxu0 %v2040_v52 }
  0x8d   :  { %1933 = vmatprep.mubr.bf16.mxu1 %v2042_v53 }
  0x93   :  { %1869 = vmatmul.mubr.bf16.gmra.mrb[56].mxu0 %v2039_v58 }
  0x94   :  { %1934 = vmatmul.mubr.bf16.gmra.mrb[56].mxu1 %v2041_v59  ;;  %1876 = vmatprep.mubr.bf16.mxu0 %v2056_v60 }
  0x95   :  { %1941 = vmatprep.mubr.bf16.mxu1 %v2058_v61 }
  0x9b   :  { %1877 = vmatmul.mubr.bf16.gmra.mrb[60].mxu0 %v2055_v62 }
  0x9c   :  { %1942 = vmatmul.mubr.bf16.gmra.mrb[60].mxu1 %v2057_v63 }
  0xf6   :  { %v2242_v0 = vpop.f32.mrb[0].mxu0 }
  0xf7   :  { %v2282_v1 = vpop.f32.mrb[0].mxu1  ;;  %v2243_v3 = vpop.f32.mrb[1].mxu0 }
  0xf8   :  { %v2244_v4 = vadd.f32 %v2243_v3, %v2242_v0  ;;  %v2283_v5 = vpop.f32.mrb[1].mxu1  ;;  %v2245_v6 = vpop.f32.mrb[2].mxu0 }
  0xf9   :  { %v2284_v7 = vadd.f32 %v2283_v5, %v2282_v1  ;;  %v2285_v8 = vpop.f32.mrb[2].mxu1  ;;  %v2246_v9 = vpop.f32.mrb[3].mxu0 }
  0xfa   :  { %v1465_v10 = vadd.f32 %v2244_v4, %v1994_v2  ;;  %v2247_v11 = vadd.f32 %v2246_v9, %v2245_v6  ;;  %v2286_v12 = vpop.f32.mrb[3].mxu1 }
  0xfb   :  { %v2287_v13 = vadd.f32 %v2286_v12, %v2285_v8 }
  0xfc   :  { %v1530_v14 = vadd.f32 %v2284_v7, %v1465_v10  ;;  %v1468_v15 = vadd.f32 %v2247_v11, %v1994_v2 }
  0xfe   :  { %v3273_v16 = vadd.f32 %v2287_v13, %v1468_v15  ;;  %v2248_v17 = vpop.f32.mrb[4].mxu0 }
  0xff   :  { %v2288_v18 = vpop.f32.mrb[4].mxu1  ;;  %v2249_v19 = vpop.f32.mrb[5].mxu0 }
 0x100   :  { %v2250_v20 = vadd.f32 %v2249_v19, %v2248_v17  ;;  %v2289_v21 = vpop.f32.mrb[5].mxu1  ;;  %v2251_v22 = vpop.f32.mrb[6].mxu0 }
 0x101   :  { %v2290_v23 = vadd.f32 %v2289_v21, %v2288_v18  ;;  %v2291_v24 = vpop.f32.mrb[6].mxu1  ;;  %v2252_v25 = vpop.f32.mrb[7].mxu0 }
 0x102   :  { %v1473_v26 = vadd.f32 %v2250_v20, %v1994_v2  ;;  %v2253_v27 = vadd.f32 %v2252_v25, %v2251_v22  ;;  %v2292_v28 = vpop.f32.mrb[7].mxu1 }
 0x103   :  { %v2293_v29 = vadd.f32 %v2292_v28, %v2291_v24 }
 0x104   :  { %v1538_v30 = vadd.f32 %v2290_v23, %v1473_v26  ;;  %v1476_v31 = vadd.f32 %v2253_v27, %v1994_v2 }
 0x106   :  { %v3275_v32 = vadd.f32 %v2293_v29, %v1476_v31  ;;  %v2254_v33 = vpop.f32.mrb[8].mxu0 }
 0x107   :  { %v2294_v34 = vpop.f32.mrb[8].mxu1  ;;  %v2255_v35 = vpop.f32.mrb[9].mxu0 }
 0x108   :  { %v2295_v36 = vpop.f32.mrb[9].mxu1  ;;  %v2256_v37 = vadd.f32 %v2255_v35, %v2254_v33  ;;  %v2257_v39 = vpop.f32.mrb[10].mxu0 }
 0x109   :  { %v2296_v38 = vadd.f32 %v2295_v36, %v2294_v34  ;;  %v2297_v40 = vpop.f32.mrb[10].mxu1  ;;  %v2258_v41 = vpop.f32.mrb[11].mxu0 }
 0x10a   :  { %v2298_v42 = vpop.f32.mrb[11].mxu1  ;;  %v1481_v43 = vadd.f32 %v2256_v37, %v1994_v2  ;;  %v2259_v44 = vadd.f32 %v2258_v41, %v2257_v39 }
 0x10b   :  { %v2299_v45 = vadd.f32 %v2298_v42, %v2297_v40 }
 0x10c   :  { %v1546_v46 = vadd.f32 %v2296_v38, %v1481_v43  ;;  %v1484_v47 = vadd.f32 %v2259_v44, %v1994_v2 }
 0x10e   :  { %v3277_v48 = vadd.f32 %v2299_v45, %v1484_v47  ;;  %v2260_v49 = vpop.f32.mrb[12].mxu0 }
 0x10f   :  { %v2300_v50 = vpop.f32.mrb[12].mxu1  ;;  %v2261_v51 = vpop.f32.mrb[13].mxu0 }
 0x110   :  { %v2262_v52 = vadd.f32 %v2261_v51, %v2260_v49  ;;  %v2301_v53 = vpop.f32.mrb[13].mxu1  ;;  %v2263_v54 = vpop.f32.mrb[14].mxu0 }
 0x111   :  { %v2302_v55 = vadd.f32 %v2301_v53, %v2300_v50  ;;  %v2303_v56 = vpop.f32.mrb[14].mxu1  ;;  %v2264_v57 = vpop.f32.mrb[15].mxu0 }
 0x112   :  { %v1489_v58 = vadd.f32 %v2262_v52, %v1994_v2  ;;  %v2265_v59 = vadd.f32 %v2264_v57, %v2263_v54  ;;  %v2304_v60 = vpop.f32.mrb[15].mxu1 }
 0x113   :  { %v2305_v61 = vadd.f32 %v2304_v60, %v2303_v56 }
 0x114   :  { %v1554_v62 = vadd.f32 %v2302_v55, %v1489_v58  ;;  %v1492_v63 = vadd.f32 %v2265_v59, %v1994_v2 }
 0x116   :  { %v3279_v0 = vadd.f32 %v2305_v61, %v1492_v63  ;;  %v2322_v1 = vpop.f32.mrb[16].mxu0 }
 0x117   :  { %v2362_v3 = vpop.f32.mrb[16].mxu1  ;;  %v2323_v4 = vpop.f32.mrb[17].mxu0 }
 0x118   :  { %v2324_v5 = vadd.f32 %v2323_v4, %v2322_v1  ;;  %v2363_v6 = vpop.f32.mrb[17].mxu1  ;;  %v2325_v7 = vpop.f32.mrb[18].mxu0 }
 0x119   :  { %v2364_v8 = vadd.f32 %v2363_v6, %v2362_v3  ;;  %v2365_v9 = vpop.f32.mrb[18].mxu1  ;;  %v2326_v10 = vpop.f32.mrb[19].mxu0 }
 0x11a   :  { %v1595_v11 = vadd.f32 %v2324_v5, %v1530_v14  ;;  %v2327_v12 = vadd.f32 %v2326_v10, %v2325_v7  ;;  %v2366_v13 = vpop.f32.mrb[19].mxu1 }
 0x11b   :  { %v2367_v15 = vadd.f32 %v2366_v13, %v2365_v9 }
 0x11c   :  { %v1660_v17 = vadd.f32 %v2364_v8, %v1595_v11  ;;  %v1598_v18 = vadd.f32 %v2327_v12, %v3273_v16 }
 0x11e   :  { %v3282_v19 = vadd.f32 %v2367_v15, %v1598_v18  ;;  %v2328_v2 = vpop.f32.mrb[20].mxu0 }
 0x11f   :  { %v2368_v20 = vpop.f32.mrb[20].mxu1  ;;  %v2329_v21 = vpop.f32.mrb[21].mxu0 }
 0x120   :  { %v2369_v22 = vpop.f32.mrb[21].mxu1  ;;  %v2330_v23 = vadd.f32 %v2329_v21, %v2328_v2  ;;  %v2331_v25 = vpop.f32.mrb[22].mxu0 }
 0x121   :  { %v2370_v24 = vadd.f32 %v2369_v22, %v2368_v20  ;;  %v2371_v26 = vpop.f32.mrb[22].mxu1  ;;  %v2332_v27 = vpop.f32.mrb[23].mxu0 }
 0x122   :  { %v2372_v28 = vpop.f32.mrb[23].mxu1  ;;  %v1603_v29 = vadd.f32 %v2330_v23, %v1538_v30  ;;  %v2333_v14 = vadd.f32 %v2332_v27, %v2331_v25 }
 0x123   :  { %v2373_v31 = vadd.f32 %v2372_v28, %v2371_v26 }
 0x124   :  { %v1668_v33 = vadd.f32 %v2370_v24, %v1603_v29  ;;  %v1606_v34 = vadd.f32 %v2333_v14, %v3275_v32 }
 0x126   :  { %v3285_v35 = vadd.f32 %v2373_v31, %v1606_v34  ;;  %v2334_v16 = vpop.f32.mrb[24].mxu0 }
 0x127   :  { %v2374_v36 = vpop.f32.mrb[24].mxu1  ;;  %v2335_v37 = vpop.f32.mrb[25].mxu0 }
 0x128   :  { %v2336_v38 = vadd.f32 %v2335_v37, %v2334_v16  ;;  %v2375_v39 = vpop.f32.mrb[25].mxu1  ;;  %v2337_v40 = vpop.f32.mrb[26].mxu0 }
 0x129   :  { %v2376_v41 = vadd.f32 %v2375_v39, %v2374_v36  ;;  %v2377_v42 = vpop.f32.mrb[26].mxu1  ;;  %v2338_v43 = vpop.f32.mrb[27].mxu0 }
 0x12a   :  { %v1611_v44 = vadd.f32 %v2336_v38, %v1546_v46  ;;  %v2339_v45 = vadd.f32 %v2338_v43, %v2337_v40  ;;  %v2378_v47 = vpop.f32.mrb[27].mxu1 }
 0x12b   :  { %v2379_v30 = vadd.f32 %v2378_v47, %v2377_v42 }
 0x12c   :  { %v1676_v49 = vadd.f32 %v2376_v41, %v1611_v44  ;;  %v1614_v50 = vadd.f32 %v2339_v45, %v3277_v48 }
 0x12e   :  { %v3288_v51 = vadd.f32 %v2379_v30, %v1614_v50  ;;  %v2340_v32 = vpop.f32.mrb[28].mxu0 }
 0x12f   :  { %v2380_v52 = vpop.f32.mrb[28].mxu1  ;;  %v2341_v53 = vpop.f32.mrb[29].mxu0 }
 0x130   :  { %v2342_v54 = vadd.f32 %v2341_v53, %v2340_v32  ;;  %v2381_v55 = vpop.f32.mrb[29].mxu1  ;;  %v2343_v56 = vpop.f32.mrb[30].mxu0 }
 0x131   :  { %v2382_v57 = vadd.f32 %v2381_v55, %v2380_v52  ;;  %v2383_v58 = vpop.f32.mrb[30].mxu1  ;;  %v2344_v59 = vpop.f32.mrb[31].mxu0 }
 0x132   :  { %v1619_v60 = vadd.f32 %v2342_v54, %v1554_v62  ;;  %v2345_v61 = vadd.f32 %v2344_v59, %v2343_v56  ;;  %v2384_v46 = vpop.f32.mrb[31].mxu1 }
 0x133   :  { %v2385_v63 = vadd.f32 %v2384_v46, %v2383_v58 }
 0x134   :  { %v1684_v1 = vadd.f32 %v2382_v57, %v1619_v60  ;;  %v1622_v3 = vadd.f32 %v2345_v61, %v3279_v0 }
 0x136   :  { %v3291_v4 = vadd.f32 %v2385_v63, %v1622_v3  ;;  %v2402_v48 = vpop.f32.mrb[32].mxu0 }
 0x137   :  { %v2442_v5 = vpop.f32.mrb[32].mxu1  ;;  %v2403_v6 = vpop.f32.mrb[33].mxu0 }
 0x138   :  { %v2443_v7 = vpop.f32.mrb[33].mxu1  ;;  %v2404_v8 = vadd.f32 %v2403_v6, %v2402_v48  ;;  %v2405_v10 = vpop.f32.mrb[34].mxu0 }
 0x139   :  { %v2444_v9 = vadd.f32 %v2443_v7, %v2442_v5  ;;  %v2445_v11 = vpop.f32.mrb[34].mxu1  ;;  %v2406_v12 = vpop.f32.mrb[35].mxu0 }
 0x13a   :  { %v2446_v13 = vpop.f32.mrb[35].mxu1  ;;  %v1725_v15 = vadd.f32 %v2404_v8, %v1660_v17  ;;  %v2407_v62 = vadd.f32 %v2406_v12, %v2405_v10 }
 0x13b   :  { %v2447_v18 = vadd.f32 %v2446_v13, %v2445_v11 }
 0x13c   :  { %v1790_v2 = vadd.f32 %v2444_v9, %v1725_v15  ;;  %v1728_v20 = vadd.f32 %v2407_v62, %v3282_v19 }
 0x13e   :  { %v3294_v21 = vadd.f32 %v2447_v18, %v1728_v20  ;;  %v2408_v0 = vpop.f32.mrb[36].mxu0 }
 0x13f   :  { %v2448_v22 = vpop.f32.mrb[36].mxu1  ;;  %v2409_v23 = vpop.f32.mrb[37].mxu0 }
 0x140   :  { %v2410_v24 = vadd.f32 %v2409_v23, %v2408_v0  ;;  %v2449_v25 = vpop.f32.mrb[37].mxu1  ;;  %v2411_v26 = vpop.f32.mrb[38].mxu0 }
 0x141   :  { %v2450_v27 = vadd.f32 %v2449_v25, %v2448_v22  ;;  %v2451_v28 = vpop.f32.mrb[38].mxu1  ;;  %v2412_v29 = vpop.f32.mrb[39].mxu0 }
 0x142   :  { %v1733_v14 = vadd.f32 %v2410_v24, %v1668_v33  ;;  %v2413_v31 = vadd.f32 %v2412_v29, %v2411_v26  ;;  %v2452_v34 = vpop.f32.mrb[39].mxu1 }
 0x143   :  { %v2453_v17 = vadd.f32 %v2452_v34, %v2451_v28 }
 0x144   :  { %v3296_v16 = vadd.f32 %v2450_v27, %v1733_v14  ;;  %v1736_v36 = vadd.f32 %v2413_v31, %v3285_v35 }
 0x146   :  { %v3299_v19 = vadd.f32 %v2453_v17, %v1736_v36  ;;  %v2414_v37 = vpop.f32.mrb[40].mxu0 }
 0x147   :  { %v2454_v38 = vpop.f32.mrb[40].mxu1  ;;  %v2415_v39 = vpop.f32.mrb[41].mxu0 }
 0x148   :  { %v2416_v40 = vadd.f32 %v2415_v39, %v2414_v37  ;;  %v2455_v41 = vpop.f32.mrb[41].mxu1  ;;  %v2417_v42 = vpop.f32.mrb[42].mxu0 }
 0x149   :  { %v2456_v43 = vadd.f32 %v2455_v41, %v2454_v38  ;;  %v2457_v44 = vpop.f32.mrb[42].mxu1  ;;  %v2418_v45 = vpop.f32.mrb[43].mxu0 }
 0x14a   :  { %v1741_v47 = vadd.f32 %v2416_v40, %v1676_v49  ;;  %v2419_v33 = vadd.f32 %v2418_v45, %v2417_v42  ;;  %v2458_v30 = vpop.f32.mrb[43].mxu1 }
 0x14b   :  { %v2459_v50 = vadd.f32 %v2458_v30, %v2457_v44 }
 0x14c   :  { %v3301_v32 = vadd.f32 %v2456_v43, %v1741_v47  ;;  %v1744_v52 = vadd.f32 %v2419_v33, %v3288_v51 }
 0x14e   :  { %v3304_v35 = vadd.f32 %v2459_v50, %v1744_v52  ;;  %v2420_v53 = vpop.f32.mrb[44].mxu0 }
 0x14f   :  { %v2460_v54 = vpop.f32.mrb[44].mxu1  ;;  %v2421_v55 = vpop.f32.mrb[45].mxu0 }
 0x150   :  { %v2461_v56 = vpop.f32.mrb[45].mxu1  ;;  %v2422_v57 = vadd.f32 %v2421_v55, %v2420_v53  ;;  %v2423_v59 = vpop.f32.mrb[46].mxu0 }
 0x151   :  { %v2462_v58 = vadd.f32 %v2461_v56, %v2460_v54  ;;  %v2463_v60 = vpop.f32.mrb[46].mxu1  ;;  %v2424_v61 = vpop.f32.mrb[47].mxu0 }
 0x152   :  { %v2464_v46 = vpop.f32.mrb[47].mxu1  ;;  %v1749_v49 = vadd.f32 %v2422_v57, %v1684_v1  ;;  %v2425_v63 = vadd.f32 %v2424_v61, %v2423_v59 }
 0x153   :  { %v2465_v3 = vadd.f32 %v2464_v46, %v2463_v60 }
 0x154   :  { %v3306_v48 = vadd.f32 %v2462_v58, %v1749_v49  ;;  %v1752_v5 = vadd.f32 %v2425_v63, %v3291_v4 }
 0x156   :  { %v3309_v51 = vadd.f32 %v2465_v3, %v1752_v5  ;;  %v2482_v6 = vpop.f32.mrb[48].mxu0 }
 0x157   :  { %v2522_v7 = vpop.f32.mrb[48].mxu1  ;;  %v2483_v8 = vpop.f32.mrb[49].mxu0 }
 0x158   :  { %v2484_v9 = vadd.f32 %v2483_v8, %v2482_v6  ;;  %v2523_v10 = vpop.f32.mrb[49].mxu1  ;;  %v2485_v11 = vpop.f32.mrb[50].mxu0 }
 0x159   :  { %v2524_v12 = vadd.f32 %v2523_v10, %v2522_v7  ;;  %v2525_v13 = vpop.f32.mrb[50].mxu1  ;;  %v2486_v15 = vpop.f32.mrb[51].mxu0 }
 0x15a   :  { %v1855_v62 = vadd.f32 %v2484_v9, %v1790_v2  ;;  %v2487_v18 = vadd.f32 %v2486_v15, %v2485_v11  ;;  %v2526_v1 = vpop.f32.mrb[51].mxu1 }
 0x15b   :  { %v2527_v20 = vadd.f32 %v2526_v1, %v2525_v13 }
 0x15c   :  { %v1920_v0 = vadd.f32 %v2524_v12, %v1855_v62  ;;  %v1858_v22 = vadd.f32 %v2487_v18, %v3294_v21 }
 0x15e   :  { %v1923_v23 = vadd.f32 %v2527_v20, %v1858_v22  ;;  %v2488_v4 = vpop.f32.mrb[52].mxu0 }
 0x15f   :  { %v2528_v24 = vpop.f32.mrb[52].mxu1  ;;  %v2489_v25 = vpop.f32.mrb[53].mxu0 }
 0x160   :  { %v2206_v26 = vpack.c.bf16 %v1923_v23, %v1920_v0  ;;  %v2490_v27 = vadd.f32 %v2489_v25, %v2488_v4  ;;  %v2529_v28 = vpop.f32.mrb[53].mxu1  ;;  %v2491_v29 = vpop.f32.mrb[54].mxu0 }
 0x161   :  { %v2530_v14 = vadd.f32 %v2529_v28, %v2528_v24  ;;  %v2531_v31 = vpop.f32.mrb[54].mxu1  ;;  %v2492_v34 = vpop.f32.mrb[55].mxu0 }
 0x162   :  { %2207 = vst [vmem:[%s3333_s3] sm:$0xff] %v2206_v26   ;;  %v1863_v2 = vadd.f32 %v2490_v27, %v3296_v16  ;;  %v2493_v17 = vadd.f32 %v2492_v34, %v2491_v29  ;;  %v2532_v36 = vpop.f32.mrb[55].mxu1 }
 0x163   :  { %v2533_v21 = vadd.f32 %v2532_v36, %v2531_v31 }
 0x164   :  { %v1928_v37 = vadd.f32 %v2530_v14, %v1863_v2  ;;  %v1866_v38 = vadd.f32 %v2493_v17, %v3299_v19 }
 0x166   :  { %v1931_v39 = vadd.f32 %v2533_v21, %v1866_v38  ;;  %v2494_v40 = vpop.f32.mrb[56].mxu0 }
 0x167   :  { %v2534_v41 = vpop.f32.mrb[56].mxu1  ;;  %v2495_v42 = vpop.f32.mrb[57].mxu0 }
 0x168   :  { %v2211_v43 = vpack.c.bf16 %v1931_v39, %v1928_v37  ;;  %v2496_v44 = vadd.f32 %v2495_v42, %v2494_v40  ;;  %v2535_v45 = vpop.f32.mrb[57].mxu1  ;;  %v2497_v47 = vpop.f32.mrb[58].mxu0 }
 0x169   :  { %v2536_v33 = vadd.f32 %v2535_v45, %v2534_v41  ;;  %v2537_v30 = vpop.f32.mrb[58].mxu1  ;;  %v2498_v50 = vpop.f32.mrb[59].mxu0 }
 0x16a   :  { %2223 = vst [vmem:[%s3333_s3 + $0x8] sm:$0xff] %v2211_v43   ;;  %v1871_v16 = vadd.f32 %v2496_v44, %v3301_v32  ;;  %v2499_v52 = vadd.f32 %v2498_v50, %v2497_v47  ;;  %v2538_v53 = vpop.f32.mrb[59].mxu1 }
 0x16b   :  { %v2539_v19 = vadd.f32 %v2538_v53, %v2537_v30 }
 0x16c   :  { %v1936_v54 = vadd.f32 %v2536_v33, %v1871_v16  ;;  %v1874_v55 = vadd.f32 %v2499_v52, %v3304_v35 }
 0x16e   :  { %v1939_v56 = vadd.f32 %v2539_v19, %v1874_v55  ;;  %v2500_v57 = vpop.f32.mrb[60].mxu0 }
 0x16f   :  { %v2540_v58 = vpop.f32.mrb[60].mxu1  ;;  %v2501_v59 = vpop.f32.mrb[61].mxu0 }
 0x170   :  { %v2216_v60 = vpack.c.bf16 %v1939_v56, %v1936_v54  ;;  %v2502_v61 = vadd.f32 %v2501_v59, %v2500_v57  ;;  %v2541_v46 = vpop.f32.mrb[61].mxu1  ;;  %v2503_v49 = vpop.f32.mrb[62].mxu0 }
 0x171   :  { %v2542_v63 = vadd.f32 %v2541_v46, %v2540_v58  ;;  %v2543_v3 = vpop.f32.mrb[62].mxu1  ;;  %v2504_v5 = vpop.f32.mrb[63].mxu0 }
 0x172   :  { %2224 = vst [vmem:[%s3333_s3 + $0x10] sm:$0xff] %v2216_v60   ;;  %v1879_v32 = vadd.f32 %v2502_v61, %v3306_v48  ;;  %v2505_v6 = vadd.f32 %v2504_v5, %v2503_v49  ;;  %v2544_v7 = vpop.f32.mrb[63].mxu1 }
 0x173   :  { %v2545_v35 = vadd.f32 %v2544_v7, %v2543_v3 }
 0x174   :  { %v1944_v8 = vadd.f32 %v2542_v63, %v1879_v32  ;;  %v1882_v9 = vadd.f32 %v2505_v6, %v3309_v51 }
 0x176   :  { %v1947_v10 = vadd.f32 %v2545_v35, %v1882_v9 }
 0x178   :  { %v2221_v11 = vpack.c.bf16 %v1947_v10, %v1944_v8 }
 0x17a   :  { %2225 = vst [vmem:[%s3333_s3 + $0x18] sm:$0xff] %v2221_v11  }

// kernel: conv_forward.5
= control target key start
LH: loop header
LB: loop body
LE: loop exit
PB: predicated region body
PF: predicated region fallthrough
CT: control target
= control target key end

     0   :  { %s352_s1 = inlined_call_operand.vmem [shape: bf16[256,128], index: 1, kind: input, shape index: {}]   ;;  %s353_s0 = inlined_call_operand.vmem [shape: bf16[16,256], index: 0, kind: input, shape index: {}]   ;;  %s354_s2 = inlined_call_operand.vmem [shape: f32[1,128], index: 2, kind: input, shape index: {}]   ;;  %s355_s3 = inlined_call_operand.vmem [shape: f32[16,128], index: 3, kind: output, shape index: {}]  }
   0x1   :  { %v250_v0 = vld [vmem:[%s352_s1 + $0x40] sm:$0xff]   ;;  %v252_v2 = vld [vmem:[%s352_s1 + $0x48] sm:$0xff]   ;;  %v254_v4 = vld [vmem:[%s352_s1 + $0x50] sm:$0xff]  }
   0x2   :  { %v251_v1 = vld [vmem:[%s352_s1] sm:$0xff]   ;;  %228 = vmatprep.subr.bf16.mxu0 %v250_v0  ;;  %v253_v3 = vld [vmem:[%s352_s1 + $0x8] sm:$0xff]   ;;  %v255_v5 = vld [vmem:[%s352_s1 + $0x10] sm:$0xff]  }
   0x3   :  { %229 = vmatpush3.bf16.msra.mxu0 %v251_v1  ;;  %v256_v6 = vld [vmem:[%s352_s1 + $0x58] sm:$0xff]   ;;  %v258_v8 = vld [vmem:[%s352_s1 + $0x60] sm:$0xff]   ;;  %v260_v10 = vld [vmem:[%s352_s1 + $0x68] sm:$0xff]  }
   0x4   :  { %230 = vmatprep.subr.bf16.mxu0 %v252_v2  ;;  %v257_v7 = vld [vmem:[%s352_s1 + $0x18] sm:$0xff]   ;;  %v259_v9 = vld [vmem:[%s352_s1 + $0x20] sm:$0xff]   ;;  %v261_v12 = vld [vmem:[%s352_s1 + $0x28] sm:$0xff]  }
   0x5   :  { %v268_v11 = vld [vmem:[%s353_s0 + $0x4] ss:$8 sps:$4 sm:$0xff]   ;;  %v262_v13 = vld [vmem:[%s352_s1 + $0x70] sm:$0xff]   ;;  %v264_v15 = vld [vmem:[%s352_s1 + $0x78] sm:$0xff]  }
   0x6   :  { %194 = vmatprep.mubr.bf16.mxu0 %v268_v11  ;;  %v263_v14 = vld [vmem:[%s352_s1 + $0x30] sm:$0xff]   ;;  %v265_v16 = vld [vmem:[%s352_s1 + $0x38] sm:$0xff]   ;;  %v266_v17 = vld [vmem:[%s353_s0] ss:$8 sps:$4 sm:$0xff]  }
   0x7   :  { %231 = vmatpush3.bf16.msra.mxu0 %v253_v3  ;;  %v209_v19 = vld [vmem:[%s354_s2] ss:$0 sm:$0xff] }
   0x8   :  { %232 = vmatprep.subr.bf16.mxu0 %v254_v4 }
   0xb   :  { %233 = vmatpush3.bf16.msra.mxu0 %v255_v5 }
   0xc   :  { %234 = vmatprep.subr.bf16.mxu0 %v256_v6 }
   0xf   :  { %235 = vmatpush3.bf16.msra.mxu0 %v257_v7 }
  0x10   :  { %236 = vmatprep.subr.bf16.mxu0 %v258_v8 }
  0x13   :  { %237 = vmatpush3.bf16.msra.mxu0 %v259_v9 }
  0x14   :  { %238 = vmatprep.subr.bf16.mxu0 %v260_v10 }
  0x17   :  { %239 = vmatpush3.bf16.msra.mxu0 %v261_v12 }
  0x18   :  { %240 = vmatprep.subr.bf16.mxu0 %v262_v13 }
  0x1b   :  { %241 = vmatpush3.bf16.msra.mxu0 %v263_v14 }
  0x1c   :  { %242 = vmatprep.subr.bf16.mxu0 %v264_v15 }
  0x1f   :  { %243 = vmatpush3.bf16.msra.mxu0 %v265_v16 }
  0x22   :  { %195 = vmatmul.mubr.bf16.vlgmr.msra.gmra.mrb[0].mxu0 %v266_v17 }
  0xf5   :  { %v244_v18 = vpop.f32.mrb[0].mxu0 }
  0xf6   :  { %v245_v20 = vpop.f32.mrb[1].mxu0 }
  0xf7   :  { %v246_v21 = vadd.f32 %v245_v20, %v244_v18  ;;  %v247_v22 = vpop.f32.mrb[2].mxu0 }
  0xf8   :  { %v248_v23 = vpop.f32.mrb[3].mxu0 }
  0xf9   :  { %v197_v24 = vadd.f32 %v246_v21, %v209_v19  ;;  %v249_v25 = vadd.f32 %v248_v23, %v247_v22 }
  0xfb   :  { %203 = vst [vmem:[%s355_s3] sm:$0xff] %v197_v24  ;;  %v200_v26 = vadd.f32 %v249_v25, %v209_v19 }
  0xfd   :  { %204 = vst [vmem:[%s355_s3 + $0x8] sm:$0xff] %v200_v26 }

</bundles_post_ra>
